<compile_context>
chip_gen: v7x
topology: tpu7x:2x2x1
jax: 0.10.0
libtpu: 0.0.40
codegen_flags: <defaults>
</compile_context>

<pallas_src>
import functools
import math

import jax
import jax.numpy as jnp
from jax import lax
from jax.experimental import pallas as pl
from jax.experimental.pallas import tpu as pltpu


# -----------------------------------------------------------------------------
# Fused kernel: per-head QKV projection + thresholded attention + out projection
# -----------------------------------------------------------------------------
def _fused_attention_kernel(thr_ref, x_ref, wq_ref, bq_ref, wk_ref, bk_ref,
                            wv_ref, bv_ref, wo_ref, bo_ref, o_ref, acc_ref,
                            *, n_heads):
    """One batch element per grid step.

    Ref shapes (leading batch dim squeezed away by the BlockSpec):
      thr_ref : (H,)        SMEM   per-head threshold value
      x_ref   : (T, C)             activations
      wq/wk/wv: (H, C, Dh)         per-head pre-transposed projection weights
                                   (attn_scale already folded into wq / bq)
      bq/bk/bv: (H, 1, Dh)
      wo_ref  : (H, Dh, C)         out-proj weight, pre-transposed, split per head
      bo_ref  : (1, C)
      o_ref   : (T, C)             final output
      acc_ref : (T, C) f32 VMEM    out-projection accumulator scratch
    """
    mm = (((1,), (0,)), ((), ()))   # canonical A @ B (weights pre-transposed on host)
    qk = (((1,), (1,)), ((), ()))   # q · kᵀ without materializing a transpose of k
    cdt = wq_ref.dtype              # matmul compute dtype (f32 default, bf16 optional)
    x = x_ref[...].astype(cdt)      # cast activations once, not per head

    acc_ref[...] = jnp.zeros_like(acc_ref)

    @pl.loop(0, n_heads)
    def _per_head(h):               # dynamic index only on leading (major) dims
        # Per-head projections; attn_scale is pre-folded into wq/bq.
        q = lax.dot_general(x, wq_ref[h], mm,
                            preferred_element_type=jnp.float32) + bq_ref[h]
        k = lax.dot_general(x, wk_ref[h], mm,
                            preferred_element_type=jnp.float32) + bk_ref[h]
        v = lax.dot_general(x, wv_ref[h], mm,
                            preferred_element_type=jnp.float32) + bv_ref[h]

        # Scores stay f32 so the discontinuous threshold compare keeps parity.
        s = lax.dot_general(q, k, qk, preferred_element_type=jnp.float32)   # (T, T)
        s = jnp.where(s < thr_ref[h], jnp.float32(-10000.0), s)

        # Numerically stable softmax; divide goes to the EUP via approx reciprocal.
        m = jnp.max(s, axis=-1, keepdims=True)
        e = jnp.exp(s - m)
        p = e * pl.reciprocal(jnp.sum(e, axis=-1, keepdims=True), approx=True)

        pv = lax.dot_general(p.astype(cdt), v.astype(cdt), mm,
                             preferred_element_type=jnp.float32)            # (T, Dh)

        # Fuse this head's slice of the output projection: accumulate directly into
        # the (T, C) scratch.  No concat, liveness bounded to one head.
        acc_ref[...] += lax.dot_general(pv.astype(cdt), wo_ref[h], mm,
                                        preferred_element_type=jnp.float32)

    o_ref[...] = (acc_ref[...] + bo_ref[...]).astype(o_ref.dtype)


# -----------------------------------------------------------------------------
# One-time (cached) host-side weight preparation
# -----------------------------------------------------------------------------
def prepare_params(params, n_heads, *, matmul_dtype=jnp.float32):
    """Hoisted out of the forward: transpose / split / scale-fold / cast ONCE."""
    C = params["wq"].shape[0]
    Dh = C // n_heads
    scale = params["attn_scale"].reshape(()).astype(jnp.float32)

    def per_head_t(w):   # torch (out, in) -> per-head pre-transposed (H, in=C, Dh)
        return jnp.transpose(w.reshape(n_heads, Dh, C), (0, 2, 1))

    threshold = (jax.nn.sigmoid(params["score_threshold"])
                 * jnp.sqrt(jnp.maximum(params["score_running_var"], 1e-6))
                 ).astype(jnp.float32)

    return dict(
        wq_t=(per_head_t(params["wq"]) * scale).astype(matmul_dtype),  # scale folded
        wk_t=per_head_t(params["wk"]).astype(matmul_dtype),
        wv_t=per_head_t(params["wv"]).astype(matmul_dtype),
        bq=(params["bq"].reshape(n_heads, 1, Dh) * scale).astype(jnp.float32),
        bk=params["bk"].reshape(n_heads, 1, Dh).astype(jnp.float32),
        bv=params["bv"].reshape(n_heads, 1, Dh).astype(jnp.float32),
        wo_t=params["wo"].T.reshape(n_heads, Dh, C).astype(matmul_dtype),
        bo=params["bo"].reshape(1, C).astype(jnp.float32),
        threshold=threshold,
        n_heads=n_heads, head_dim=Dh, embed_dim=C,
    )


# -----------------------------------------------------------------------------
# Pallas call wrapper
# -----------------------------------------------------------------------------
def _attention_call(prepped, x, *, single_buffered):
    B, T, C = x.shape
    H, Dh = prepped["n_heads"], prepped["head_dim"]

    def const_spec(shape):
        rank = len(shape)
        imap = lambda b: (0,) * rank
        if single_buffered:
            # Constant block index -> no need for double buffering (saves VMEM).
            return pl.BlockSpec(shape, imap, pipeline_mode=pl.Buffered(1))
        return pl.BlockSpec(shape, imap)

    in_specs = [
        pl.BlockSpec(memory_space=pltpu.MemorySpace.SMEM),          # threshold (H,)
        pl.BlockSpec((pl.Squeezed(), T, C), lambda b: (b, 0, 0)),   # x
        const_spec((H, C, Dh)), const_spec((H, 1, Dh)),             # Wq, bq (resident)
        const_spec((H, C, Dh)), const_spec((H, 1, Dh)),             # Wk, bk
        const_spec((H, C, Dh)), const_spec((H, 1, Dh)),             # Wv, bv
        const_spec((H, Dh, C)), const_spec((1, C)),                 # Wo, bo
    ]
    out_specs = pl.BlockSpec((pl.Squeezed(), T, C), lambda b: (b, 0, 0))

    # Explicit VMEM budget: weights + double-buffered x/out blocks + scratch +
    # per-head scores temporaries, with headroom.  Cap below v7x's 64 MiB physical.
    w_item = jnp.dtype(prepped["wq_t"].dtype).itemsize
    a_item = jnp.dtype(x.dtype).itemsize
    weight_bytes = 4 * H * C * Dh * w_item + (3 * H * Dh + C) * 4
    if not single_buffered:
        weight_bytes *= 2
    act_bytes = 2 * T * C * a_item * 2                 # x + out, double-buffered
    scratch_bytes = T * C * 4                          # f32 accumulator
    tmp_bytes = 6 * T * T * 4 + 6 * T * Dh * 4         # scores/softmax + q,k,v,pv temps
    vmem_limit = int(2 * (weight_bytes + act_bytes + scratch_bytes + tmp_bytes)) + (16 << 20)
    vmem_limit = min(vmem_limit, 48 << 20)

    kernel = functools.partial(_fused_attention_kernel, n_heads=H)
    return pl.pallas_call(
        kernel,
        out_shape=jax.ShapeDtypeStruct((B, T, C), x.dtype),
        grid_spec=pltpu.PrefetchScalarGridSpec(
            num_scalar_prefetch=0,
            grid=(B,),
            in_specs=in_specs,
            out_specs=out_specs,
            scratch_shapes=[pltpu.VMEM((T, C), jnp.float32)],
        ),
        compiler_params=pltpu.CompilerParams(
            dimension_semantics=("parallel",),
            vmem_limit_bytes=vmem_limit),
    )(
        prepped["threshold"], x,
        prepped["wq_t"], prepped["bq"],
        prepped["wk_t"], prepped["bk"],
        prepped["wv_t"], prepped["bv"],
        prepped["wo_t"], prepped["bo"],
    )


def thresholded_attention_forward(prepped, x):
    """Inference forward of ThresholdedAttention. x: (B, T, C) -> (B, T, C)."""
    try:
        return _attention_call(prepped, x, single_buffered=True)
    except Exception:
        # Fallback for JAX versions without BlockSpec pipeline_mode / Buffered(1):
        # identical kernel, weights just default-double-buffered.
        return _attention_call(prepped, x, single_buffered=False)


# -----------------------------------------------------------------------------
# Parameter init (mirrors nn.Linear defaults loosely) and pure-JAX reference
# -----------------------------------------------------------------------------
def init_params(key, embed_dim, n_heads):
    head_dim = embed_dim // n_heads
    ks = jax.random.split(key, 8)

    def lin(kw, kb):
        bound = 1.0 / math.sqrt(embed_dim)
        w = jax.random.uniform(kw, (embed_dim, embed_dim), jnp.float32, -bound, bound)
        b = jax.random.uniform(kb, (embed_dim,), jnp.float32, -bound, bound)
        return w, b

    wq, bq = lin(ks[0], ks[1])
    wk, bk = lin(ks[2], ks[3])
    wv, bv = lin(ks[4], ks[5])
    wo, bo = lin(ks[6], ks[7])
    return dict(
        wq=wq, bq=bq, wk=wk, bk=bk, wv=wv, bv=bv, wo=wo, bo=bo,
        attn_scale=jnp.full((1,), 1.0 / math.sqrt(head_dim), jnp.float32),
        score_threshold=jnp.full((1,), 0.5, jnp.float32),
        score_running_mean=jnp.zeros((n_heads,), jnp.float32),
        score_running_var=jnp.ones((n_heads,), jnp.float32),
    )


def reference_forward(params, x, n_heads):
    B, T, C = x.shape
    Dh = C // n_heads
    q = (x @ params["wq"].T + params["bq"]).reshape(B, T, n_heads, Dh).transpose(0, 2, 1, 3)
    k = (x @ params["wk"].T + params["bk"]).reshape(B, T, n_heads, Dh).transpose(0, 2, 1, 3)
    v = (x @ params["wv"].T + params["bv"]).reshape(B, T, n_heads, Dh).transpose(0, 2, 1, 3)
    scores = jnp.einsum("bhqd,bhkd->bhqk", q, k) * params["attn_scale"]
    thr = jax.nn.sigmoid(params["score_threshold"]) * jnp.sqrt(
        jnp.maximum(params["score_running_var"], 1e-6))
    scores = jnp.where(scores < thr.reshape(1, n_heads, 1, 1), -10000.0, scores)
    w = jax.nn.softmax(scores, axis=-1)
    o = jnp.einsum("bhqk,bhkd->bhqd", w, v).transpose(0, 2, 1, 3).reshape(B, T, C)
    return o @ params["wo"].T + params["bo"]


if __name__ == "__main__":
    # Lane-dense demo shapes per the perf review: C=128 (unmasked lane stores),
    # head_dim=64, T=128.  Still small / fast, deterministic.
    B, T, C, H = 2, 128, 128, 2

    key = jax.random.PRNGKey(0)
    k_param, k_x = jax.random.split(key)
    params = init_params(k_param, C, H)
    x = jax.random.normal(k_x, (B, T, C), jnp.float32)

    prepped = prepare_params(params, H)                 # one-time cached weight prep
    out = thresholded_attention_forward(prepped, x)
    out = jax.block_until_ready(out)
    assert out.shape == (B, T, C)

    # f32 reference (PyTorch parity): use true-f32 matmuls for the comparison.
    with jax.default_matmul_precision("highest"):
        ref = reference_forward(params, x, H)
        # The hard compare (scores < thr) is discontinuous: query rows whose reference
        # scores land within eps of the threshold can legitimately flip the mask bit
        # under f32 matmul rounding differences, so exclude them from the check.
        Dh = C // H
        q = (x @ params["wq"].T + params["bq"]).reshape(B, T, H, Dh).transpose(0, 2, 1, 3)
        k = (x @ params["wk"].T + params["bk"]).reshape(B, T, H, Dh).transpose(0, 2, 1, 3)
        scores = jnp.einsum("bhqd,bhkd->bhqk", q, k) * params["attn_scale"]
    thr = (jax.nn.sigmoid(params["score_threshold"])
           * jnp.sqrt(jnp.maximum(params["score_running_var"], 1e-6)))
    near = jnp.abs(scores - thr.reshape(1, H, 1, 1)) < 1e-3
    safe_rows = ~jnp.any(near, axis=(1, 3))                      # (B, T)
    assert float(jnp.mean(safe_rows.astype(jnp.float32))) > 0.5  # check stays meaningful

    err = jnp.where(safe_rows[:, :, None], jnp.abs(out - ref), 0.0)
    max_err = float(jnp.max(err))
    # Tolerance covers the approx EUP reciprocal and attn_scale folding into Wq.
    assert max_err < 2e-2, f"Pallas output mismatch vs reference: max_err={max_err}"

    print("KERNEL_OK")
</pallas_src>

<mosaic_0001>
module attributes {stable_mosaic.version = 11 : i64} {
  func.func @_fused_attention_kernel(%arg0: i32, %arg1: memref<2xf32, #tpu.memory_space<smem>>, %arg2: memref<1x128x128xf32, #tpu.memory_space<vmem>>, %arg3: memref<2x128x64xf32, #tpu.memory_space<vmem>>, %arg4: memref<2x1x64xf32, #tpu.memory_space<vmem>>, %arg5: memref<2x128x64xf32, #tpu.memory_space<vmem>>, %arg6: memref<2x1x64xf32, #tpu.memory_space<vmem>>, %arg7: memref<2x128x64xf32, #tpu.memory_space<vmem>>, %arg8: memref<2x1x64xf32, #tpu.memory_space<vmem>>, %arg9: memref<2x64x128xf32, #tpu.memory_space<vmem>>, %arg10: memref<1x128xf32, #tpu.memory_space<vmem>>, %arg11: memref<1x128x128xf32, #tpu.memory_space<vmem>>, %arg12: memref<128x128xf32, #tpu.memory_space<vmem>>) attributes {dimension_semantics = [#tpu.dimension_semantics<parallel>], iteration_bounds = array<i64: 2>, scalar_prefetch = 0 : i64, scratch_operands = 1 : i64, tpu.core_type = #tpu.core_type<tc>, window_params = [{transform_indices = @transform_0, window_bounds = array<i64: 2>}, {transform_indices = @transform_1, window_bounds = array<i64: 1, 128, 128>}, {pipeline_mode = #tpu.pipeline_mode<synchronous>, transform_indices = @transform_2, window_bounds = array<i64: 2, 128, 64>}, {pipeline_mode = #tpu.pipeline_mode<synchronous>, transform_indices = @transform_3, window_bounds = array<i64: 2, 1, 64>}, {pipeline_mode = #tpu.pipeline_mode<synchronous>, transform_indices = @transform_4, window_bounds = array<i64: 2, 128, 64>}, {pipeline_mode = #tpu.pipeline_mode<synchronous>, transform_indices = @transform_5, window_bounds = array<i64: 2, 1, 64>}, {pipeline_mode = #tpu.pipeline_mode<synchronous>, transform_indices = @transform_6, window_bounds = array<i64: 2, 128, 64>}, {pipeline_mode = #tpu.pipeline_mode<synchronous>, transform_indices = @transform_7, window_bounds = array<i64: 2, 1, 64>}, {pipeline_mode = #tpu.pipeline_mode<synchronous>, transform_indices = @transform_8, window_bounds = array<i64: 2, 64, 128>}, {pipeline_mode = #tpu.pipeline_mode<synchronous>, transform_indices = @transform_9, window_bounds = array<i64: 1, 128>}, {transform_indices = @transform_10, window_bounds = array<i64: 1, 128, 128>}]} {
    %c0 = arith.constant 0 : index
    %c0_0 = arith.constant 0 : index
    %c0_1 = arith.constant 0 : index
    %0 = vector.load %arg2[%c0, %c0_0, %c0_1] : memref<1x128x128xf32, #tpu.memory_space<vmem>>, vector<1x128x128xf32>
    %1 = vector.shape_cast %0 : vector<1x128x128xf32> to vector<128x128xf32>
    %cst = arith.constant 0.000000e+00 : f32
    %2 = vector.broadcast %cst : f32 to vector<128x128xf32>
    %c0_2 = arith.constant 0 : index
    %c0_3 = arith.constant 0 : index
    %3 = vector.load %arg12[%c0_2, %c0_3] : memref<128x128xf32, #tpu.memory_space<vmem>>, vector<128x128xf32>
    tpu.vector_store %arg12[%c0_2, %c0_3], %2 {strides = array<i32>} : memref<128x128xf32, #tpu.memory_space<vmem>>, vector<128x128xf32>,
    %c0_i32 = arith.constant 0 : i32
    %c2_i32 = arith.constant 2 : i32
    %4 = arith.addi %c0_i32, %c2_i32 : i32
    %c1_i32 = arith.constant 1 : i32
    scf.for %arg13 = %c0_i32 to %4 step %c1_i32  : i32 {
      %c1_i32_12 = arith.constant 1 : i32
      %12 = arith.muli %arg13, %c1_i32_12 : i32
      %c0_i32_13 = arith.constant 0 : i32
      %13 = arith.addi %c0_i32_13, %12 : i32
      %14 = arith.index_cast %13 : i32 to index
      %c0_14 = arith.constant 0 : index
      %c0_15 = arith.constant 0 : index
      %15 = vector.load %arg3[%14, %c0_14, %c0_15] : memref<2x128x64xf32, #tpu.memory_space<vmem>>, vector<1x128x64xf32>
      %16 = vector.shape_cast %15 : vector<1x128x64xf32> to vector<128x64xf32>
      %cst_16 = arith.constant dense<0.000000e+00> : vector<128x64xf32>
      %17 = tpu.matmul %1, %16, %cst_16 {dimension_numbers = #tpu.dot_dimension_numbers<[1], [0], [0], [1], [0, 0, 1, 1], [], []>} : vector<128x128xf32>, vector<128x64xf32>, vector<128x64xf32> -> vector<128x64xf32>
      %18 = arith.index_cast %13 : i32 to index
      %c0_17 = arith.constant 0 : index
      %c0_18 = arith.constant 0 : index
      %19 = vector.load %arg4[%18, %c0_17, %c0_18] : memref<2x1x64xf32, #tpu.memory_space<vmem>>, vector<1x1x64xf32>
      %20 = vector.shape_cast %19 : vector<1x1x64xf32> to vector<1x64xf32>
      %21 = vector.broadcast %20 : vector<1x64xf32> to vector<128x64xf32>
      %22 = arith.addf %17, %21 : vector<128x64xf32>
      %23 = arith.index_cast %13 : i32 to index
      %c0_19 = arith.constant 0 : index
      %c0_20 = arith.constant 0 : index
      %24 = vector.load %arg5[%23, %c0_19, %c0_20] : memref<2x128x64xf32, #tpu.memory_space<vmem>>, vector<1x128x64xf32>
      %25 = vector.shape_cast %24 : vector<1x128x64xf32> to vector<128x64xf32>
      %cst_21 = arith.constant dense<0.000000e+00> : vector<128x64xf32>
      %26 = tpu.matmul %1, %25, %cst_21 {dimension_numbers = #tpu.dot_dimension_numbers<[1], [0], [0], [1], [0, 0, 1, 1], [], []>} : vector<128x128xf32>, vector<128x64xf32>, vector<128x64xf32> -> vector<128x64xf32>
      %27 = arith.index_cast %13 : i32 to index
      %c0_22 = arith.constant 0 : index
      %c0_23 = arith.constant 0 : index
      %28 = vector.load %arg6[%27, %c0_22, %c0_23] : memref<2x1x64xf32, #tpu.memory_space<vmem>>, vector<1x1x64xf32>
      %29 = vector.shape_cast %28 : vector<1x1x64xf32> to vector<1x64xf32>
      %30 = vector.broadcast %29 : vector<1x64xf32> to vector<128x64xf32>
      %31 = arith.addf %26, %30 : vector<128x64xf32>
      %32 = arith.index_cast %13 : i32 to index
      %c0_24 = arith.constant 0 : index
      %c0_25 = arith.constant 0 : index
      %33 = vector.load %arg7[%32, %c0_24, %c0_25] : memref<2x128x64xf32, #tpu.memory_space<vmem>>, vector<1x128x64xf32>
      %34 = vector.shape_cast %33 : vector<1x128x64xf32> to vector<128x64xf32>
      %cst_26 = arith.constant dense<0.000000e+00> : vector<128x64xf32>
      %35 = tpu.matmul %1, %34, %cst_26 {dimension_numbers = #tpu.dot_dimension_numbers<[1], [0], [0], [1], [0, 0, 1, 1], [], []>} : vector<128x128xf32>, vector<128x64xf32>, vector<128x64xf32> -> vector<128x64xf32>
      %36 = arith.index_cast %13 : i32 to index
      %c0_27 = arith.constant 0 : index
      %c0_28 = arith.constant 0 : index
      %37 = vector.load %arg8[%36, %c0_27, %c0_28] : memref<2x1x64xf32, #tpu.memory_space<vmem>>, vector<1x1x64xf32>
      %38 = vector.shape_cast %37 : vector<1x1x64xf32> to vector<1x64xf32>
      %39 = vector.broadcast %38 : vector<1x64xf32> to vector<128x64xf32>
      %40 = arith.addf %35, %39 : vector<128x64xf32>
      %cst_29 = arith.constant dense<0.000000e+00> : vector<128x128xf32>
      %41 = tpu.matmul %22, %31, %cst_29 {dimension_numbers = #tpu.dot_dimension_numbers<[1], [1], [0], [0], [0, 0, 1, 0], [], []>} : vector<128x64xf32>, vector<128x64xf32>, vector<128x128xf32> -> vector<128x128xf32>
      %42 = arith.index_cast %13 : i32 to index
      %43 = memref.load %arg1[%42] : memref<2xf32, #tpu.memory_space<smem>>
      %44 = vector.broadcast %43 : f32 to vector<128x128xf32>
      %45 = arith.cmpf olt, %41, %44 : vector<128x128xf32>
      %cst_30 = arith.constant -1.000000e+04 : f32
      %46 = vector.broadcast %cst_30 : f32 to vector<128x128xf32>
      %47 = arith.select %45, %46, %41 : vector<128x128xi1>, vector<128x128xf32>
      %cst_31 = arith.constant dense<0xFF800000> : vector<128xf32>
      %48 = vector.multi_reduction <maximumf>, %47, %cst_31 [1] : vector<128x128xf32> to vector<128xf32>
      %49 = vector.shape_cast %48 : vector<128xf32> to vector<128x1xf32>
      %50 = vector.broadcast %49 : vector<128x1xf32> to vector<128x128xf32>
      %51 = arith.subf %47, %50 : vector<128x128xf32>
      %52 = math.exp %51 : vector<128x128xf32>
      %cst_32 = arith.constant dense<0.000000e+00> : vector<128xf32>
      %53 = vector.multi_reduction <add>, %52, %cst_32 [1] : vector<128x128xf32> to vector<128xf32>
      %54 = vector.shape_cast %53 : vector<128xf32> to vector<128x1xf32>
      %55 = tpu.reciprocal %54 {approx = true} : vector<128x1xf32> -> vector<128x1xf32>
      %56 = vector.broadcast %55 : vector<128x1xf32> to vector<128x128xf32>
      %57 = arith.mulf %52, %56 : vector<128x128xf32>
      %cst_33 = arith.constant dense<0.000000e+00> : vector<128x64xf32>
      %58 = tpu.matmul %57, %40, %cst_33 {dimension_numbers = #tpu.dot_dimension_numbers<[1], [0], [0], [1], [0, 0, 1, 1], [], []>} : vector<128x128xf32>, vector<128x64xf32>, vector<128x64xf32> -> vector<128x64xf32>
      %c0_34 = arith.constant 0 : index
      %c0_35 = arith.constant 0 : index
      %59 = vector.load %arg12[%c0_34, %c0_35] : memref<128x128xf32, #tpu.memory_space<vmem>>, vector<128x128xf32>
      %60 = arith.index_cast %13 : i32 to index
      %c0_36 = arith.constant 0 : index
      %c0_37 = arith.constant 0 : index
      %61 = vector.load %arg9[%60, %c0_36, %c0_37] : memref<2x64x128xf32, #tpu.memory_space<vmem>>, vector<1x64x128xf32>
      %62 = vector.shape_cast %61 : vector<1x64x128xf32> to vector<64x128xf32>
      %cst_38 = arith.constant dense<0.000000e+00> : vector<128x128xf32>
      %63 = tpu.matmul %58, %62, %cst_38 {dimension_numbers = #tpu.dot_dimension_numbers<[1], [0], [0], [1], [0, 0, 1, 1], [], []>} : vector<128x64xf32>, vector<64x128xf32>, vector<128x128xf32> -> vector<128x128xf32>
      %64 = arith.addf %59, %63 : vector<128x128xf32>
      %c0_39 = arith.constant 0 : index
      %c0_40 = arith.constant 0 : index
      %65 = vector.load %arg12[%c0_39, %c0_40] : memref<128x128xf32, #tpu.memory_space<vmem>>, vector<128x128xf32>
      tpu.vector_store %arg12[%c0_39, %c0_40], %64 {strides = array<i32>} : memref<128x128xf32, #tpu.memory_space<vmem>>, vector<128x128xf32>,
    }
    %c2_i32_4 = arith.constant 2 : i32
    %c0_5 = arith.constant 0 : index
    %c0_6 = arith.constant 0 : index
    %5 = vector.load %arg12[%c0_5, %c0_6] : memref<128x128xf32, #tpu.memory_space<vmem>>, vector<128x128xf32>
    %c0_7 = arith.constant 0 : index
    %c0_8 = arith.constant 0 : index
    %6 = vector.load %arg10[%c0_7, %c0_8] : memref<1x128xf32, #tpu.memory_space<vmem>>, vector<1x128xf32>
    %7 = vector.broadcast %6 : vector<1x128xf32> to vector<128x128xf32>
    %8 = arith.addf %5, %7 : vector<128x128xf32>
    %c0_9 = arith.constant 0 : index
    %c0_10 = arith.constant 0 : index
    %c0_11 = arith.constant 0 : index
    %9 = vector.load %arg11[%c0_9, %c0_10, %c0_11] : memref<1x128x128xf32, #tpu.memory_space<vmem>>, vector<1x128x128xf32>
    %10 = vector.shape_cast %9 : vector<1x128x128xf32> to vector<128x128xf32>
    %11 = vector.shape_cast %8 : vector<128x128xf32> to vector<1x128x128xf32>
    tpu.vector_store %arg11[%c0_9, %c0_10, %c0_11], %11 {strides = array<i32>} : memref<1x128x128xf32, #tpu.memory_space<vmem>>, vector<1x128x128xf32>,
    return
  }
  func.func @transform_0(%arg0: i32) -> i32 {
    %c0_i32 = arith.constant 0 : i32
    %c0_i32_0 = arith.constant 0 : i32
    return %c0_i32 : i32
  }
  func.func @transform_1(%arg0: i32) -> (i32, i32, i32) {
    %c0_i32 = arith.constant 0 : i32
    %c0_i32_0 = arith.constant 0 : i32
    %c0_i32_1 = arith.constant 0 : i32
    return %arg0, %c0_i32, %c0_i32_0 : i32, i32, i32
  }
  func.func @transform_2(%arg0: i32) -> (i32, i32, i32) {
    %c0_i32 = arith.constant 0 : i32
    %c0_i32_0 = arith.constant 0 : i32
    %c0_i32_1 = arith.constant 0 : i32
    %c0_i32_2 = arith.constant 0 : i32
    return %c0_i32, %c0_i32_0, %c0_i32_1 : i32, i32, i32
  }
  func.func @transform_3(%arg0: i32) -> (i32, i32, i32) {
    %c0_i32 = arith.constant 0 : i32
    %c0_i32_0 = arith.constant 0 : i32
    %c0_i32_1 = arith.constant 0 : i32
    %c0_i32_2 = arith.constant 0 : i32
    return %c0_i32, %c0_i32_0, %c0_i32_1 : i32, i32, i32
  }
  func.func @transform_4(%arg0: i32) -> (i32, i32, i32) {
    %c0_i32 = arith.constant 0 : i32
    %c0_i32_0 = arith.constant 0 : i32
    %c0_i32_1 = arith.constant 0 : i32
    %c0_i32_2 = arith.constant 0 : i32
    return %c0_i32, %c0_i32_0, %c0_i32_1 : i32, i32, i32
  }
  func.func @transform_5(%arg0: i32) -> (i32, i32, i32) {
    %c0_i32 = arith.constant 0 : i32
    %c0_i32_0 = arith.constant 0 : i32
    %c0_i32_1 = arith.constant 0 : i32
    %c0_i32_2 = arith.constant 0 : i32
    return %c0_i32, %c0_i32_0, %c0_i32_1 : i32, i32, i32
  }
  func.func @transform_6(%arg0: i32) -> (i32, i32, i32) {
    %c0_i32 = arith.constant 0 : i32
    %c0_i32_0 = arith.constant 0 : i32
    %c0_i32_1 = arith.constant 0 : i32
    %c0_i32_2 = arith.constant 0 : i32
    return %c0_i32, %c0_i32_0, %c0_i32_1 : i32, i32, i32
  }
  func.func @transform_7(%arg0: i32) -> (i32, i32, i32) {
    %c0_i32 = arith.constant 0 : i32
    %c0_i32_0 = arith.constant 0 : i32
    %c0_i32_1 = arith.constant 0 : i32
    %c0_i32_2 = arith.constant 0 : i32
    return %c0_i32, %c0_i32_0, %c0_i32_1 : i32, i32, i32
  }
  func.func @transform_8(%arg0: i32) -> (i32, i32, i32) {
    %c0_i32 = arith.constant 0 : i32
    %c0_i32_0 = arith.constant 0 : i32
    %c0_i32_1 = arith.constant 0 : i32
    %c0_i32_2 = arith.constant 0 : i32
    return %c0_i32, %c0_i32_0, %c0_i32_1 : i32, i32, i32
  }
  func.func @transform_9(%arg0: i32) -> (i32, i32) {
    %c0_i32 = arith.constant 0 : i32
    %c0_i32_0 = arith.constant 0 : i32
    %c0_i32_1 = arith.constant 0 : i32
    return %c0_i32, %c0_i32_0 : i32, i32
  }
  func.func @transform_10(%arg0: i32) -> (i32, i32, i32) {
    %c0_i32 = arith.constant 0 : i32
    %c0_i32_0 = arith.constant 0 : i32
    %c0_i32_1 = arith.constant 0 : i32
    return %arg0, %c0_i32, %c0_i32_0 : i32, i32, i32
  }
}

module attributes {stable_mosaic.version = 11 : i64} {
  func.func @_fused_attention_kernel(%arg0: i32, %arg1: memref<2xf32, #tpu.memory_space<smem>>, %arg2: memref<1x128x128xf32, #tpu.memory_space<vmem>>, %arg3: memref<2x128x64xf32, #tpu.memory_space<vmem>>, %arg4: memref<2x1x64xf32, #tpu.memory_space<vmem>>, %arg5: memref<2x128x64xf32, #tpu.memory_space<vmem>>, %arg6: memref<2x1x64xf32, #tpu.memory_space<vmem>>, %arg7: memref<2x128x64xf32, #tpu.memory_space<vmem>>, %arg8: memref<2x1x64xf32, #tpu.memory_space<vmem>>, %arg9: memref<2x64x128xf32, #tpu.memory_space<vmem>>, %arg10: memref<1x128xf32, #tpu.memory_space<vmem>>, %arg11: memref<1x128x128xf32, #tpu.memory_space<vmem>>, %arg12: memref<128x128xf32, #tpu.memory_space<vmem>>) attributes {dimension_semantics = [#tpu.dimension_semantics<parallel>], iteration_bounds = array<i64: 2>, scalar_prefetch = 0 : i64, scratch_operands = 1 : i64, tpu.core_type = #tpu.core_type<tc>, window_params = [{transform_indices = @transform_0, window_bounds = array<i64: 2>}, {transform_indices = @transform_1, window_bounds = array<i64: 1, 128, 128>}, {pipeline_mode = #tpu.pipeline_mode<synchronous>, transform_indices = @transform_2, window_bounds = array<i64: 2, 128, 64>}, {pipeline_mode = #tpu.pipeline_mode<synchronous>, transform_indices = @transform_3, window_bounds = array<i64: 2, 1, 64>}, {pipeline_mode = #tpu.pipeline_mode<synchronous>, transform_indices = @transform_4, window_bounds = array<i64: 2, 128, 64>}, {pipeline_mode = #tpu.pipeline_mode<synchronous>, transform_indices = @transform_5, window_bounds = array<i64: 2, 1, 64>}, {pipeline_mode = #tpu.pipeline_mode<synchronous>, transform_indices = @transform_6, window_bounds = array<i64: 2, 128, 64>}, {pipeline_mode = #tpu.pipeline_mode<synchronous>, transform_indices = @transform_7, window_bounds = array<i64: 2, 1, 64>}, {pipeline_mode = #tpu.pipeline_mode<synchronous>, transform_indices = @transform_8, window_bounds = array<i64: 2, 64, 128>}, {pipeline_mode = #tpu.pipeline_mode<synchronous>, transform_indices = @transform_9, window_bounds = array<i64: 1, 128>}, {transform_indices = @transform_10, window_bounds = array<i64: 1, 128, 128>}]} {
    %c0 = arith.constant 0 : index
    %c0_0 = arith.constant 0 : index
    %c0_1 = arith.constant 0 : index
    %0 = vector.load %arg2[%c0, %c0_0, %c0_1] : memref<1x128x128xf32, #tpu.memory_space<vmem>>, vector<1x128x128xf32>
    %1 = vector.shape_cast %0 : vector<1x128x128xf32> to vector<128x128xf32>
    %cst = arith.constant 0.000000e+00 : f32
    %2 = vector.broadcast %cst : f32 to vector<128x128xf32>
    %c0_2 = arith.constant 0 : index
    %c0_3 = arith.constant 0 : index
    %3 = vector.load %arg12[%c0_2, %c0_3] : memref<128x128xf32, #tpu.memory_space<vmem>>, vector<128x128xf32>
    tpu.vector_store %arg12[%c0_2, %c0_3], %2 {strides = array<i32>} : memref<128x128xf32, #tpu.memory_space<vmem>>, vector<128x128xf32>,
    %c0_i32 = arith.constant 0 : i32
    %c2_i32 = arith.constant 2 : i32
    %4 = arith.addi %c0_i32, %c2_i32 : i32
    %c1_i32 = arith.constant 1 : i32
    scf.for %arg13 = %c0_i32 to %4 step %c1_i32  : i32 {
      %c1_i32_12 = arith.constant 1 : i32
      %12 = arith.muli %arg13, %c1_i32_12 : i32
      %c0_i32_13 = arith.constant 0 : i32
      %13 = arith.addi %c0_i32_13, %12 : i32
      %14 = arith.index_cast %13 : i32 to index
      %c0_14 = arith.constant 0 : index
      %c0_15 = arith.constant 0 : index
      %15 = vector.load %arg3[%14, %c0_14, %c0_15] : memref<2x128x64xf32, #tpu.memory_space<vmem>>, vector<1x128x64xf32>
      %16 = vector.shape_cast %15 : vector<1x128x64xf32> to vector<128x64xf32>
      %cst_16 = arith.constant dense<0.000000e+00> : vector<128x64xf32>
      %17 = tpu.matmul %1, %16, %cst_16 {dimension_numbers = #tpu.dot_dimension_numbers<[1], [0], [0], [1], [0, 0, 1, 1], [], []>} : vector<128x128xf32>, vector<128x64xf32>, vector<128x64xf32> -> vector<128x64xf32>
      %18 = arith.index_cast %13 : i32 to index
      %c0_17 = arith.constant 0 : index
      %c0_18 = arith.constant 0 : index
      %19 = vector.load %arg4[%18, %c0_17, %c0_18] : memref<2x1x64xf32, #tpu.memory_space<vmem>>, vector<1x1x64xf32>
      %20 = vector.shape_cast %19 : vector<1x1x64xf32> to vector<1x64xf32>
      %21 = vector.broadcast %20 : vector<1x64xf32> to vector<128x64xf32>
      %22 = arith.addf %17, %21 : vector<128x64xf32>
      %23 = arith.index_cast %13 : i32 to index
      %c0_19 = arith.constant 0 : index
      %c0_20 = arith.constant 0 : index
      %24 = vector.load %arg5[%23, %c0_19, %c0_20] : memref<2x128x64xf32, #tpu.memory_space<vmem>>, vector<1x128x64xf32>
      %25 = vector.shape_cast %24 : vector<1x128x64xf32> to vector<128x64xf32>
      %cst_21 = arith.constant dense<0.000000e+00> : vector<128x64xf32>
      %26 = tpu.matmul %1, %25, %cst_21 {dimension_numbers = #tpu.dot_dimension_numbers<[1], [0], [0], [1], [0, 0, 1, 1], [], []>} : vector<128x128xf32>, vector<128x64xf32>, vector<128x64xf32> -> vector<128x64xf32>
      %27 = arith.index_cast %13 : i32 to index
      %c0_22 = arith.constant 0 : index
      %c0_23 = arith.constant 0 : index
      %28 = vector.load %arg6[%27, %c0_22, %c0_23] : memref<2x1x64xf32, #tpu.memory_space<vmem>>, vector<1x1x64xf32>
      %29 = vector.shape_cast %28 : vector<1x1x64xf32> to vector<1x64xf32>
      %30 = vector.broadcast %29 : vector<1x64xf32> to vector<128x64xf32>
      %31 = arith.addf %26, %30 : vector<128x64xf32>
      %32 = arith.index_cast %13 : i32 to index
      %c0_24 = arith.constant 0 : index
      %c0_25 = arith.constant 0 : index
      %33 = vector.load %arg7[%32, %c0_24, %c0_25] : memref<2x128x64xf32, #tpu.memory_space<vmem>>, vector<1x128x64xf32>
      %34 = vector.shape_cast %33 : vector<1x128x64xf32> to vector<128x64xf32>
      %cst_26 = arith.constant dense<0.000000e+00> : vector<128x64xf32>
      %35 = tpu.matmul %1, %34, %cst_26 {dimension_numbers = #tpu.dot_dimension_numbers<[1], [0], [0], [1], [0, 0, 1, 1], [], []>} : vector<128x128xf32>, vector<128x64xf32>, vector<128x64xf32> -> vector<128x64xf32>
      %36 = arith.index_cast %13 : i32 to index
      %c0_27 = arith.constant 0 : index
      %c0_28 = arith.constant 0 : index
      %37 = vector.load %arg8[%36, %c0_27, %c0_28] : memref<2x1x64xf32, #tpu.memory_space<vmem>>, vector<1x1x64xf32>
      %38 = vector.shape_cast %37 : vector<1x1x64xf32> to vector<1x64xf32>
      %39 = vector.broadcast %38 : vector<1x64xf32> to vector<128x64xf32>
      %40 = arith.addf %35, %39 : vector<128x64xf32>
      %cst_29 = arith.constant dense<0.000000e+00> : vector<128x128xf32>
      %41 = tpu.matmul %22, %31, %cst_29 {dimension_numbers = #tpu.dot_dimension_numbers<[1], [1], [0], [0], [0, 0, 1, 0], [], []>} : vector<128x64xf32>, vector<128x64xf32>, vector<128x128xf32> -> vector<128x128xf32>
      %42 = arith.index_cast %13 : i32 to index
      %43 = memref.load %arg1[%42] : memref<2xf32, #tpu.memory_space<smem>>
      %44 = vector.broadcast %43 : f32 to vector<128x128xf32>
      %45 = arith.cmpf olt, %41, %44 : vector<128x128xf32>
      %cst_30 = arith.constant -1.000000e+04 : f32
      %46 = vector.broadcast %cst_30 : f32 to vector<128x128xf32>
      %47 = arith.select %45, %46, %41 : vector<128x128xi1>, vector<128x128xf32>
      %cst_31 = arith.constant dense<0xFF800000> : vector<128xf32>
      %48 = vector.multi_reduction <maximumf>, %47, %cst_31 [1] : vector<128x128xf32> to vector<128xf32>
      %49 = vector.shape_cast %48 : vector<128xf32> to vector<128x1xf32>
      %50 = vector.broadcast %49 : vector<128x1xf32> to vector<128x128xf32>
      %51 = arith.subf %47, %50 : vector<128x128xf32>
      %52 = math.exp %51 : vector<128x128xf32>
      %cst_32 = arith.constant dense<0.000000e+00> : vector<128xf32>
      %53 = vector.multi_reduction <add>, %52, %cst_32 [1] : vector<128x128xf32> to vector<128xf32>
      %54 = vector.shape_cast %53 : vector<128xf32> to vector<128x1xf32>
      %55 = tpu.reciprocal %54 {approx = true} : vector<128x1xf32> -> vector<128x1xf32>
      %56 = vector.broadcast %55 : vector<128x1xf32> to vector<128x128xf32>
      %57 = arith.mulf %52, %56 : vector<128x128xf32>
      %cst_33 = arith.constant dense<0.000000e+00> : vector<128x64xf32>
      %58 = tpu.matmul %57, %40, %cst_33 {dimension_numbers = #tpu.dot_dimension_numbers<[1], [0], [0], [1], [0, 0, 1, 1], [], []>} : vector<128x128xf32>, vector<128x64xf32>, vector<128x64xf32> -> vector<128x64xf32>
      %c0_34 = arith.constant 0 : index
      %c0_35 = arith.constant 0 : index
      %59 = vector.load %arg12[%c0_34, %c0_35] : memref<128x128xf32, #tpu.memory_space<vmem>>, vector<128x128xf32>
      %60 = arith.index_cast %13 : i32 to index
      %c0_36 = arith.constant 0 : index
      %c0_37 = arith.constant 0 : index
      %61 = vector.load %arg9[%60, %c0_36, %c0_37] : memref<2x64x128xf32, #tpu.memory_space<vmem>>, vector<1x64x128xf32>
      %62 = vector.shape_cast %61 : vector<1x64x128xf32> to vector<64x128xf32>
      %cst_38 = arith.constant dense<0.000000e+00> : vector<128x128xf32>
      %63 = tpu.matmul %58, %62, %cst_38 {dimension_numbers = #tpu.dot_dimension_numbers<[1], [0], [0], [1], [0, 0, 1, 1], [], []>} : vector<128x64xf32>, vector<64x128xf32>, vector<128x128xf32> -> vector<128x128xf32>
      %64 = arith.addf %59, %63 : vector<128x128xf32>
      %c0_39 = arith.constant 0 : index
      %c0_40 = arith.constant 0 : index
      %65 = vector.load %arg12[%c0_39, %c0_40] : memref<128x128xf32, #tpu.memory_space<vmem>>, vector<128x128xf32>
      tpu.vector_store %arg12[%c0_39, %c0_40], %64 {strides = array<i32>} : memref<128x128xf32, #tpu.memory_space<vmem>>, vector<128x128xf32>,
    }
    %c2_i32_4 = arith.constant 2 : i32
    %c0_5 = arith.constant 0 : index
    %c0_6 = arith.constant 0 : index
    %5 = vector.load %arg12[%c0_5, %c0_6] : memref<128x128xf32, #tpu.memory_space<vmem>>, vector<128x128xf32>
    %c0_7 = arith.constant 0 : index
    %c0_8 = arith.constant 0 : index
    %6 = vector.load %arg10[%c0_7, %c0_8] : memref<1x128xf32, #tpu.memory_space<vmem>>, vector<1x128xf32>
    %7 = vector.broadcast %6 : vector<1x128xf32> to vector<128x128xf32>
    %8 = arith.addf %5, %7 : vector<128x128xf32>
    %c0_9 = arith.constant 0 : index
    %c0_10 = arith.constant 0 : index
    %c0_11 = arith.constant 0 : index
    %9 = vector.load %arg11[%c0_9, %c0_10, %c0_11] : memref<1x128x128xf32, #tpu.memory_space<vmem>>, vector<1x128x128xf32>
    %10 = vector.shape_cast %9 : vector<1x128x128xf32> to vector<128x128xf32>
    %11 = vector.shape_cast %8 : vector<128x128xf32> to vector<1x128x128xf32>
    tpu.vector_store %arg11[%c0_9, %c0_10, %c0_11], %11 {strides = array<i32>} : memref<1x128x128xf32, #tpu.memory_space<vmem>>, vector<1x128x128xf32>,
    return
  }
  func.func @transform_0(%arg0: i32) -> i32 {
    %c0_i32 = arith.constant 0 : i32
    %c0_i32_0 = arith.constant 0 : i32
    return %c0_i32 : i32
  }
  func.func @transform_1(%arg0: i32) -> (i32, i32, i32) {
    %c0_i32 = arith.constant 0 : i32
    %c0_i32_0 = arith.constant 0 : i32
    %c0_i32_1 = arith.constant 0 : i32
    return %arg0, %c0_i32, %c0_i32_0 : i32, i32, i32
  }
  func.func @transform_2(%arg0: i32) -> (i32, i32, i32) {
    %c0_i32 = arith.constant 0 : i32
    %c0_i32_0 = arith.constant 0 : i32
    %c0_i32_1 = arith.constant 0 : i32
    %c0_i32_2 = arith.constant 0 : i32
    return %c0_i32, %c0_i32_0, %c0_i32_1 : i32, i32, i32
  }
  func.func @transform_3(%arg0: i32) -> (i32, i32, i32) {
    %c0_i32 = arith.constant 0 : i32
    %c0_i32_0 = arith.constant 0 : i32
    %c0_i32_1 = arith.constant 0 : i32
    %c0_i32_2 = arith.constant 0 : i32
    return %c0_i32, %c0_i32_0, %c0_i32_1 : i32, i32, i32
  }
  func.func @transform_4(%arg0: i32) -> (i32, i32, i32) {
    %c0_i32 = arith.constant 0 : i32
    %c0_i32_0 = arith.constant 0 : i32
    %c0_i32_1 = arith.constant 0 : i32
    %c0_i32_2 = arith.constant 0 : i32
    return %c0_i32, %c0_i32_0, %c0_i32_1 : i32, i32, i32
  }
  func.func @transform_5(%arg0: i32) -> (i32, i32, i32) {
    %c0_i32 = arith.constant 0 : i32
    %c0_i32_0 = arith.constant 0 : i32
    %c0_i32_1 = arith.constant 0 : i32
    %c0_i32_2 = arith.constant 0 : i32
    return %c0_i32, %c0_i32_0, %c0_i32_1 : i32, i32, i32
  }
  func.func @transform_6(%arg0: i32) -> (i32, i32, i32) {
    %c0_i32 = arith.constant 0 : i32
    %c0_i32_0 = arith.constant 0 : i32
    %c0_i32_1 = arith.constant 0 : i32
    %c0_i32_2 = arith.constant 0 : i32
    return %c0_i32, %c0_i32_0, %c0_i32_1 : i32, i32, i32
  }
  func.func @transform_7(%arg0: i32) -> (i32, i32, i32) {
    %c0_i32 = arith.constant 0 : i32
    %c0_i32_0 = arith.constant 0 : i32
    %c0_i32_1 = arith.constant 0 : i32
    %c0_i32_2 = arith.constant 0 : i32
    return %c0_i32, %c0_i32_0, %c0_i32_1 : i32, i32, i32
  }
  func.func @transform_8(%arg0: i32) -> (i32, i32, i32) {
    %c0_i32 = arith.constant 0 : i32
    %c0_i32_0 = arith.constant 0 : i32
    %c0_i32_1 = arith.constant 0 : i32
    %c0_i32_2 = arith.constant 0 : i32
    return %c0_i32, %c0_i32_0, %c0_i32_1 : i32, i32, i32
  }
  func.func @transform_9(%arg0: i32) -> (i32, i32) {
    %c0_i32 = arith.constant 0 : i32
    %c0_i32_0 = arith.constant 0 : i32
    %c0_i32_1 = arith.constant 0 : i32
    return %c0_i32, %c0_i32_0 : i32, i32
  }
  func.func @transform_10(%arg0: i32) -> (i32, i32, i32) {
    %c0_i32 = arith.constant 0 : i32
    %c0_i32_0 = arith.constant 0 : i32
    %c0_i32_1 = arith.constant 0 : i32
    return %arg0, %c0_i32, %c0_i32_0 : i32, i32, i32
  }
}

</mosaic_0001>

<bundles_post_ra>
// kernel: tpu_custom_call.1
= control target key start
LH: loop header
LB: loop body
LE: loop exit
PB: predicated region body
PF: predicated region fallthrough
CT: control target
= control target key end

     0   :  { %15 = vsyncpa [#allocation5], 0  ;;  %s3572_s0 = inlined_call_operand.vmem [shape: f32[2], index: 0, kind: input, shape index: {}]   ;;  %s3573_s1 = inlined_call_operand.vmem [shape: f32[2,128,128], index: 1, kind: input, shape index: {}]   ;;  %s3574_s2 = inlined_call_operand.vmem [shape: f32[2,128,64], index: 2, kind: input, shape index: {}]   ;;  %s3575_s3 = inlined_call_operand.vmem [shape: f32[2,1,64], index: 3, kind: input, shape index: {}]   ;;  %s3576_s4 = inlined_call_operand.vmem [shape: f32[2,128,64], index: 4, kind: input, shape index: {}]   ;;  %s3577_s5 = inlined_call_operand.vmem [shape: f32[2,1,64], index: 5, kind: input, shape index: {}]   ;;  %s3578_s6 = inlined_call_operand.vmem [shape: f32[2,128,64], index: 6, kind: input, shape index: {}]   ;;  %s3579_s7 = inlined_call_operand.vmem [shape: f32[2,1,64], index: 7, kind: input, shape index: {}]   ;;  %s3580_s8 = inlined_call_operand.vmem [shape: f32[2,64,128], index: 8, kind: input, shape index: {}]   ;;  %s3581_s9 = inlined_call_operand.vmem [shape: f32[1,128], index: 9, kind: input, shape index: {}]   ;;  %s3582_s10 = inlined_call_operand.hbm [shape: f32[2,128,128], index: 10, kind: output, shape index: {}]  }
   0x1   :  { %16 = vsyncpa [#allocation4], 0 }
   0x2   :  { %18 = vsyncpa [#allocation4 + $0x1], 0  ;;  %s2954_s13 = smov 0   ;;  %s2956_s14 = smov 0  }
   0x3   :  { %s2958_s15 = smov 0   ;;  %s2960_s16 = smov 0  }
   0x4 LB: > { %s2975_s17 = sadd.s32 4294967295, %s2888_s16   ;;  %s1896_s18 = sadd.s32 4294967294, %s2888_s16   ;;  %s2888_s16 = sphi %s2960_s16, %s3591_s16   ;;  %s2884_s15 = sphi %s2958_s15, %s3590_s15   ;;  %s2880_s14 = sphi %s2956_s14, %s3589_s14   ;;  %s2876_s13 = sphi %s2954_s13, %s3588_s13  }
   0x5   : > { %s2979_s19 = sadd.s32 1, %s2888_s16   ;;  %s246_s20 = sadd.s32 1, %s2884_s15 }
   0x6   : > { %s243_s21 = ssub.s32 %s2888_s16, %s2979_s19  ;;  %p256_p0 = scmp.ne.s32.totalorder %s2884_s15, %s2880_s14 }
   0x7   : > { %p244_p1 = scmp.eq.s32.totalorder %s243_s21, 0  ;;  %p257_p2 = scmp.eq.s32.totalorder %s2975_s17, 1 }
   0x8   : > { %p262_p3 = scmp.ne.s32.totalorder %s2880_s14, %s2876_s13  ;;  %p263_p4 = scmp.eq.s32.totalorder %s1896_s18, 1 }
   0x9   : > { %s2990_s22 = scalar_select %p244_p1, %s2884_s15, %s246_s20  }
   0xa   : > { %p2992_p5 = por %p257_p2, %p256_p0  ;;  %p2996_p6 = por %p263_p4, %p262_p3 }
   0xb   : > { %p1897_p7 = scmp.ge.s32.totalorder %s2888_s16, 1  ;;  %p270_p8 = scmp.lt.s32.totalorder %s2888_s16, 3 }
   0xc   : > { %p2692_p9 = scmp.eq.s32.totalorder %s2975_s17, 0  ;;  %s283_s28 = sshll.u32 %s3572_s0, 4  ;;  %s284_s28 = int_to_ptr.vmem [resolvable:$true] %s283_s28 }
   0xd   : > { %p3003_p10 = pnand %p1897_p7, %p270_p8  ;;  %s2803_s29 = scalar_lea.vmem %s284_s28, 16 }
   0xe   : > { %p2804_p13 = scmp.ne.s32.totalorder %s284_s28, %s2803_s29  ;;  %p2811_p3 = scmp.lt.s32.totalorder %s284_s28, %s284_s28 }
   0xf   : > { %p2684_p11 = pneg %p3003_p10  ;;  %p2812_p4 = scmp.lt.s32.totalorder %s2803_s29, %s2803_s29 }
  0x11   : > { %p2685_p12 = pnand %p2692_p9, %p2684_p11  ;;  %p2813_p7 = por %p2812_p4, %p2811_p3 }
  0x13   : > { %p2805_p0 = pneg %p2685_p12 }
  0x15   : > { %p2806_p1 = pnand %p2805_p0, %p2804_p13 }
  0x17   : > { %p2807_p2 = pneg %p2806_p1 }
  0x19   : > { %p2814_p8 = pnand %p2813_p7, %p2807_p2 }
  0x1b   : > { %2817 = shalt.err (!%p2814_p8)
}
  0x1c   : > { %s2894_s30 = smov [#allocation3]   ;;  %328 = sbr.rel (%p3003_p10) target bundleno = 1382 (0x566), region = 60 }
  0x1d   : > { %2687 = dma.vmem_to_smem (!%p2685_p12), %s284_s28, 16, %s2894_s30, [#allocation5]  }
  0x23   : > { %2867 = dma.done.wait (%p2692_p9), [#allocation5], 16  }
  0x24   : > { %2869 = vsyncadd (%p2692_p9), [#allocation5], 4294967280 }
  0x25   : > { %334 = sfence }
  0x26   : > { %s364_s11 = sand.u32 1, %s2880_s14   ;;  %p367_p11 = scmp.lt.s32.totalorder %s2975_s17, 1  ;;  %v2895_v0 = vmov 0.0  }
  0x27   : > { %s3024_s12 = sshll.u32 %s364_s11, 7  ;;  %388 = vst [vmem:[#allocation2] sm:$0xff] %v2895_v0  ;;  %389 = vst [vmem:[#allocation2 + $0x8] sm:$0xff] %v2895_v0  ;;  %s3067_s28 = smov 0  }
  0x28   : > { %390 = vst [vmem:[#allocation2 + $0x10] sm:$0xff] %v2895_v0  ;;  %391 = vst [vmem:[#allocation2 + $0x18] sm:$0xff] %v2895_v0  ;;  %s368_s18 = scalar_select %p367_p11, %s2975_s17, 1 }
  0x29   : > { %392 = vst [vmem:[#allocation2 + $0x20] sm:$0xff] %v2895_v0  ;;  %393 = vst [vmem:[#allocation2 + $0x28] sm:$0xff] %v2895_v0  ;;  %s3065_s27 = scalar_lea.vmem [#allocation6], %s3024_s12 }
  0x2a   : > { %394 = vst [vmem:[#allocation2 + $0x30] sm:$0xff] %v2895_v0  ;;  %395 = vst [vmem:[#allocation2 + $0x38] sm:$0xff] %v2895_v0  ;;  %s1964_s20 = sshll.u32 %s368_s18, 7 }
  0x2b   : > { %396 = vst [vmem:[#allocation2 + $0x40] sm:$0xff] %v2895_v0  ;;  %397 = vst [vmem:[#allocation2 + $0x48] sm:$0xff] %v2895_v0  ;;  %s371_s26 = scalar_lea.vmem %s3573_s1, %s1964_s20 }
  0x2c   : > { %398 = vst [vmem:[#allocation2 + $0x50] sm:$0xff] %v2895_v0  ;;  %399 = vst [vmem:[#allocation2 + $0x58] sm:$0xff] %v2895_v0  ;;  %v3032_v1 = vld [vmem:[%s371_s26] sm:$0xff]  ;;  %v3034_v2 = vld [vmem:[%s371_s26 + $0x8] sm:$0xff] }
  0x2d   : > { %400 = vst [vmem:[#allocation2 + $0x60] sm:$0xff] %v2895_v0  ;;  %401 = vst [vmem:[#allocation2 + $0x68] sm:$0xff] %v2895_v0  ;;  %v3036_v3 = vld [vmem:[%s371_s26 + $0x10] sm:$0xff]  ;;  %v3038_v4 = vld [vmem:[%s371_s26 + $0x18] sm:$0xff] }
  0x2e   : > { %402 = vst [vmem:[#allocation2 + $0x70] sm:$0xff] %v2895_v0  ;;  %403 = vst [vmem:[#allocation2 + $0x78] sm:$0xff] %v2895_v0  ;;  %v3040_v5 = vld [vmem:[%s371_s26 + $0x20] sm:$0xff]  ;;  %v3042_v6 = vld [vmem:[%s371_s26 + $0x28] sm:$0xff] }
  0x2f   : > { %v3044_v7 = vld [vmem:[%s371_s26 + $0x30] sm:$0xff]  ;;  %v3046_v8 = vld [vmem:[%s371_s26 + $0x38] sm:$0xff]  ;;  %v3048_v9 = vld [vmem:[%s371_s26 + $0x40] sm:$0xff] }
  0x30   : > { %v3050_v10 = vld [vmem:[%s371_s26 + $0x48] sm:$0xff]  ;;  %v3052_v11 = vld [vmem:[%s371_s26 + $0x50] sm:$0xff]  ;;  %v3054_v12 = vld [vmem:[%s371_s26 + $0x58] sm:$0xff] }
  0x31   : > { %v3056_v13 = vld [vmem:[%s371_s26 + $0x60] sm:$0xff]  ;;  %v3058_v14 = vld [vmem:[%s371_s26 + $0x68] sm:$0xff]  ;;  %v3060_v15 = vld [vmem:[%s371_s26 + $0x70] sm:$0xff] }
  0x32   : > { %v3062_v16 = vld [vmem:[%s371_s26 + $0x78] sm:$0xff] }
  0x33 LB: >> { %2238 = vmatprep.mubr.f32.mxu1 %v3032_v1  ;;  %2182 = vmatprep.mubr.f32.mxu0 %v3032_v1  ;;  %s3075_s29 = sshll.u32 %s2892_s28, 7  ;;  %s598_s18 = scalar_lea.vmem %s3577_s5, %s2892_s28  ;;  %vm921_vm0 = vcmask 523264   ;;  %s2892_s28 = sphi %s3067_s28, %s409_s28  }
  0x34   : >> { %s3081_s12 = scalar_lea.vmem %s3576_s4, %s3075_s29  ;;  %s3093_s25 = scalar_lea.vmem %s3574_s2, %s3075_s29  ;;  %vm3166_vm1 = vmpackc.low %vm921_vm0, %vm921_vm0 }
  0x35   : >> { %v582_v17 = vld [vmem:[%s3081_s12] sm:$0xff]  ;;  %v583_v18 = vld [vmem:[%s3081_s12 + $0x8] sm:$0xff]  ;;  %v584_v19 = vld [vmem:[%s3081_s12 + $0x10] sm:$0xff]  ;;  %s428_s21 = scalar_lea.vmem %s3575_s3, %s2892_s28  ;;  %s3266_s30 = scalar_lea.vmem %s3578_s6, %s3075_s29 }
  0x36   : >> { %v2502_v20 = vpack.c.bf16 %v583_v18, %v582_v17  ;;  %v585_v21 = vld [vmem:[%s3081_s12 + $0x18] sm:$0xff]  ;;  %v586_v23 = vld [vmem:[%s3081_s12 + $0x20] sm:$0xff]  ;;  %v587_v24 = vld [vmem:[%s3081_s12 + $0x28] sm:$0xff]  ;;  %s1163_s29 = sld [smem:[#allocation3 + %s2892_s28]]  ;;  %s768_s20 = scalar_lea.vmem %s3579_s7, %s2892_s28 }
  0x37   : >> { %v2506_v22 = vpack.c.bf16 %v585_v21, %v584_v19  ;;  %v2510_v25 = vpack.c.bf16 %v587_v24, %v586_v23  ;;  %v588_v26 = vld [vmem:[%s3081_s12 + $0x30] sm:$0xff]  ;;  %v412_v27 = vld [vmem:[%s3093_s25] sm:$0xff]  ;;  %v413_v28 = vld [vmem:[%s3093_s25 + $0x8] sm:$0xff] }
  0x38   : >> { %2503 = vmatprep.subr.bf16.mxu1 %v2502_v20  ;;  %v589_v29 = vld [vmem:[%s3081_s12 + $0x38] sm:$0xff]  ;;  %v2470_v30 = vpack.c.bf16 %v413_v28, %v412_v27  ;;  %v414_v31 = vld [vmem:[%s3093_s25 + $0x10] sm:$0xff]  ;;  %v416_v34 = vld [vmem:[%s3093_s25 + $0x20] sm:$0xff] }
  0x39   : >> { %2505 = vmatpush3.bf16.msra.mxu1 %v2502_v20  ;;  %v415_v32 = vld [vmem:[%s3093_s25 + $0x18] sm:$0xff]  ;;  %v417_v35 = vld [vmem:[%s3093_s25 + $0x28] sm:$0xff]  ;;  %v2514_v36 = vpack.c.bf16 %v589_v29, %v588_v26  ;;  %v590_v37 = vld [vmem:[%s3081_s12 + $0x40] sm:$0xff] }
  0x3a   : >> { %2507 = vmatprep.subr.bf16.mxu1 %v2506_v22  ;;  %v2474_v33 = vpack.c.bf16 %v415_v32, %v414_v31  ;;  %2471 = vmatprep.subr.bf16.mxu0 %v2470_v30  ;;  %v591_v38 = vld [vmem:[%s3081_s12 + $0x48] sm:$0xff]  ;;  %v2478_v39 = vpack.c.bf16 %v417_v35, %v416_v34  ;;  %v418_v40 = vld [vmem:[%s3093_s25 + $0x30] sm:$0xff]  ;;  %v419_v41 = vld [vmem:[%s3093_s25 + $0x38] sm:$0xff] }
  0x3b   : >> { %2473 = vmatpush3.bf16.msra.mxu0 %v2470_v30  ;;  %v2518_v42 = vpack.c.bf16 %v591_v38, %v590_v37  ;;  %v592_v43 = vld [vmem:[%s3081_s12 + $0x50] sm:$0xff]  ;;  %v593_v44 = vld [vmem:[%s3081_s12 + $0x58] sm:$0xff]  ;;  %v2482_v45 = vpack.c.bf16 %v419_v41, %v418_v40  ;;  %v420_v46 = vld [vmem:[%s3093_s25 + $0x40] sm:$0xff] }
  0x3c   : >> { %2475 = vmatprep.subr.bf16.mxu0 %v2474_v33  ;;  %v421_v47 = vld [vmem:[%s3093_s25 + $0x48] sm:$0xff]  ;;  %v2522_v48 = vpack.c.bf16 %v593_v44, %v592_v43  ;;  %v594_v49 = vld [vmem:[%s3081_s12 + $0x60] sm:$0xff]  ;;  %v422_v52 = vld [vmem:[%s3093_s25 + $0x50] sm:$0xff] }
  0x3d   : >> { %2509 = vmatpush3.bf16.msra.mxu1 %v2506_v22  ;;  %v595_v50 = vld [vmem:[%s3081_s12 + $0x68] sm:$0xff]  ;;  %v2486_v51 = vpack.c.bf16 %v421_v47, %v420_v46  ;;  %v423_v53 = vld [vmem:[%s3093_s25 + $0x58] sm:$0xff]  ;;  %v596_v55 = vld [vmem:[%s3081_s12 + $0x70] sm:$0xff] }
  0x3e   : >> { %2511 = vmatprep.subr.bf16.mxu1 %v2510_v25  ;;  %v2526_v54 = vpack.c.bf16 %v595_v50, %v594_v49  ;;  %v597_v56 = vld [vmem:[%s3081_s12 + $0x78] sm:$0xff]  ;;  %v2490_v57 = vpack.c.bf16 %v423_v53, %v422_v52  ;;  %v424_v58 = vld [vmem:[%s3093_s25 + $0x60] sm:$0xff]  ;;  %v425_v59 = vld [vmem:[%s3093_s25 + $0x68] sm:$0xff] }
  0x3f   : >> { %2477 = vmatpush3.bf16.msra.mxu0 %v2474_v33  ;;  %v2530_v60 = vpack.c.bf16 %v597_v56, %v596_v55  ;;  %v2494_v61 = vpack.c.bf16 %v425_v59, %v424_v58  ;;  %v426_v62 = vld [vmem:[%s3093_s25 + $0x70] sm:$0xff]  ;;  %v427_v63 = vld [vmem:[%s3093_s25 + $0x78] sm:$0xff]  ;;  %v3156_v17 = vld [vmem:[%s598_s18] ss:$0 sm:$0xff] }
  0x40   : >> { %2479 = vmatprep.subr.bf16.mxu0 %v2478_v39  ;;  %v2498_v0 = vpack.c.bf16 %v427_v63, %v426_v62  ;;  %v752_v22 = vld [vmem:[%s3266_s30] sm:$0xff] }
  0x41   : >> { %2513 = vmatpush3.bf16.msra.mxu1 %v2510_v25  ;;  %v3170_v25 = vld [vmem:[%s428_s21] ss:$0 sm:$0xff]  ;;  %s1941_s21 = sshll.u32 %s2892_s28, 6  ;;  %s409_s28 = sadd.s32 1, %s2892_s28  }
  0x42   : >> { %2515 = vmatprep.subr.bf16.mxu1 %v2514_v36  ;;  %p406_p9 = scmp.ge.s32.totalorder %s409_s28, 2  }
  0x43   : >> { %2481 = vmatpush3.bf16.msra.mxu0 %v2478_v39  ;;  %s1965_s28 = sshll.u32 (%p406_p9), %s2975_s17, 11  ;;  %s1806_s12 = sshll.u32 (%p406_p9), %s3065_s27, 4  ;;  %s3519_s12 = int_to_ptr.vmem [resolvable:$true] %s1806_s12 }
  0x44   : >> { %2483 = vmatprep.subr.bf16.mxu0 %v2482_v45  ;;  %s3531_s25 = scalar_lea.sflag (%p406_p9), [#allocation4], %s364_s11  ;;  %s2818_s26 = scalar_lea.vmem (%p406_p9), %s3519_s12, 2048 }
  0x45   : >> { %2517 = vmatpush3.bf16.msra.mxu1 %v2514_v36  ;;  %p2819_p10 = scmp.ne.s32.totalorder (%p406_p9), %s3519_s12, %s2818_s26 }
  0x46   : >> { %2519 = vmatprep.subr.bf16.mxu1 %v2518_v42 }
  0x47   : >> { %2485 = vmatpush3.bf16.msra.mxu0 %v2482_v45  ;;  %p2820_p12 = pnand (%p406_p9), %p2819_p10, %p2992_p5 }
  0x48   : >> { %2487 = vmatprep.subr.bf16.mxu0 %v2486_v51 }
  0x49   : >> { %2521 = vmatpush3.bf16.msra.mxu1 %v2518_v42  ;;  %p2821_p13 = pneg (%p406_p9), %p2820_p12 }
  0x4a   : >> { %2523 = vmatprep.subr.bf16.mxu1 %v2522_v48 }
  0x4b   : >> { %2489 = vmatpush3.bf16.msra.mxu0 %v2486_v51 }
  0x4c   : >> { %2491 = vmatprep.subr.bf16.mxu0 %v2490_v57 }
  0x4d   : >> { %2525 = vmatpush3.bf16.msra.mxu1 %v2522_v48 }
  0x4e   : >> { %2527 = vmatprep.subr.bf16.mxu1 %v2526_v54 }
  0x4f   : >> { %2493 = vmatpush3.bf16.msra.mxu0 %v2490_v57 }
  0x50   : >> { %2495 = vmatprep.subr.bf16.mxu0 %v2494_v61 }
  0x51   : >> { %2529 = vmatpush3.bf16.msra.mxu1 %v2526_v54 }
  0x52   : >> { %2531 = vmatprep.subr.bf16.mxu1 %v2530_v60 }
  0x53   : >> { %2497 = vmatpush3.bf16.msra.mxu0 %v2494_v61 }
  0x54   : >> { %2499 = vmatprep.subr.bf16.mxu0 %v2498_v0 }
  0x55   : >> { %2533 = vmatpush3.bf16.msra.mxu1 %v2530_v60 }
  0x57   : >> { %2501 = vmatpush3.bf16.msra.mxu0 %v2498_v0 }
  0x58   : >> { %2239 = vmatmul.mubr.f32.vlgmr.msra.gmra.mrb[0].mxu1 %v3034_v2 }
  0x59   : >> { %2241 = vmatprep.mubr.f32.mxu1 %v3036_v3 }
  0x5a   : >> { %2183 = vmatmul.mubr.f32.vlgmr.msra.gmra.mrb[0].mxu0 %v3034_v2 }
  0x5b   : >> { %2185 = vmatprep.mubr.f32.mxu0 %v3036_v3 }
  0x5c   : >> { %2242 = vmatmul.mubr.f32.gmra.mrb[2].mxu1 %v3038_v4 }
  0x5d   : >> { %2244 = vmatprep.mubr.f32.mxu1 %v3040_v5 }
  0x5e   : >> { %2186 = vmatmul.mubr.f32.gmra.mrb[2].mxu0 %v3038_v4 }
  0x5f   : >> { %2188 = vmatprep.mubr.f32.mxu0 %v3040_v5 }
  0x60   : >> { %2245 = vmatmul.mubr.f32.gmra.mrb[4].mxu1 %v3042_v6 }
  0x61   : >> { %2247 = vmatprep.mubr.f32.mxu1 %v3044_v7 }
  0x62   : >> { %2189 = vmatmul.mubr.f32.gmra.mrb[4].mxu0 %v3042_v6 }
  0x63   : >> { %2191 = vmatprep.mubr.f32.mxu0 %v3044_v7 }
  0x64   : >> { %2248 = vmatmul.mubr.f32.gmra.mrb[6].mxu1 %v3046_v8 }
  0x65   : >> { %2250 = vmatprep.mubr.f32.mxu1 %v3048_v9 }
  0x66   : >> { %2192 = vmatmul.mubr.f32.gmra.mrb[6].mxu0 %v3046_v8 }
  0x67   : >> { %2194 = vmatprep.mubr.f32.mxu0 %v3048_v9 }
  0x68   : >> { %2251 = vmatmul.mubr.f32.gmra.mrb[8].mxu1 %v3050_v10 }
  0x69   : >> { %2253 = vmatprep.mubr.f32.mxu1 %v3052_v11 }
  0x6a   : >> { %2195 = vmatmul.mubr.f32.gmra.mrb[8].mxu0 %v3050_v10 }
  0x6b   : >> { %2197 = vmatprep.mubr.f32.mxu0 %v3052_v11 }
  0x6c   : >> { %2254 = vmatmul.mubr.f32.gmra.mrb[10].mxu1 %v3054_v12 }
  0x6d   : >> { %2256 = vmatprep.mubr.f32.mxu1 %v3056_v13 }
  0x6e   : >> { %2198 = vmatmul.mubr.f32.gmra.mrb[10].mxu0 %v3054_v12 }
  0x6f   : >> { %2200 = vmatprep.mubr.f32.mxu0 %v3056_v13 }
  0x70   : >> { %2257 = vmatmul.mubr.f32.gmra.mrb[12].mxu1 %v3058_v14 }
  0x71   : >> { %2259 = vmatprep.mubr.f32.mxu1 %v3060_v15 }
  0x72   : >> { %2201 = vmatmul.mubr.f32.gmra.mrb[12].mxu0 %v3058_v14 }
  0x73   : >> { %2203 = vmatprep.mubr.f32.mxu0 %v3060_v15 }
  0x74   : >> { %2260 = vmatmul.mubr.f32.gmra.mrb[14].mxu1 %v3062_v16 }
  0x76   : >> { %2204 = vmatmul.mubr.f32.gmra.mrb[14].mxu0 %v3062_v16 }
  0x77   : >> { %2294 = vmatprep.mubr.f32.mxu0 %v3032_v1 }
 0x12b   : >> { %v2240_v18 = vpop.f32.mrb[0].mxu1 }
 0x12c   : >> { %v678_v19 = vadd.f32 %v2240_v18, %v3156_v17  ;;  %v672_v20 = vpop.f32.mrb[1].mxu1 }
 0x12d   : >> { %v673_v21 = vadd.f32 %v3156_v17, %v672_v20  ;;  %v3173_v28 = vpop.f32.mrb[0].mxu0 }
 0x12e   : >> { %v502_v30 = vpop.f32.mrb[1].mxu0 }
 0x12f   : >> { %v2566_v23 = vpack.c.bf16 %v678_v19, %v673_v21  ;;  %v2243_v24 = vpop.f32.mrb[2].mxu1  ;;  %v503_v31 = vadd.f32 %v3170_v25, %v502_v30 }
 0x130   : >> { %v688_v26 = vadd.f32 %v2243_v24, %v3156_v17  ;;  %v682_v27 = vpop.f32.mrb[3].mxu1 }
 0x131   : >> { %2568 = vmatprep.subr.msk.bf16.mxu1 %vm3166_vm1, %v2566_v23  ;;  %v683_v29 = vadd.f32 %v3156_v17, %v682_v27  ;;  %v2187_v36 = vpop.f32.mrb[2].mxu0  ;;  %2350 = vmatprep.mubr.msk.f32.mxu1 %vm921_vm0, %v503_v31 }
 0x132   : >> { %2571 = vmatpush3.bf16.xpose.msk.msra.mxu1 %vm3166_vm1, %v2566_v23  ;;  %v3187_v38 = vadd.f32 %v2187_v36, %v3170_v25  ;;  %v3189_v39 = vpop.f32.mrb[3].mxu0 }
 0x133   : >> { %v2572_v32 = vpack.c.bf16 %v688_v26, %v683_v29  ;;  %v2246_v33 = vpop.f32.mrb[4].mxu1 }
 0x134   : >> { %v698_v34 = vadd.f32 %v2246_v33, %v3156_v17  ;;  %v692_v35 = vpop.f32.mrb[5].mxu1 }
 0x135   : >> { %2574 = vmatprep.subr.msk.bf16.mxu1 %vm3166_vm1, %v2572_v32  ;;  %v693_v37 = vadd.f32 %v3156_v17, %v692_v35  ;;  %v2190_v44 = vpop.f32.mrb[4].mxu0 }
 0x136   : >> { %v3194_v46 = vadd.f32 %v2190_v44, %v3170_v25  ;;  %v522_v47 = vpop.f32.mrb[5].mxu0 }
 0x137   : >> { %v2578_v40 = vpack.c.bf16 %v698_v34, %v693_v37  ;;  %v2249_v41 = vpop.f32.mrb[6].mxu1  ;;  %v523_v48 = vadd.f32 %v3170_v25, %v522_v47 }
 0x138   : >> { %v708_v42 = vadd.f32 %v2249_v41, %v3156_v17  ;;  %v702_v43 = vpop.f32.mrb[7].mxu1 }
 0x139   : >> { %v703_v45 = vadd.f32 %v3156_v17, %v702_v43  ;;  %v2193_v53 = vpop.f32.mrb[6].mxu0 }
 0x13a   : >> { %2577 = vmatpush3.bf16.xpose.msk.msra.mxu1 %vm3166_vm1, %v2572_v32  ;;  %v538_v55 = vadd.f32 %v2193_v53, %v3170_v25  ;;  %v532_v56 = vpop.f32.mrb[7].mxu0  ;;  %v758_v53 = vld [vmem:[%s3266_s30 + $0x30] sm:$0xff] }
 0x13b   : >> { %2580 = vmatprep.subr.msk.bf16.mxu1 %vm3166_vm1, %v2578_v40  ;;  %v2584_v49 = vpack.c.bf16 %v708_v42, %v703_v45  ;;  %v2252_v50 = vpop.f32.mrb[8].mxu1  ;;  %v533_v57 = vadd.f32 %v3170_v25, %v532_v56  ;;  %v760_v56 = vld [vmem:[%s3266_s30 + $0x40] sm:$0xff] }
 0x13c   : >> { %v718_v51 = vadd.f32 %v2252_v50, %v3156_v17  ;;  %v712_v52 = vpop.f32.mrb[9].mxu1 }
 0x13d   : >> { %v713_v54 = vadd.f32 %v3156_v17, %v712_v52  ;;  %v2196_v62 = vpop.f32.mrb[8].mxu0 }
 0x13e   : >> { %v548_v0 = vadd.f32 %v2196_v62, %v3170_v25  ;;  %v542_v18 = vpop.f32.mrb[9].mxu0  ;;  %v764_v62 = vld [vmem:[%s3266_s30 + $0x60] sm:$0xff] }
 0x13f   : >> { %v2590_v58 = vpack.c.bf16 %v718_v51, %v713_v54  ;;  %v2255_v59 = vpop.f32.mrb[10].mxu1  ;;  %v543_v19 = vadd.f32 %v3170_v25, %v542_v18  ;;  %v757_v51 = vld [vmem:[%s3266_s30 + $0x28] sm:$0xff]  ;;  %v759_v54 = vld [vmem:[%s3266_s30 + $0x38] sm:$0xff]  ;;  %v766_v18 = vld [vmem:[%s3266_s30 + $0x70] sm:$0xff] }
 0x140   : >> { %v728_v60 = vadd.f32 %v2255_v59, %v3156_v17  ;;  %v722_v61 = vpop.f32.mrb[11].mxu1  ;;  %v762_v59 = vld [vmem:[%s3266_s30 + $0x50] sm:$0xff] }
 0x141   : >> { %v723_v63 = vadd.f32 %v3156_v17, %v722_v61  ;;  %v2199_v26 = vpop.f32.mrb[10].mxu0 }
 0x142   : >> { %2583 = vmatpush3.bf16.xpose.msk.msra.mxu1 %vm3166_vm1, %v2578_v40  ;;  %v558_v29 = vadd.f32 %v2199_v26, %v3170_v25  ;;  %v552_v30 = vpop.f32.mrb[11].mxu0 }
 0x143   : >> { %2586 = vmatprep.subr.msk.bf16.mxu1 %vm3166_vm1, %v2584_v49  ;;  %v2596_v20 = vpack.c.bf16 %v728_v60, %v723_v63  ;;  %v2258_v21 = vpop.f32.mrb[12].mxu1  ;;  %v553_v31 = vadd.f32 %v3170_v25, %v552_v30  ;;  %v763_v60 = vld [vmem:[%s3266_s30 + $0x58] sm:$0xff]  ;;  %v765_v63 = vld [vmem:[%s3266_s30 + $0x68] sm:$0xff] }
 0x144   : >> { %v738_v23 = vadd.f32 %v2258_v21, %v3156_v17  ;;  %v732_v24 = vpop.f32.mrb[13].mxu1  ;;  %v2554_v61 = vpack.c.bf16 %v763_v60, %v762_v59  ;;  %v3300_v21 = vstv %s1163_s29 }
 0x145   : >> { %v733_v27 = vadd.f32 %v3156_v17, %v732_v24  ;;  %v2202_v36 = vpop.f32.mrb[12].mxu0 }
 0x146   : >> { %v568_v40 = vadd.f32 %v2202_v36, %v3170_v25  ;;  %v562_v41 = vpop.f32.mrb[13].mxu0 }
 0x147   : >> { %v2602_v32 = vpack.c.bf16 %v738_v23, %v733_v27  ;;  %v2261_v33 = vpop.f32.mrb[14].mxu1  ;;  %v563_v42 = vadd.f32 %v3170_v25, %v562_v41 }
 0x148   : >> { %v748_v34 = vadd.f32 %v2261_v33, %v3156_v17  ;;  %v742_v35 = vpop.f32.mrb[15].mxu1 }
 0x149   : >> { %v743_v37 = vadd.f32 %v3156_v17, %v742_v35  ;;  %v2205_v44 = vpop.f32.mrb[14].mxu0  ;;  %v513_v17 = vadd.f32 %v3170_v25, %v3189_v39  ;;  %v755_v39 = vld [vmem:[%s3266_s30 + $0x18] sm:$0xff] }
 0x14a   : >> { %2589 = vmatpush3.bf16.xpose.msk.msra.mxu1 %vm3166_vm1, %v2584_v49  ;;  %v578_v45 = vadd.f32 %v2205_v44, %v3170_v25  ;;  %v572_v47 = vpop.f32.mrb[15].mxu0  ;;  %v508_v49 = vadd.f32 %v3173_v28, %v3170_v25 }
 0x14b   : >> { %2592 = vmatprep.subr.msk.bf16.mxu1 %vm3166_vm1, %v2590_v58  ;;  %v2608_v43 = vpack.c.bf16 %v748_v34, %v743_v37  ;;  %v573_v50 = vadd.f32 %v3170_v25, %v572_v47  ;;  %v753_v25 = vld [vmem:[%s3266_s30 + $0x8] sm:$0xff] }
 0x14c   : >> { %v2534_v28 = vpack.c.bf16 %v753_v25, %v752_v22 }
 0x14e   : >> { %2535 = vmatprep.subr.bf16.mxu0 %v2534_v28 }
 0x14f   : >> { %2537 = vmatpush3.bf16.msra.mxu0 %v2534_v28 }
 0x152   : >> { %2595 = vmatpush3.bf16.xpose.msk.msra.mxu1 %vm3166_vm1, %v2590_v58 }
 0x153   : >> { %2598 = vmatprep.subr.msk.bf16.mxu1 %vm3166_vm1, %v2596_v20 }
 0x15a   : >> { %2601 = vmatpush3.bf16.xpose.msk.msra.mxu1 %vm3166_vm1, %v2596_v20 }
 0x15b   : >> { %2604 = vmatprep.subr.msk.bf16.mxu1 %vm3166_vm1, %v2602_v32 }
 0x162   : >> { %2607 = vmatpush3.bf16.xpose.msk.msra.mxu1 %vm3166_vm1, %v2602_v32 }
 0x163   : >> { %2610 = vmatprep.subr.msk.bf16.mxu1 %vm3166_vm1, %v2608_v43 }
 0x16a   : >> { %2613 = vmatpush3.bf16.xpose.msk.msra.mxu1 %vm3166_vm1, %v2608_v43 }
 0x171   : >> { %2351 = vmatmul.mubr.msk.f32.vlgmr.msra.gmra.mrb[16].mxu1 %vm921_vm0, %v508_v49 }
 0x172   : >> { %2353 = vmatprep.mubr.msk.f32.mxu1 %vm921_vm0, %v513_v17 }
 0x175   : >> { %2354 = vmatmul.mubr.msk.f32.gmra.mrb[18].mxu1 %vm921_vm0, %v3187_v38  ;;  %v754_v38 = vld [vmem:[%s3266_s30 + $0x10] sm:$0xff] }
 0x176   : >> { %2356 = vmatprep.mubr.msk.f32.mxu1 %vm921_vm0, %v523_v48  ;;  %v2538_v48 = vpack.c.bf16 %v755_v39, %v754_v38 }
 0x178   : >> { %2539 = vmatprep.subr.bf16.mxu0 %v2538_v48 }
 0x179   : >> { %2357 = vmatmul.mubr.msk.f32.gmra.mrb[20].mxu1 %vm921_vm0, %v3194_v46  ;;  %v756_v46 = vld [vmem:[%s3266_s30 + $0x20] sm:$0xff]  ;;  %2541 = vmatpush3.bf16.msra.mxu0 %v2538_v48 }
 0x17a   : >> { %2359 = vmatprep.mubr.msk.f32.mxu1 %vm921_vm0, %v533_v57  ;;  %v2542_v52 = vpack.c.bf16 %v757_v51, %v756_v46  ;;  %v761_v57 = vld [vmem:[%s3266_s30 + $0x48] sm:$0xff] }
 0x17b   : >> { %v2550_v58 = vpack.c.bf16 %v761_v57, %v760_v56 }
 0x17c   : >> { %2543 = vmatprep.subr.bf16.mxu0 %v2542_v52 }
 0x17d   : >> { %2360 = vmatmul.mubr.msk.f32.gmra.mrb[22].mxu1 %vm921_vm0, %v538_v55  ;;  %v2546_v55 = vpack.c.bf16 %v759_v54, %v758_v53  ;;  %2545 = vmatpush3.bf16.msra.mxu0 %v2542_v52 }
 0x17e   : >> { %2362 = vmatprep.mubr.msk.f32.mxu1 %vm921_vm0, %v543_v19  ;;  %v767_v19 = vld [vmem:[%s3266_s30 + $0x78] sm:$0xff]  ;;  %s3456_s30 = scalar_lea.vmem %s3580_s8, %s1941_s21  ;;  %s3517_s21 = scalar_lea.hbm (%p406_p9), %s3582_s10, %s1965_s28 }
 0x17f   : >> { %2547 = vmatprep.subr.bf16.mxu0 %v2546_v55  ;;  %v2562_v20 = vpack.c.bf16 %v767_v19, %v766_v18 }
 0x181   : >> { %2363 = vmatmul.mubr.msk.f32.gmra.mrb[24].mxu1 %vm921_vm0, %v548_v0  ;;  %2549 = vmatpush3.bf16.msra.mxu0 %v2546_v55  ;;  %v2558_v0 = vpack.c.bf16 %v765_v63, %v764_v62 }
 0x182   : >> { %2365 = vmatprep.mubr.msk.f32.mxu1 %vm921_vm0, %v553_v31  ;;  %2551 = vmatprep.subr.bf16.mxu0 %v2550_v58 }
 0x185   : >> { %2366 = vmatmul.mubr.msk.f32.gmra.mrb[26].mxu1 %vm921_vm0, %v558_v29  ;;  %2553 = vmatpush3.bf16.msra.mxu0 %v2550_v58  ;;  %v3371_v58 = vld [vmem:[%s768_s20] ss:$0 sm:$0xff] }
 0x186   : >> { %2368 = vmatprep.mubr.msk.f32.mxu1 %vm921_vm0, %v563_v42  ;;  %2555 = vmatprep.subr.bf16.mxu0 %v2554_v61 }
 0x189   : >> { %2369 = vmatmul.mubr.msk.f32.gmra.mrb[28].mxu1 %vm921_vm0, %v568_v40  ;;  %2557 = vmatpush3.bf16.msra.mxu0 %v2554_v61 }
 0x18a   : >> { %2371 = vmatprep.mubr.msk.f32.mxu1 %vm921_vm0, %v573_v50  ;;  %2559 = vmatprep.subr.bf16.mxu0 %v2558_v0 }
 0x18d   : >> { %2372 = vmatmul.mubr.msk.f32.gmra.mrb[30].mxu1 %vm921_vm0, %v578_v45  ;;  %2561 = vmatpush3.bf16.msra.mxu0 %v2558_v0 }
 0x18e   : >> { %2563 = vmatprep.subr.bf16.mxu0 %v2562_v20 }
 0x191   : >> { %2565 = vmatpush3.bf16.msra.mxu0 %v2562_v20 }
 0x194   : >> { %2295 = vmatmul.mubr.f32.vlgmr.msra.gmra.mrb[16].mxu0 %v3034_v2 }
 0x195   : >> { %2297 = vmatprep.mubr.f32.mxu0 %v3036_v3 }
 0x198   : >> { %2298 = vmatmul.mubr.f32.gmra.mrb[18].mxu0 %v3038_v4 }
 0x199   : >> { %2300 = vmatprep.mubr.f32.mxu0 %v3040_v5 }
 0x19c   : >> { %2301 = vmatmul.mubr.f32.gmra.mrb[20].mxu0 %v3042_v6 }
 0x19d   : >> { %2303 = vmatprep.mubr.f32.mxu0 %v3044_v7 }
 0x1a0   : >> { %2304 = vmatmul.mubr.f32.gmra.mrb[22].mxu0 %v3046_v8 }
 0x1a1   : >> { %2306 = vmatprep.mubr.f32.mxu0 %v3048_v9 }
 0x1a4   : >> { %2307 = vmatmul.mubr.f32.gmra.mrb[24].mxu0 %v3050_v10 }
 0x1a5   : >> { %2309 = vmatprep.mubr.f32.mxu0 %v3052_v11 }
 0x1a8   : >> { %2310 = vmatmul.mubr.f32.gmra.mrb[26].mxu0 %v3054_v12 }
 0x1a9   : >> { %2312 = vmatprep.mubr.f32.mxu0 %v3056_v13 }
 0x1ac   : >> { %2313 = vmatmul.mubr.f32.gmra.mrb[28].mxu0 %v3058_v14 }
 0x1ad   : >> { %2315 = vmatprep.mubr.f32.mxu0 %v3060_v15 }
 0x1b0   : >> { %2316 = vmatmul.mubr.f32.gmra.mrb[30].mxu0 %v3062_v16 }
 0x244   : >> { %v2352_v23 = vpop.f32.mrb[16].mxu1 }
 0x245   : >> { %v1084_v24 = vpop.f32.mrb[17].mxu1  ;;  %vm1166_vm3 = vcmp.lt.f32.partialorder %v2352_v23, %v3300_v21 }
 0x246   : >> { %vm1165_vm2 = vcmp.lt.f32.partialorder %v1084_v24, %v3300_v21  ;;  %v3308_v30 = vsel %vm1166_vm3, -10000.0, %v2352_v23 }
 0x247   : >> { %v3303_v26 = vsel %vm1165_vm2, -10000.0, %v1084_v24 }
 0x248   : >> { %1197 = vmax.xlane.f32.xlu0 %v3303_v26  ;;  %v2355_v27 = vpop.f32.mrb[18].mxu1 }
 0x249   : >> { %v1094_v29 = vpop.f32.mrb[19].mxu1  ;;  %vm1168_vm5 = vcmp.lt.f32.partialorder %v2355_v27, %v3300_v21 }
 0x24a   : >> { %vm1167_vm4 = vcmp.lt.f32.partialorder %v1094_v29, %v3300_v21  ;;  %v3316_v34 = vsel %vm1168_vm5, -10000.0, %v2355_v27 }
 0x24b   : >> { %v3310_v31 = vsel %vm1167_vm4, -10000.0, %v1094_v29 }
 0x24c   : >> { %1199 = vmax.xlane.f32.xlu0 %v3308_v30  ;;  %1201 = vmax.xlane.f32.xlu1 %v3310_v31  ;;  %v2358_v32 = vpop.f32.mrb[20].mxu1 }
 0x24d   : >> { %v1104_v33 = vpop.f32.mrb[21].mxu1  ;;  %vm1170_vm7 = vcmp.lt.f32.partialorder %v2358_v32, %v3300_v21 }
 0x24e   : >> { %vm1169_vm6 = vcmp.lt.f32.partialorder %v1104_v33, %v3300_v21  ;;  %v3324_v40 = vsel %vm1170_vm7, -10000.0, %v2358_v32 }
 0x24f   : >> { %v3318_v35 = vsel %vm1169_vm6, -10000.0, %v1104_v33 }
 0x250   : >> { %1203 = vmax.xlane.f32.xlu1 %v3316_v34  ;;  %1205 = vmax.xlane.f32.xlu0 %v3318_v35  ;;  %v2361_v36 = vpop.f32.mrb[22].mxu1 }
 0x251   : >> { %v1114_v37 = vpop.f32.mrb[23].mxu1  ;;  %vm1172_vm9 = vcmp.lt.f32.partialorder %v2361_v36, %v3300_v21 }
 0x252   : >> { %vm1171_vm8 = vcmp.lt.f32.partialorder %v1114_v37, %v3300_v21  ;;  %v3332_v44 = vsel %vm1172_vm9, -10000.0, %v2361_v36 }
 0x253   : >> { %v3326_v41 = vsel %vm1171_vm8, -10000.0, %v1114_v37 }
 0x254   : >> { %1207 = vmax.xlane.f32.xlu1 %v3324_v40  ;;  %1209 = vmax.xlane.f32.xlu0 %v3326_v41  ;;  %v2364_v42 = vpop.f32.mrb[24].mxu1 }
 0x255   : >> { %v1124_v43 = vpop.f32.mrb[25].mxu1  ;;  %vm1174_vm11 = vcmp.lt.f32.partialorder %v2364_v42, %v3300_v21 }
 0x256   : >> { %vm1173_vm10 = vcmp.lt.f32.partialorder %v1124_v43, %v3300_v21  ;;  %v3340_v17 = vsel %vm1174_vm11, -10000.0, %v2364_v42 }
 0x257   : >> { %v3334_v45 = vsel %vm1173_vm10, -10000.0, %v1124_v43 }
 0x258   : >> { %1211 = vmax.xlane.f32.xlu1 %v3332_v44  ;;  %1213 = vmax.xlane.f32.xlu0 %v3334_v45  ;;  %v2367_v47 = vpop.f32.mrb[26].mxu1 }
 0x259   : >> { %v1134_v50 = vpop.f32.mrb[27].mxu1  ;;  %vm1176_vm13 = vcmp.lt.f32.partialorder %v2367_v47, %v3300_v21 }
 0x25a   : >> { %vm1175_vm12 = vcmp.lt.f32.partialorder %v1134_v50, %v3300_v21  ;;  %v3348_v28 = vsel %vm1176_vm13, -10000.0, %v2367_v47 }
 0x25b   : >> { %v3342_v49 = vsel %vm1175_vm12, -10000.0, %v1134_v50 }
 0x25c   : >> { %1215 = vmax.xlane.f32.xlu1 %v3340_v17  ;;  %1217 = vmax.xlane.f32.xlu0 %v3342_v49  ;;  %v2370_v22 = vpop.f32.mrb[28].mxu1 }
 0x25d   : >> { %v1144_v25 = vpop.f32.mrb[29].mxu1  ;;  %vm1178_vm15 = vcmp.lt.f32.partialorder %v2370_v22, %v3300_v21 }
 0x25e   : >> { %vm1177_vm14 = vcmp.lt.f32.partialorder %v1144_v25, %v3300_v21  ;;  %v3356_v48 = vsel %vm1178_vm15, -10000.0, %v2370_v22 }
 0x25f   : >> { %v3350_v38 = vsel %vm1177_vm14, -10000.0, %v1144_v25 }
 0x260   : >> { %1219 = vmax.xlane.f32.xlu1 %v3348_v28  ;;  %1221 = vmax.xlane.f32.xlu0 %v3350_v38  ;;  %v2373_v39 = vpop.f32.mrb[30].mxu1 }
 0x261   : >> { %v1154_v46 = vpop.f32.mrb[31].mxu1  ;;  %vm1180_vm2 = vcmp.lt.f32.partialorder %v2373_v39, %v3300_v21 }
 0x262   : >> { %vm1179_vm1 = vcmp.lt.f32.partialorder %v1154_v46, %v3300_v21  ;;  %v3363_v52 = vsel %vm1180_vm2, -10000.0, %v2373_v39 }
 0x263   : >> { %v3358_v51 = vsel %vm1179_vm1, -10000.0, %v1154_v46 }
 0x264   : >> { %1223 = vmax.xlane.f32.xlu1 %v3356_v48  ;;  %1225 = vmax.xlane.f32.xlu0 %v3358_v51 }
 0x267   : >> { %v2296_v61 = vpop.f32.mrb[16].mxu0 }
 0x268   : >> { %1227 = vmax.xlane.f32.xlu1 %v3363_v52  ;;  %v848_v0 = vadd.f32 %v2296_v61, %v3371_v58  ;;  %v842_v18 = vpop.f32.mrb[17].mxu0 }
 0x269   : >> { %v843_v21 = vadd.f32 %v3371_v58, %v842_v18 }
 0x26b   : >> { %v2299_v27 = vpop.f32.mrb[18].mxu0 }
 0x26c   : >> { %v852_v32 = vpop.f32.mrb[19].mxu0 }
 0x26d   : >> { %v853_v37 = vadd.f32 %v3371_v58, %v852_v32 }
 0x26f   : >> { %v2302_v43 = vpop.f32.mrb[20].mxu0 }
 0x270   : >> { %v868_v25 = vadd.f32 %v2302_v43, %v3371_v58  ;;  %v862_v39 = vpop.f32.mrb[21].mxu0 }
 0x2d5   : >> { %v1198_v53 = vpop.xlane.xlu0 %1197 }
 0x2d6   : >> { %v1229_v54 = vsub.f32 %v3303_v26, %v1198_v53  ;;  %v2614_v26 = vpack.c.bf16 %v848_v0, %v843_v21 }
 0x2d8   : >> { %v1245_v55 = vmul.f32 1.442695, %v1229_v54  ;;  %2615 = vmatprep.subr.bf16.mxu0 %v2614_v26  ;;  %2662 = vmatprep.subr.bf16.mxu1 %v2614_v26 }
 0x2d9   : >> { %v1200_v56 = vpop.xlane.xlu0 %1199  ;;  %v1202_v57 = vpop.xlane.xlu1 %1201  ;;  %2617 = vmatpush3.bf16.msra.mxu0 %v2614_v26  ;;  %2670 = vmatpush3.bf16.msra.mxu1 %v2614_v26 }
 0x2da   : >> { %2739 = vpow2.f32 %v1245_v55  ;;  %v1230_v59 = vsub.f32 %v3308_v30, %v1200_v56  ;;  %v1231_v60 = vsub.f32 %v3310_v31, %v1202_v57  ;;  %v858_v31 = vadd.f32 %v2299_v27, %v3371_v58  ;;  %v2305_v56 = vpop.f32.mrb[22].mxu0 }
 0x2db   : >> { %v878_v61 = vadd.f32 %v2305_v56, %v3371_v58 }
 0x2dc   : >> { %v1247_v62 = vmul.f32 1.442695, %v1230_v59  ;;  %v1249_v63 = vmul.f32 1.442695, %v1231_v60 }
 0x2dd   : >> { %v1204_v19 = vpop.xlane.xlu1 %1203  ;;  %v1206_v20 = vpop.xlane.xlu0 %1205 }
 0x2de   : >> { %2741 = vpow2.f32 %v1247_v62  ;;  %v1232_v23 = vsub.f32 %v3316_v34, %v1204_v19  ;;  %v1233_v24 = vsub.f32 %v3318_v35, %v1206_v20  ;;  %v2618_v35 = vpack.c.bf16 %v858_v31, %v853_v37  ;;  %v872_v62 = vpop.f32.mrb[23].mxu0 }
 0x2df   : >> { %2743 = vpow2.f32 %v1249_v63  ;;  %v2308_v21 = vpop.f32.mrb[24].mxu0 }
 0x2e0   : >> { %v1251_v29 = vmul.f32 1.442695, %v1232_v23  ;;  %v1253_v30 = vmul.f32 1.442695, %v1233_v24  ;;  %2619 = vmatprep.subr.bf16.mxu0 %v2618_v35  ;;  %2663 = vmatprep.subr.bf16.mxu1 %v2618_v35  ;;  %v888_v27 = vadd.f32 %v2308_v21, %v3371_v58 }
 0x2e1   : >> { %v1208_v33 = vpop.xlane.xlu1 %1207  ;;  %v1210_v36 = vpop.xlane.xlu0 %1209  ;;  %2621 = vmatpush3.bf16.msra.mxu0 %v2618_v35  ;;  %2671 = vmatpush3.bf16.msra.mxu1 %v2618_v35 }
 0x2e2   : >> { %2745 = vpow2.f32 %v1251_v29  ;;  %v1234_v42 = vsub.f32 %v3324_v40, %v1208_v33  ;;  %v1235_v34 = vsub.f32 %v3326_v41, %v1210_v36  ;;  %v863_v40 = vadd.f32 %v3371_v58, %v862_v39  ;;  %v882_v29 = vpop.f32.mrb[25].mxu0 }
 0x2e3   : >> { %2747 = vpow2.f32 %v1253_v30  ;;  %v2311_v37 = vpop.f32.mrb[26].mxu0 }
 0x2e4   : >> { %v3383_v47 = vpop.eup %2739  ;;  %v1255_v50 = vmul.f32 1.442695, %v1234_v42  ;;  %v1257_v22 = vmul.f32 1.442695, %v1235_v34  ;;  %v2622_v55 = vpack.c.bf16 %v868_v25, %v863_v40  ;;  %v898_v43 = vadd.f32 %v2311_v37, %v3371_v58 }
 0x2e5   : >> { %v1212_v46 = vpop.xlane.xlu1 %1211  ;;  %v1214_v53 = vpop.xlane.xlu0 %1213  ;;  %1277 = vadd.xlane.f32.xlu0 %v3383_v47 }
 0x2e6   : >> { %2749 = vpow2.f32 %v1255_v50  ;;  %v1236_v41 = vsub.f32 %v3332_v44, %v1212_v46  ;;  %v1237_v54 = vsub.f32 %v3334_v45, %v1214_v53  ;;  %v873_v44 = vadd.f32 %v3371_v58, %v872_v62  ;;  %2623 = vmatprep.subr.bf16.mxu0 %v2622_v55  ;;  %2664 = vmatprep.subr.bf16.mxu1 %v2622_v55  ;;  %v892_v50 = vpop.f32.mrb[27].mxu0 }
 0x2e7   : >> { %2751 = vpow2.f32 %v1257_v22  ;;  %2625 = vmatpush3.bf16.msra.mxu0 %v2622_v55  ;;  %2672 = vmatpush3.bf16.msra.mxu1 %v2622_v55  ;;  %v893_v25 = vadd.f32 %v3371_v58, %v892_v50  ;;  %v2314_v40 = vpop.f32.mrb[28].mxu0 }
 0x2e8   : >> { %v3390_v57 = vpop.eup %2741  ;;  %v1259_v59 = vmul.f32 1.442695, %v1236_v41  ;;  %v1261_v60 = vmul.f32 1.442695, %v1237_v54  ;;  %v2626_v20 = vpack.c.bf16 %v878_v61, %v873_v44  ;;  %v908_v56 = vadd.f32 %v2314_v40, %v3371_v58 }
 0x2e9   : >> { %v3393_v63 = vpop.eup %2743  ;;  %v1216_v0 = vpop.xlane.xlu1 %1215  ;;  %1279 = vadd.xlane.f32.xlu1 %v3390_v57  ;;  %v2634_v53 = vpack.c.bf16 %v898_v43, %v893_v25  ;;  %v1507_v25 = vld [vmem:[%s3456_s30 + $0x18] sm:$0xff] }
 0x2ea   : >> { %v1218_v18 = vpop.xlane.xlu0 %1217  ;;  %2753 = vpow2.f32 %v1259_v59  ;;  %v1238_v45 = vsub.f32 %v3340_v17, %v1216_v0  ;;  %1281 = vadd.xlane.f32.xlu0 %v3393_v63  ;;  %2627 = vmatprep.subr.bf16.mxu0 %v2626_v20  ;;  %v902_v59 = vpop.f32.mrb[29].mxu0 }
 0x2eb   : >> { %v1239_v19 = vsub.f32 %v3342_v49, %v1218_v18  ;;  %2755 = vpow2.f32 %v1261_v60  ;;  %v883_v49 = vadd.f32 %v3371_v58, %v882_v29  ;;  %2665 = vmatprep.subr.bf16.mxu1 %v2626_v20  ;;  %2629 = vmatpush3.bf16.msra.mxu0 %v2626_v20 }
 0x2ec   : >> { %v3400_v23 = vpop.eup %2745  ;;  %v1263_v24 = vmul.f32 1.442695, %v1238_v45  ;;  %2673 = vmatpush3.bf16.msra.mxu1 %v2626_v20  ;;  %v2317_v45 = vpop.f32.mrb[30].mxu0 }
 0x2ed   : >> { %v1265_v26 = vmul.f32 1.442695, %v1239_v19  ;;  %v3403_v30 = vpop.eup %2747  ;;  %v1220_v17 = vpop.xlane.xlu1 %1219  ;;  %1283 = vadd.xlane.f32.xlu1 %v3400_v23  ;;  %v2630_v36 = vpack.c.bf16 %v888_v27, %v883_v49  ;;  %v918_v19 = vadd.f32 %v2317_v45, %v3371_v58 }
 0x2ee   : >> { %v1222_v31 = vpop.xlane.xlu0 %1221  ;;  %2757 = vpow2.f32 %v1263_v24  ;;  %v1240_v32 = vsub.f32 %v3348_v28, %v1220_v17  ;;  %1285 = vadd.xlane.f32.xlu0 %v3403_v30  ;;  %v1504_v17 = vld [vmem:[%s3456_s30] sm:$0xff] }
 0x2ef   : >> { %v1241_v33 = vsub.f32 %v3350_v38, %v1222_v31  ;;  %2759 = vpow2.f32 %v1265_v26  ;;  %2631 = vmatprep.subr.bf16.mxu0 %v2630_v36  ;;  %2666 = vmatprep.subr.bf16.mxu1 %v2630_v36  ;;  %v1505_v31 = vld [vmem:[%s3456_s30 + $0x8] sm:$0xff] }
 0x2f0   : >> { %v3410_v42 = vpop.eup %2749  ;;  %v1267_v34 = vmul.f32 1.442695, %v1240_v32  ;;  %2633 = vmatpush3.bf16.msra.mxu0 %v2630_v36  ;;  %2674 = vmatpush3.bf16.msra.mxu1 %v2630_v36  ;;  %v2646_v49 = vpack.c.bf16 %v1505_v31, %v1504_v17 }
 0x2f1   : >> { %v1269_v35 = vmul.f32 1.442695, %v1241_v33  ;;  %v3413_v22 = vpop.eup %2751  ;;  %v1224_v28 = vpop.xlane.xlu1 %1223  ;;  %1287 = vadd.xlane.f32.xlu1 %v3410_v42  ;;  %2635 = vmatprep.subr.bf16.mxu0 %v2634_v53 }
 0x2f2   : >> { %v1226_v38 = vpop.xlane.xlu0 %1225  ;;  %2761 = vpow2.f32 %v1267_v34  ;;  %v1242_v39 = vsub.f32 %v3356_v48, %v1224_v28  ;;  %1289 = vadd.xlane.f32.xlu0 %v3413_v22  ;;  %2667 = vmatprep.subr.bf16.mxu1 %v2634_v53 }
 0x2f3   : >> { %v1243_v46 = vsub.f32 %v3358_v51, %v1226_v38  ;;  %2763 = vpow2.f32 %v1269_v35  ;;  %v903_v51 = vadd.f32 %v3371_v58, %v902_v59  ;;  %v1506_v38 = vld [vmem:[%s3456_s30 + $0x10] sm:$0xff]  ;;  %v1508_v59 = vld [vmem:[%s3456_s30 + $0x20] sm:$0xff] }
 0x2f4   : >> { %v3420_v41 = vpop.eup %2753  ;;  %v1271_v54 = vmul.f32 1.442695, %v1242_v39  ;;  %2637 = vmatpush3.bf16.msra.mxu0 %v2634_v53  ;;  %2675 = vmatpush3.bf16.msra.mxu1 %v2634_v53 }
 0x2f5   : >> { %v1273_v55 = vmul.f32 1.442695, %v1243_v46  ;;  %v3423_v60 = vpop.eup %2755  ;;  %1291 = vadd.xlane.f32.xlu1 %v3420_v41  ;;  %v1228_v48 = vpop.xlane.xlu1 %1227  ;;  %v2638_v62 = vpack.c.bf16 %v908_v56, %v903_v51 }
 0x2f6   : >> { %2765 = vpow2.f32 %v1271_v54  ;;  %v1244_v61 = vsub.f32 %v3363_v52, %v1228_v48  ;;  %1293 = vadd.xlane.f32.xlu0 %v3423_v60  ;;  %v912_v52 = vpop.f32.mrb[31].mxu0  ;;  %v2650_v54 = vpack.c.bf16 %v1507_v25, %v1506_v38 }
 0x2f7   : >> { %2767 = vpow2.f32 %v1273_v55  ;;  %2639 = vmatprep.subr.bf16.mxu0 %v2638_v62  ;;  %2668 = vmatprep.subr.bf16.mxu1 %v2638_v62  ;;  %v913_v20 = vadd.f32 %v3371_v58, %v912_v52  ;;  %v1511_v52 = vld [vmem:[%s3456_s30 + $0x38] sm:$0xff] }
 0x2f8   : >> { %v3429_v0 = vpop.eup %2757  ;;  %v1275_v18 = vmul.f32 1.442695, %v1244_v61  ;;  %2641 = vmatpush3.bf16.msra.mxu0 %v2638_v62  ;;  %2676 = vmatpush3.bf16.msra.mxu1 %v2638_v62 }
 0x2f9   : >> { %v3431_v44 = vpop.eup %2759  ;;  %1295 = vadd.xlane.f32.xlu1 %v3429_v0  ;;  %v2642_v26 = vpack.c.bf16 %v918_v19, %v913_v20 }
 0x2fa   : >> { %2769 = vpow2.f32 %v1275_v18  ;;  %1297 = vadd.xlane.f32.xlu0 %v3431_v44 }
 0x2fb   : >> { %2643 = vmatprep.subr.bf16.mxu0 %v2642_v26  ;;  %2669 = vmatprep.subr.bf16.mxu1 %v2642_v26 }
 0x2fc   : >> { %v3437_v21 = vpop.eup %2761  ;;  %2645 = vmatpush3.bf16.msra.mxu0 %v2642_v26  ;;  %2677 = vmatpush3.bf16.msra.mxu1 %v2642_v26 }
 0x2fd   : >> { %v3439_v24 = vpop.eup %2763  ;;  %1299 = vadd.xlane.f32.xlu1 %v3437_v21  ;;  %2647 = vmatprep.subr.bf16.mxu0 %v2646_v49 }
 0x2fe   : >> { %1301 = vadd.xlane.f32.xlu0 %v3439_v24 }
 0x300   : >> { %v3443_v27 = vpop.eup %2765 }
 0x301   : >> { %v3445_v29 = vpop.eup %2767  ;;  %1303 = vadd.xlane.f32.xlu1 %v3443_v27 }
 0x302   : >> { %1305 = vadd.xlane.f32.xlu0 %v3445_v29 }
 0x304   : >> { %v3449_v58 = vpop.eup %2769 }
 0x305   : >> { %1307 = vadd.xlane.f32.xlu1 %v3449_v58 }
 0x372   : >> { %v1278_v32 = vpop.xlane.xlu0 %1277 }
 0x373   : >> { %2771 = vrcp.f32 %v1278_v32 }
 0x376   : >> { %v1280_v33 = vpop.xlane.xlu1 %1279 }
 0x377   : >> { %2773 = vrcp.f32 %v1280_v33  ;;  %v1282_v36 = vpop.xlane.xlu0 %1281 }
 0x378   : >> { %2775 = vrcp.f32 %v1282_v36 }
 0x37a   : >> { %v1284_v37 = vpop.xlane.xlu1 %1283 }
 0x37b   : >> { %2777 = vrcp.f32 %v1284_v37  ;;  %v1286_v34 = vpop.xlane.xlu0 %1285 }
 0x37c   : >> { %2779 = vrcp.f32 %v1286_v34 }
 0x37d   : >> { %v2772_v35 = vpop.eup %2771 }
 0x37e   : >> { %v1288_v43 = vpop.xlane.xlu1 %1287  ;;  %v1325_v50 = vmul.f32 %v2772_v35, %v3383_v47  ;;  %v1509_v47 = vld [vmem:[%s3456_s30 + $0x28] sm:$0xff] }
 0x37f   : >> { %2781 = vrcp.f32 %v1288_v43  ;;  %v1290_v28 = vpop.xlane.xlu0 %1289 }
 0x380   : >> { %2783 = vrcp.f32 %v1290_v28  ;;  %2406 = vmatprep.mubr.f32.mxu0 %v1325_v50 }
 0x381   : >> { %v2774_v39 = vpop.eup %2773 }
 0x382   : >> { %v2776_v46 = vpop.eup %2775  ;;  %v1326_v53 = vmul.f32 %v2774_v39, %v3390_v57  ;;  %v1292_v40 = vpop.xlane.xlu1 %1291  ;;  %v2654_v57 = vpack.c.bf16 %v1509_v47, %v1508_v59 }
 0x383   : >> { %2785 = vrcp.f32 %v1292_v40  ;;  %v1294_v55 = vpop.xlane.xlu0 %1293  ;;  %v1327_v56 = vmul.f32 %v2776_v46, %v3393_v63  ;;  %v1510_v63 = vld [vmem:[%s3456_s30 + $0x30] sm:$0xff]  ;;  %s2896_s30 = smov (%p406_p9), [#allocation6]  }
 0x384   : >> { %2787 = vrcp.f32 %v1294_v55  ;;  %2407 = vmatmul.mubr.f32.vlgmr.msra.gmra.mrb[32].mxu0 %v1326_v53  ;;  %v2658_v31 = vpack.c.bf16 %v1511_v52, %v1510_v63  ;;  %s2822_s29 = sshll.u32 (%p406_p9), %s2896_s30, 4  ;;  %s2823_s29 = int_to_ptr.vmem [resolvable:$false] %s2822_s29 }
 0x385   : >> { %v2778_v48 = vpop.eup %2777  ;;  %2409 = vmatprep.mubr.f32.mxu0 %v1327_v56  ;;  %2649 = vmatpush3.bf16.msra.mxu0 %v2646_v49  ;;  %s2824_s18 = scalar_lea.vmem (%p406_p9), %s2823_s29, 4096  ;;  %p2825_p0 = scmp.lt.s32.totalorder (%p406_p9), %s3519_s12, %s2823_s29 }
 0x386   : >> { %v2780_v51 = vpop.eup %2779  ;;  %v1296_v61 = vpop.xlane.xlu1 %1295  ;;  %v1328_v62 = vmul.f32 %v2778_v48, %v3400_v23  ;;  %2651 = vmatprep.subr.bf16.mxu0 %v2650_v54  ;;  %p2826_p1 = scmp.lt.s32.totalorder (%p406_p9), %s2824_s18, %s2818_s26 }
 0x387   : >> { %2789 = vrcp.f32 %v1296_v61  ;;  %v1298_v18 = vpop.xlane.xlu0 %1297  ;;  %v1329_v45 = vmul.f32 %v2780_v51, %v3403_v30 }
 0x388   : >> { %2791 = vrcp.f32 %v1298_v18  ;;  %2410 = vmatmul.mubr.f32.gmra.mrb[34].mxu0 %v1328_v62  ;;  %v1487_v18 = vld [vmem:[#allocation2 + $0x8] sm:$0xff]  ;;  %p2827_p2 = por (%p406_p9), %p2826_p1, %p2825_p0 }
 0x389   : >> { %v2782_v19 = vpop.eup %2781  ;;  %2412 = vmatprep.mubr.f32.mxu0 %v1329_v45  ;;  %2653 = vmatpush3.bf16.msra.mxu0 %v2650_v54  ;;  %v1486_v45 = vld [vmem:[#allocation2] sm:$0xff] }
 0x38a   : >> { %v2784_v20 = vpop.eup %2783  ;;  %v1300_v26 = vpop.xlane.xlu1 %1299  ;;  %v1330_v17 = vmul.f32 %v2782_v19, %v3410_v42  ;;  %2655 = vmatprep.subr.bf16.mxu0 %v2654_v57  ;;  %p2828_p3 = pnand (%p406_p9), %p2827_p2, %p2821_p13 }
 0x38b   : >> { %2793 = vrcp.f32 %v1300_v26  ;;  %v1302_v23 = vpop.xlane.xlu0 %1301  ;;  %v1331_v49 = vmul.f32 %v2784_v20, %v3413_v22  ;;  %v1489_v26 = vld [vmem:[#allocation2 + $0x18] sm:$0xff] }
 0x38c   : >> { %2795 = vrcp.f32 %v1302_v23  ;;  %2413 = vmatmul.mubr.f32.gmra.mrb[36].mxu0 %v1330_v17  ;;  %v1488_v17 = vld [vmem:[#allocation2 + $0x10] sm:$0xff] }
 0x38d   : >> { %v2786_v30 = vpop.eup %2785  ;;  %2415 = vmatprep.mubr.f32.mxu0 %v1331_v49  ;;  %2657 = vmatpush3.bf16.msra.mxu0 %v2654_v57 }
 0x38e   : >> { %v2788_v32 = vpop.eup %2787  ;;  %v1304_v33 = vpop.xlane.xlu1 %1303  ;;  %v1332_v36 = vmul.f32 %v2786_v30, %v3420_v41  ;;  %2659 = vmatprep.subr.bf16.mxu0 %v2658_v31 }
 0x38f   : >> { %2797 = vrcp.f32 %v1304_v33  ;;  %v1306_v37 = vpop.xlane.xlu0 %1305  ;;  %v1333_v42 = vmul.f32 %v2788_v32, %v3423_v60  ;;  %v1491_v32 = vld [vmem:[#allocation2 + $0x28] sm:$0xff]  ;;  %v1490_v33 = vld [vmem:[#allocation2 + $0x20] sm:$0xff] }
 0x390   : >> { %2799 = vrcp.f32 %v1306_v37  ;;  %2416 = vmatmul.mubr.f32.gmra.mrb[38].mxu0 %v1332_v36 }
 0x391   : >> { %v2790_v34 = vpop.eup %2789  ;;  %2418 = vmatprep.mubr.f32.mxu1 %v1333_v42  ;;  %2661 = vmatpush3.bf16.msra.mxu0 %v2658_v31 }
 0x392   : >> { %v2792_v22 = vpop.eup %2791  ;;  %v1334_v35 = vmul.f32 %v2790_v34, %v3429_v0  ;;  %v1308_v43 = vpop.xlane.xlu1 %1307 }
 0x393   : >> { %2801 = vrcp.f32 %v1308_v43  ;;  %v1335_v50 = vmul.f32 %v2792_v22, %v3431_v44  ;;  %v1493_v22 = vld [vmem:[#allocation2 + $0x38] sm:$0xff] }
 0x394   : >> { %2419 = vmatmul.mubr.f32.vlgmr.msra.gmra.mrb[32].mxu1 %v1334_v35  ;;  %v1492_v35 = vld [vmem:[#allocation2 + $0x30] sm:$0xff] }
 0x395   : >> { %v2794_v28 = vpop.eup %2793  ;;  %2421 = vmatprep.mubr.f32.mxu1 %v1335_v50 }
 0x396   : >> { %v2796_v41 = vpop.eup %2795  ;;  %v1336_v38 = vmul.f32 %v2794_v28, %v3437_v21 }
 0x397   : >> { %v1337_v60 = vmul.f32 %v2796_v41, %v3439_v24 }
 0x398   : >> { %2422 = vmatmul.mubr.f32.gmra.mrb[34].mxu1 %v1336_v38  ;;  %v1495_v38 = vld [vmem:[#allocation2 + $0x48] sm:$0xff] }
 0x399   : >> { %v2798_v25 = vpop.eup %2797  ;;  %2424 = vmatprep.mubr.f32.mxu1 %v1337_v60  ;;  %v1494_v60 = vld [vmem:[#allocation2 + $0x40] sm:$0xff] }
 0x39a   : >> { %v2800_v39 = vpop.eup %2799  ;;  %v1338_v46 = vmul.f32 %v2798_v25, %v3443_v27 }
 0x39b   : >> { %v1339_v0 = vmul.f32 %v2800_v39, %v3445_v29 }
 0x39c   : >> { %2425 = vmatmul.mubr.f32.gmra.mrb[36].mxu1 %v1338_v46 }
 0x39d   : >> { %v2802_v53 = vpop.eup %2801  ;;  %2427 = vmatprep.mubr.f32.mxu1 %v1339_v0 }
 0x39e   : >> { %v1340_v44 = vmul.f32 %v2802_v53, %v3449_v58  ;;  %v1497_v53 = vld [vmem:[#allocation2 + $0x58] sm:$0xff] }
 0x3a0   : >> { %2428 = vmatmul.mubr.f32.gmra.mrb[38].mxu1 %v1340_v44  ;;  %v1496_v44 = vld [vmem:[#allocation2 + $0x50] sm:$0xff] }
 0x457   : >> { %v2408_v40 = vpop.f32.mrb[32].mxu0 }
 0x458   : >> { %v1407_v54 = vpop.f32.mrb[33].mxu0 }
 0x459   : >> { %2446 = vmatprep.mubr.msk.f32.mxu0 %vm921_vm0, %v1407_v54 }
 0x45a   : >> { %2447 = vmatmul.mubr.msk.f32.vlgmr.msra.gmra.mrb[40].mxu0 %vm921_vm0, %v2408_v40 }
 0x45b   : >> { %v2411_v21 = vpop.f32.mrb[34].mxu0 }
 0x45c   : >> { %v1417_v24 = vpop.f32.mrb[35].mxu0 }
 0x45d   : >> { %2449 = vmatprep.mubr.msk.f32.mxu0 %vm921_vm0, %v1417_v24 }
 0x45e   : >> { %2450 = vmatmul.mubr.msk.f32.gmra.mrb[42].mxu0 %vm921_vm0, %v2411_v21 }
 0x45f   : >> { %v2414_v27 = vpop.f32.mrb[36].mxu0 }
 0x460   : >> { %v1427_v29 = vpop.f32.mrb[37].mxu0 }
 0x461   : >> { %2452 = vmatprep.mubr.msk.f32.mxu0 %vm921_vm0, %v1427_v29  ;;  %v1498_v29 = vld [vmem:[#allocation2 + $0x60] sm:$0xff] }
 0x462   : >> { %2453 = vmatmul.mubr.msk.f32.gmra.mrb[44].mxu0 %vm921_vm0, %v2414_v27  ;;  %v1499_v27 = vld [vmem:[#allocation2 + $0x68] sm:$0xff] }
 0x463   : >> { %v2417_v58 = vpop.f32.mrb[38].mxu0 }
 0x464   : >> { %v1437_v55 = vpop.f32.mrb[39].mxu0 }
 0x465   : >> { %2455 = vmatprep.mubr.msk.f32.mxu0 %vm921_vm0, %v1437_v55 }
 0x466   : >> { %2456 = vmatmul.mubr.msk.f32.gmra.mrb[46].mxu0 %vm921_vm0, %v2417_v58 }
 0x467   : >> { %v2420_v56 = vpop.f32.mrb[32].mxu1 }
 0x468   : >> { %v1447_v59 = vpop.f32.mrb[33].mxu1 }
 0x469   : >> { %2458 = vmatprep.mubr.msk.f32.mxu0 %vm921_vm0, %v1447_v59 }
 0x46a   : >> { %2459 = vmatmul.mubr.msk.f32.gmra.mrb[48].mxu0 %vm921_vm0, %v2420_v56 }
 0x46b   : >> { %v2423_v47 = vpop.f32.mrb[34].mxu1 }
 0x46c   : >> { %v1457_v48 = vpop.f32.mrb[35].mxu1 }
 0x46d   : >> { %2461 = vmatprep.mubr.msk.f32.mxu0 %vm921_vm0, %v1457_v48  ;;  %v1500_v48 = vld [vmem:[#allocation2 + $0x70] sm:$0xff] }
 0x46e   : >> { %2462 = vmatmul.mubr.msk.f32.gmra.mrb[50].mxu0 %vm921_vm0, %v2423_v47  ;;  %v1501_v47 = vld [vmem:[#allocation2 + $0x78] sm:$0xff] }
 0x46f   : >> { %v2426_v51 = vpop.f32.mrb[36].mxu1 }
 0x470   : >> { %v1467_v61 = vpop.f32.mrb[37].mxu1 }
 0x471   : >> { %2464 = vmatprep.mubr.msk.f32.mxu0 %vm921_vm0, %v1467_v61 }
 0x472   : >> { %2465 = vmatmul.mubr.msk.f32.gmra.mrb[52].mxu0 %vm921_vm0, %v2426_v51 }
 0x473   : >> { %v2429_v62 = vpop.f32.mrb[38].mxu1 }
 0x474   : >> { %v1477_v57 = vpop.f32.mrb[39].mxu1 }
 0x475   : >> { %2467 = vmatprep.mubr.msk.f32.mxu0 %vm921_vm0, %v1477_v57 }
 0x476   : >> { %2468 = vmatmul.mubr.msk.f32.gmra.mrb[54].mxu0 %vm921_vm0, %v2429_v62 }
 0x52d   : >> { %v2448_v63 = vpop.f32.mrb[40].mxu0 }
 0x52e   : >> { %v1706_v52 = vadd.f32 %v2448_v63, %v1487_v18  ;;  %v1626_v19 = vpop.f32.mrb[41].mxu0 }
 0x52f   : >> { %v1705_v20 = vadd.f32 %v1626_v19, %v1486_v45  ;;  %v1958_v45 = vld [vmem:[%s3581_s9] ss:$0 sm:$0xff] (%p406_p9) }
 0x530   : >> { %1722 = vst [vmem:[#allocation2 + $0x8] sm:$0xff] %v1706_v52 }
 0x531   : >> { %1721 = vst [vmem:[#allocation2] sm:$0xff] %v1705_v20  ;;  %v2451_v31 = vpop.f32.mrb[42].mxu0 }
 0x532   : >> { %v1708_v23 = vadd.f32 %v2451_v31, %v1489_v26  ;;  %v1636_v49 = vpop.f32.mrb[43].mxu0 }
 0x533   : >> { %v1707_v30 = vadd.f32 %v1636_v49, %v1488_v17 }
 0x534   : >> { %1724 = vst [vmem:[#allocation2 + $0x18] sm:$0xff] %v1708_v23 }
 0x535   : >> { %1723 = vst [vmem:[#allocation2 + $0x10] sm:$0xff] %v1707_v30  ;;  %v2454_v36 = vpop.f32.mrb[44].mxu0 }
 0x536   : >> { %v1710_v37 = vadd.f32 %v2454_v36, %v1491_v32  ;;  %v1646_v42 = vpop.f32.mrb[45].mxu0 }
 0x537   : >> { %v1709_v34 = vadd.f32 %v1646_v42, %v1490_v33  ;;  %v1738_v63 = vld [vmem:[#allocation2 + $0x8] sm:$0xff] (%p406_p9) }
 0x538   : >> { %1726 = vst [vmem:[#allocation2 + $0x28] sm:$0xff] %v1710_v37  ;;  %v1737_v18 = vld [vmem:[#allocation2] sm:$0xff] (%p406_p9)  ;;  %v1761_v19 = vadd.f32 (%p406_p9), %v1958_v45, %v1738_v63 }
 0x539   : >> { %1725 = vst [vmem:[#allocation2 + $0x20] sm:$0xff] %v1709_v34  ;;  %v2457_v43 = vpop.f32.mrb[46].mxu0  ;;  %v1760_v52 = vadd.f32 (%p406_p9), %v1958_v45, %v1737_v18 }
 0x53a   : >> { %v1712_v50 = vadd.f32 %v2457_v43, %v1493_v22  ;;  %v1656_v28 = vpop.f32.mrb[47].mxu0  ;;  %1777 = vst [vmem:[%s3065_s27 + $0x8] sm:$0xff] (%p406_p9), %v1761_v19 }
 0x53b   : >> { %v1711_v41 = vadd.f32 %v1656_v28, %v1492_v35  ;;  %v1740_v26 = vld [vmem:[#allocation2 + $0x18] sm:$0xff] (%p406_p9)  ;;  %1776 = vst [vmem:[%s3065_s27] sm:$0xff] (%p406_p9), %v1760_v52 }
 0x53c   : >> { %1728 = vst [vmem:[#allocation2 + $0x38] sm:$0xff] %v1712_v50  ;;  %v1739_v20 = vld [vmem:[#allocation2 + $0x10] sm:$0xff] (%p406_p9)  ;;  %v1763_v23 = vadd.f32 (%p406_p9), %v1958_v45, %v1740_v26 }
 0x53d   : >> { %1727 = vst [vmem:[#allocation2 + $0x30] sm:$0xff] %v1711_v41  ;;  %v2460_v25 = vpop.f32.mrb[48].mxu0  ;;  %v1762_v31 = vadd.f32 (%p406_p9), %v1958_v45, %v1739_v20 }
 0x53e   : >> { %v1714_v39 = vadd.f32 %v2460_v25, %v1495_v38  ;;  %v1666_v46 = vpop.f32.mrb[49].mxu0  ;;  %1779 = vst [vmem:[%s3065_s27 + $0x18] sm:$0xff] (%p406_p9), %v1763_v23 }
 0x53f   : >> { %v1713_v0 = vadd.f32 %v1666_v46, %v1494_v60  ;;  %v1742_v1 = vld [vmem:[#allocation2 + $0x28] sm:$0xff] (%p406_p9)  ;;  %1778 = vst [vmem:[%s3065_s27 + $0x10] sm:$0xff] (%p406_p9), %v1762_v31 }
 0x540   : >> { %1730 = vst [vmem:[#allocation2 + $0x48] sm:$0xff] %v1714_v39  ;;  %v1741_v17 = vld [vmem:[#allocation2 + $0x20] sm:$0xff] (%p406_p9)  ;;  %v1765_v4 = vadd.f32 (%p406_p9), %v1958_v45, %v1742_v1 }
 0x541   : >> { %1729 = vst [vmem:[#allocation2 + $0x40] sm:$0xff] %v1713_v0  ;;  %v2463_v40 = vpop.f32.mrb[50].mxu0  ;;  %v1764_v49 = vadd.f32 (%p406_p9), %v1958_v45, %v1741_v17 }
 0x542   : >> { %v1716_v54 = vadd.f32 %v2463_v40, %v1497_v53  ;;  %v1676_v21 = vpop.f32.mrb[51].mxu0  ;;  %1781 = vst [vmem:[%s3065_s27 + $0x28] sm:$0xff] (%p406_p9), %v1765_v4 }
 0x543   : >> { %v1715_v24 = vadd.f32 %v1676_v21, %v1496_v44  ;;  %v1744_v3 = vld [vmem:[#allocation2 + $0x38] sm:$0xff] (%p406_p9)  ;;  %1780 = vst [vmem:[%s3065_s27 + $0x20] sm:$0xff] (%p406_p9), %v1764_v49 }
 0x544   : >> { %1732 = vst [vmem:[#allocation2 + $0x58] sm:$0xff] %v1716_v54  ;;  %v1743_v2 = vld [vmem:[#allocation2 + $0x30] sm:$0xff] (%p406_p9)  ;;  %v1767_v6 = vadd.f32 (%p406_p9), %v1958_v45, %v1744_v3 }
 0x545   : >> { %1731 = vst [vmem:[#allocation2 + $0x50] sm:$0xff] %v1715_v24  ;;  %v2466_v58 = vpop.f32.mrb[52].mxu0  ;;  %v1766_v5 = vadd.f32 (%p406_p9), %v1958_v45, %v1743_v2 }
 0x546   : >> { %v1718_v55 = vadd.f32 %v2466_v58, %v1499_v27  ;;  %v1686_v56 = vpop.f32.mrb[53].mxu0  ;;  %1783 = vst [vmem:[%s3065_s27 + $0x38] sm:$0xff] (%p406_p9), %v1767_v6 }
 0x547   : >> { %v1717_v59 = vadd.f32 %v1686_v56, %v1498_v29  ;;  %408 = sbr.rel (!%p406_p9) target bundleno = 51 (0x33), region = 114  ;;  %v1746_v8 = vld [vmem:[#allocation2 + $0x48] sm:$0xff] (%p406_p9)  ;;  %1782 = vst [vmem:[%s3065_s27 + $0x30] sm:$0xff] (%p406_p9), %v1766_v5 }
 0x548   : >> { %1734 = vst [vmem:[#allocation2 + $0x68] sm:$0xff] %v1718_v55  ;;  %v1745_v7 = vld [vmem:[#allocation2 + $0x40] sm:$0xff] (%p406_p9)  ;;  %v1769_v11 = vadd.f32 (%p406_p9), %v1958_v45, %v1746_v8 }
 0x549   : >> { %1733 = vst [vmem:[#allocation2 + $0x60] sm:$0xff] %v1717_v59  ;;  %v2469_v51 = vpop.f32.mrb[54].mxu0  ;;  %v1768_v10 = vadd.f32 (%p406_p9), %v1958_v45, %v1745_v7 }
 0x54a   : >> { %v1720_v61 = vadd.f32 %v2469_v51, %v1501_v47  ;;  %v1696_v62 = vpop.f32.mrb[55].mxu0  ;;  %1785 = vst [vmem:[%s3065_s27 + $0x48] sm:$0xff] (%p406_p9), %v1769_v11 }
 0x54b   : >> { %v1719_v57 = vadd.f32 %v1696_v62, %v1500_v48  ;;  %v1748_v13 = vld [vmem:[#allocation2 + $0x58] sm:$0xff] (%p406_p9)  ;;  %1784 = vst [vmem:[%s3065_s27 + $0x40] sm:$0xff] (%p406_p9), %v1768_v10 }
 0x54c   : >> { %1736 = vst [vmem:[#allocation2 + $0x78] sm:$0xff] %v1720_v61  ;;  %v1747_v9 = vld [vmem:[#allocation2 + $0x50] sm:$0xff] (%p406_p9)  ;;  %v1771_v16 = vadd.f32 (%p406_p9), %v1958_v45, %v1748_v13 }
 0x54d   : >> { %1735 = vst [vmem:[#allocation2 + $0x70] sm:$0xff] %v1719_v57  ;;  %v1770_v12 = vadd.f32 (%p406_p9), %v1958_v45, %v1747_v9 }
 0x54e   : > { %1787 = vst [vmem:[%s3065_s27 + $0x58] sm:$0xff] %v1771_v16 }
 0x54f   : > { %v1750_v15 = vld [vmem:[#allocation2 + $0x68] sm:$0xff]  ;;  %1786 = vst [vmem:[%s3065_s27 + $0x50] sm:$0xff] %v1770_v12 }
 0x550   : > { %v1749_v14 = vld [vmem:[#allocation2 + $0x60] sm:$0xff]  ;;  %v1773_v32 = vadd.f32 %v1958_v45, %v1750_v15 }
 0x551   : > { %v1772_v30 = vadd.f32 %v1958_v45, %v1749_v14 }
 0x552   : > { %1789 = vst [vmem:[%s3065_s27 + $0x68] sm:$0xff] %v1773_v32 }
 0x553   : > { %v1752_v36 = vld [vmem:[#allocation2 + $0x78] sm:$0xff]  ;;  %1788 = vst [vmem:[%s3065_s27 + $0x60] sm:$0xff] %v1772_v30 }
 0x554   : > { %v1751_v33 = vld [vmem:[#allocation2 + $0x70] sm:$0xff]  ;;  %v1775_v42 = vadd.f32 %v1958_v45, %v1752_v36 }
 0x555   : > { %v1774_v37 = vadd.f32 %v1958_v45, %v1751_v33 }
 0x556   : > { %1791 = vst [vmem:[%s3065_s27 + $0x78] sm:$0xff] %v1775_v42 }
 0x557   : > { %1790 = vst [vmem:[%s3065_s27 + $0x70] sm:$0xff] %v1774_v37 }
 0x558   : > { %2831 = shalt.err (!%p2828_p3)
}
 0x559   : > { %s2832_s11 = scalar_lea.hbm %s3517_s21, 2048  ;;  %s2836_s17 = scalar_lea.hbm %s3582_s10, 4096 }
 0x55a   : > { %p2833_p4 = scmp.ne.s32.totalorder %s3517_s21, %s2832_s11  ;;  %p2837_p11 = scmp.lt.u32.totalorder %s3517_s21, %s3582_s10 }
 0x55b   : > { %p2838_p9 = scmp.lt.u32.totalorder %s2836_s17, %s2832_s11  ;;  %p2840_p12 = scmp.lt.u32.totalorder %s2832_s11, %s3517_s21 }
 0x55c   : > { %p2834_p7 = pnand %p2833_p4, %p2992_p5 }
 0x55d   : > { %p2839_p10 = por %p2838_p9, %p2837_p11 }
 0x55e   : > { %p2835_p8 = pneg %p2834_p7 }
 0x55f   : > { %p2841_p13 = por %p2840_p12, %p2839_p10 }
 0x561   : > { %p2842_p0 = pnand %p2841_p13, %p2835_p8 }
 0x563   : > { %2845 = shalt.err (!%p2842_p0)
}
 0x564   : > { %s2897_s26 = smov 128   ;;  %s2898_s29 = smov 8  }
 0x565   : > { %2682 = dma.vmem_to_hbm [thread:$0]  (%p2992_p5), %s3519_s12, 2048, %s3517_s21, %s3531_s25, %s2897_s26, %s2897_s26, %s2898_s29  }
 0x566 PF: > { %p2694_p1 = scmp.ge.s32.totalorder %s2888_s16, 2  ;;  %s1821_s18 = sand.u32 1, %s2876_s13  }
 0x567   : > { %s1822_s11 = scalar_lea.sflag [#allocation4], %s1821_s18 }
 0x568   : > { %p2689_p2 = pnand %p2694_p1, %p2996_p6 }
 0x56a   : > { %2871 = dma.done.wait (!%p2689_p2), %s1822_s11, 2048  }
 0x56b   : > { %2873 = vsyncadd (!%p2689_p2), %s1822_s11, 4294965248  ;;  %p21_p3 = scmp.ge.s32.totalorder %s2979_s19, 4   ;;  %s3588_s13 = smov %s2880_s14 }
 0x56c   : > { %s3589_s14 = smov %s2884_s15  ;;  %s3590_s15 = smov %s2990_s22 }
 0x56d   : > { %s3591_s16 = smov %s2979_s19  ;;  %23 = sbr.rel (!%p21_p3) target bundleno = 4 (0x4), region = 125 }
 0x574   :  { %1827 = vsyncpa [#allocation4], 1 }
 0x575   :  { %1829 = vsyncpa [#allocation4 + $0x1], 1 }
 0x576   :  { %1830 = vsyncpa [#allocation5], 1 }
 0x577   :  { %1832 = vsyncpa [#allocation5 + $0x1], 1 }

// kernel: tpu_custom_call.1
= control target key start
LH: loop header
LB: loop body
LE: loop exit
PB: predicated region body
PF: predicated region fallthrough
CT: control target
= control target key end

     0   :  { %15 = vsyncpa [#allocation5], 0  ;;  %s3572_s0 = inlined_call_operand.vmem [shape: f32[2], index: 0, kind: input, shape index: {}]   ;;  %s3573_s1 = inlined_call_operand.vmem [shape: f32[2,128,128], index: 1, kind: input, shape index: {}]   ;;  %s3574_s2 = inlined_call_operand.vmem [shape: f32[2,128,64], index: 2, kind: input, shape index: {}]   ;;  %s3575_s3 = inlined_call_operand.vmem [shape: f32[2,1,64], index: 3, kind: input, shape index: {}]   ;;  %s3576_s4 = inlined_call_operand.vmem [shape: f32[2,128,64], index: 4, kind: input, shape index: {}]   ;;  %s3577_s5 = inlined_call_operand.vmem [shape: f32[2,1,64], index: 5, kind: input, shape index: {}]   ;;  %s3578_s6 = inlined_call_operand.vmem [shape: f32[2,128,64], index: 6, kind: input, shape index: {}]   ;;  %s3579_s7 = inlined_call_operand.vmem [shape: f32[2,1,64], index: 7, kind: input, shape index: {}]   ;;  %s3580_s8 = inlined_call_operand.vmem [shape: f32[2,64,128], index: 8, kind: input, shape index: {}]   ;;  %s3581_s9 = inlined_call_operand.vmem [shape: f32[1,128], index: 9, kind: input, shape index: {}]   ;;  %s3582_s10 = inlined_call_operand.hbm [shape: f32[2,128,128], index: 10, kind: output, shape index: {}]  }
   0x1   :  { %16 = vsyncpa [#allocation4], 0 }
   0x2   :  { %18 = vsyncpa [#allocation4 + $0x1], 0  ;;  %s2954_s13 = smov 0   ;;  %s2956_s14 = smov 0  }
   0x3   :  { %s2958_s15 = smov 0   ;;  %s2960_s16 = smov 0  }
   0x4 LB: > { %s2975_s17 = sadd.s32 4294967295, %s2888_s16   ;;  %s1896_s18 = sadd.s32 4294967294, %s2888_s16   ;;  %s2888_s16 = sphi %s2960_s16, %s3591_s16   ;;  %s2884_s15 = sphi %s2958_s15, %s3590_s15   ;;  %s2880_s14 = sphi %s2956_s14, %s3589_s14   ;;  %s2876_s13 = sphi %s2954_s13, %s3588_s13  }
   0x5   : > { %s2979_s19 = sadd.s32 1, %s2888_s16   ;;  %s246_s20 = sadd.s32 1, %s2884_s15 }
   0x6   : > { %s243_s21 = ssub.s32 %s2888_s16, %s2979_s19  ;;  %p256_p0 = scmp.ne.s32.totalorder %s2884_s15, %s2880_s14 }
   0x7   : > { %p244_p1 = scmp.eq.s32.totalorder %s243_s21, 0  ;;  %p257_p2 = scmp.eq.s32.totalorder %s2975_s17, 1 }
   0x8   : > { %p262_p3 = scmp.ne.s32.totalorder %s2880_s14, %s2876_s13  ;;  %p263_p4 = scmp.eq.s32.totalorder %s1896_s18, 1 }
   0x9   : > { %s2990_s22 = scalar_select %p244_p1, %s2884_s15, %s246_s20  }
   0xa   : > { %p2992_p5 = por %p257_p2, %p256_p0  ;;  %p2996_p6 = por %p263_p4, %p262_p3 }
   0xb   : > { %p1897_p7 = scmp.ge.s32.totalorder %s2888_s16, 1  ;;  %p270_p8 = scmp.lt.s32.totalorder %s2888_s16, 3 }
   0xc   : > { %p2692_p9 = scmp.eq.s32.totalorder %s2975_s17, 0  ;;  %s283_s28 = sshll.u32 %s3572_s0, 4  ;;  %s284_s28 = int_to_ptr.vmem [resolvable:$true] %s283_s28 }
   0xd   : > { %p3003_p10 = pnand %p1897_p7, %p270_p8  ;;  %s2803_s29 = scalar_lea.vmem %s284_s28, 16 }
   0xe   : > { %p2804_p13 = scmp.ne.s32.totalorder %s284_s28, %s2803_s29  ;;  %p2811_p3 = scmp.lt.s32.totalorder %s284_s28, %s284_s28 }
   0xf   : > { %p2684_p11 = pneg %p3003_p10  ;;  %p2812_p4 = scmp.lt.s32.totalorder %s2803_s29, %s2803_s29 }
  0x11   : > { %p2685_p12 = pnand %p2692_p9, %p2684_p11  ;;  %p2813_p7 = por %p2812_p4, %p2811_p3 }
  0x13   : > { %p2805_p0 = pneg %p2685_p12 }
  0x15   : > { %p2806_p1 = pnand %p2805_p0, %p2804_p13 }
  0x17   : > { %p2807_p2 = pneg %p2806_p1 }
  0x19   : > { %p2814_p8 = pnand %p2813_p7, %p2807_p2 }
  0x1b   : > { %2817 = shalt.err (!%p2814_p8)
}
  0x1c   : > { %s2894_s30 = smov [#allocation3]   ;;  %328 = sbr.rel (%p3003_p10) target bundleno = 1382 (0x566), region = 60 }
  0x1d   : > { %2687 = dma.vmem_to_smem (!%p2685_p12), %s284_s28, 16, %s2894_s30, [#allocation5]  }
  0x23   : > { %2867 = dma.done.wait (%p2692_p9), [#allocation5], 16  }
  0x24   : > { %2869 = vsyncadd (%p2692_p9), [#allocation5], 4294967280 }
  0x25   : > { %334 = sfence }
  0x26   : > { %s364_s11 = sand.u32 1, %s2880_s14   ;;  %p367_p11 = scmp.lt.s32.totalorder %s2975_s17, 1  ;;  %v2895_v0 = vmov 0.0  }
  0x27   : > { %s3024_s12 = sshll.u32 %s364_s11, 7  ;;  %388 = vst [vmem:[#allocation2] sm:$0xff] %v2895_v0  ;;  %389 = vst [vmem:[#allocation2 + $0x8] sm:$0xff] %v2895_v0  ;;  %s3067_s28 = smov 0  }
  0x28   : > { %390 = vst [vmem:[#allocation2 + $0x10] sm:$0xff] %v2895_v0  ;;  %391 = vst [vmem:[#allocation2 + $0x18] sm:$0xff] %v2895_v0  ;;  %s368_s18 = scalar_select %p367_p11, %s2975_s17, 1 }
  0x29   : > { %392 = vst [vmem:[#allocation2 + $0x20] sm:$0xff] %v2895_v0  ;;  %393 = vst [vmem:[#allocation2 + $0x28] sm:$0xff] %v2895_v0  ;;  %s3065_s27 = scalar_lea.vmem [#allocation6], %s3024_s12 }
  0x2a   : > { %394 = vst [vmem:[#allocation2 + $0x30] sm:$0xff] %v2895_v0  ;;  %395 = vst [vmem:[#allocation2 + $0x38] sm:$0xff] %v2895_v0  ;;  %s1964_s20 = sshll.u32 %s368_s18, 7 }
  0x2b   : > { %396 = vst [vmem:[#allocation2 + $0x40] sm:$0xff] %v2895_v0  ;;  %397 = vst [vmem:[#allocation2 + $0x48] sm:$0xff] %v2895_v0  ;;  %s371_s26 = scalar_lea.vmem %s3573_s1, %s1964_s20 }
  0x2c   : > { %398 = vst [vmem:[#allocation2 + $0x50] sm:$0xff] %v2895_v0  ;;  %399 = vst [vmem:[#allocation2 + $0x58] sm:$0xff] %v2895_v0  ;;  %v3032_v1 = vld [vmem:[%s371_s26] sm:$0xff]  ;;  %v3034_v2 = vld [vmem:[%s371_s26 + $0x8] sm:$0xff] }
  0x2d   : > { %400 = vst [vmem:[#allocation2 + $0x60] sm:$0xff] %v2895_v0  ;;  %401 = vst [vmem:[#allocation2 + $0x68] sm:$0xff] %v2895_v0  ;;  %v3036_v3 = vld [vmem:[%s371_s26 + $0x10] sm:$0xff]  ;;  %v3038_v4 = vld [vmem:[%s371_s26 + $0x18] sm:$0xff] }
  0x2e   : > { %402 = vst [vmem:[#allocation2 + $0x70] sm:$0xff] %v2895_v0  ;;  %403 = vst [vmem:[#allocation2 + $0x78] sm:$0xff] %v2895_v0  ;;  %v3040_v5 = vld [vmem:[%s371_s26 + $0x20] sm:$0xff]  ;;  %v3042_v6 = vld [vmem:[%s371_s26 + $0x28] sm:$0xff] }
  0x2f   : > { %v3044_v7 = vld [vmem:[%s371_s26 + $0x30] sm:$0xff]  ;;  %v3046_v8 = vld [vmem:[%s371_s26 + $0x38] sm:$0xff]  ;;  %v3048_v9 = vld [vmem:[%s371_s26 + $0x40] sm:$0xff] }
  0x30   : > { %v3050_v10 = vld [vmem:[%s371_s26 + $0x48] sm:$0xff]  ;;  %v3052_v11 = vld [vmem:[%s371_s26 + $0x50] sm:$0xff]  ;;  %v3054_v12 = vld [vmem:[%s371_s26 + $0x58] sm:$0xff] }
  0x31   : > { %v3056_v13 = vld [vmem:[%s371_s26 + $0x60] sm:$0xff]  ;;  %v3058_v14 = vld [vmem:[%s371_s26 + $0x68] sm:$0xff]  ;;  %v3060_v15 = vld [vmem:[%s371_s26 + $0x70] sm:$0xff] }
  0x32   : > { %v3062_v16 = vld [vmem:[%s371_s26 + $0x78] sm:$0xff] }
  0x33 LB: >> { %2238 = vmatprep.mubr.f32.mxu1 %v3032_v1  ;;  %2182 = vmatprep.mubr.f32.mxu0 %v3032_v1  ;;  %s3075_s29 = sshll.u32 %s2892_s28, 7  ;;  %s598_s18 = scalar_lea.vmem %s3577_s5, %s2892_s28  ;;  %vm921_vm0 = vcmask 523264   ;;  %s2892_s28 = sphi %s3067_s28, %s409_s28  }
  0x34   : >> { %s3081_s12 = scalar_lea.vmem %s3576_s4, %s3075_s29  ;;  %s3093_s25 = scalar_lea.vmem %s3574_s2, %s3075_s29  ;;  %vm3166_vm1 = vmpackc.low %vm921_vm0, %vm921_vm0 }
  0x35   : >> { %v582_v17 = vld [vmem:[%s3081_s12] sm:$0xff]  ;;  %v583_v18 = vld [vmem:[%s3081_s12 + $0x8] sm:$0xff]  ;;  %v584_v19 = vld [vmem:[%s3081_s12 + $0x10] sm:$0xff]  ;;  %s428_s21 = scalar_lea.vmem %s3575_s3, %s2892_s28  ;;  %s3266_s30 = scalar_lea.vmem %s3578_s6, %s3075_s29 }
  0x36   : >> { %v2502_v20 = vpack.c.bf16 %v583_v18, %v582_v17  ;;  %v585_v21 = vld [vmem:[%s3081_s12 + $0x18] sm:$0xff]  ;;  %v586_v23 = vld [vmem:[%s3081_s12 + $0x20] sm:$0xff]  ;;  %v587_v24 = vld [vmem:[%s3081_s12 + $0x28] sm:$0xff]  ;;  %s1163_s29 = sld [smem:[#allocation3 + %s2892_s28]]  ;;  %s768_s20 = scalar_lea.vmem %s3579_s7, %s2892_s28 }
  0x37   : >> { %v2506_v22 = vpack.c.bf16 %v585_v21, %v584_v19  ;;  %v2510_v25 = vpack.c.bf16 %v587_v24, %v586_v23  ;;  %v588_v26 = vld [vmem:[%s3081_s12 + $0x30] sm:$0xff]  ;;  %v412_v27 = vld [vmem:[%s3093_s25] sm:$0xff]  ;;  %v413_v28 = vld [vmem:[%s3093_s25 + $0x8] sm:$0xff] }
  0x38   : >> { %2503 = vmatprep.subr.bf16.mxu1 %v2502_v20  ;;  %v589_v29 = vld [vmem:[%s3081_s12 + $0x38] sm:$0xff]  ;;  %v2470_v30 = vpack.c.bf16 %v413_v28, %v412_v27  ;;  %v414_v31 = vld [vmem:[%s3093_s25 + $0x10] sm:$0xff]  ;;  %v416_v34 = vld [vmem:[%s3093_s25 + $0x20] sm:$0xff] }
  0x39   : >> { %2505 = vmatpush3.bf16.msra.mxu1 %v2502_v20  ;;  %v415_v32 = vld [vmem:[%s3093_s25 + $0x18] sm:$0xff]  ;;  %v417_v35 = vld [vmem:[%s3093_s25 + $0x28] sm:$0xff]  ;;  %v2514_v36 = vpack.c.bf16 %v589_v29, %v588_v26  ;;  %v590_v37 = vld [vmem:[%s3081_s12 + $0x40] sm:$0xff] }
  0x3a   : >> { %2507 = vmatprep.subr.bf16.mxu1 %v2506_v22  ;;  %v2474_v33 = vpack.c.bf16 %v415_v32, %v414_v31  ;;  %2471 = vmatprep.subr.bf16.mxu0 %v2470_v30  ;;  %v591_v38 = vld [vmem:[%s3081_s12 + $0x48] sm:$0xff]  ;;  %v2478_v39 = vpack.c.bf16 %v417_v35, %v416_v34  ;;  %v418_v40 = vld [vmem:[%s3093_s25 + $0x30] sm:$0xff]  ;;  %v419_v41 = vld [vmem:[%s3093_s25 + $0x38] sm:$0xff] }
  0x3b   : >> { %2473 = vmatpush3.bf16.msra.mxu0 %v2470_v30  ;;  %v2518_v42 = vpack.c.bf16 %v591_v38, %v590_v37  ;;  %v592_v43 = vld [vmem:[%s3081_s12 + $0x50] sm:$0xff]  ;;  %v593_v44 = vld [vmem:[%s3081_s12 + $0x58] sm:$0xff]  ;;  %v2482_v45 = vpack.c.bf16 %v419_v41, %v418_v40  ;;  %v420_v46 = vld [vmem:[%s3093_s25 + $0x40] sm:$0xff] }
  0x3c   : >> { %2475 = vmatprep.subr.bf16.mxu0 %v2474_v33  ;;  %v421_v47 = vld [vmem:[%s3093_s25 + $0x48] sm:$0xff]  ;;  %v2522_v48 = vpack.c.bf16 %v593_v44, %v592_v43  ;;  %v594_v49 = vld [vmem:[%s3081_s12 + $0x60] sm:$0xff]  ;;  %v422_v52 = vld [vmem:[%s3093_s25 + $0x50] sm:$0xff] }
  0x3d   : >> { %2509 = vmatpush3.bf16.msra.mxu1 %v2506_v22  ;;  %v595_v50 = vld [vmem:[%s3081_s12 + $0x68] sm:$0xff]  ;;  %v2486_v51 = vpack.c.bf16 %v421_v47, %v420_v46  ;;  %v423_v53 = vld [vmem:[%s3093_s25 + $0x58] sm:$0xff]  ;;  %v596_v55 = vld [vmem:[%s3081_s12 + $0x70] sm:$0xff] }
  0x3e   : >> { %2511 = vmatprep.subr.bf16.mxu1 %v2510_v25  ;;  %v2526_v54 = vpack.c.bf16 %v595_v50, %v594_v49  ;;  %v597_v56 = vld [vmem:[%s3081_s12 + $0x78] sm:$0xff]  ;;  %v2490_v57 = vpack.c.bf16 %v423_v53, %v422_v52  ;;  %v424_v58 = vld [vmem:[%s3093_s25 + $0x60] sm:$0xff]  ;;  %v425_v59 = vld [vmem:[%s3093_s25 + $0x68] sm:$0xff] }
  0x3f   : >> { %2477 = vmatpush3.bf16.msra.mxu0 %v2474_v33  ;;  %v2530_v60 = vpack.c.bf16 %v597_v56, %v596_v55  ;;  %v2494_v61 = vpack.c.bf16 %v425_v59, %v424_v58  ;;  %v426_v62 = vld [vmem:[%s3093_s25 + $0x70] sm:$0xff]  ;;  %v427_v63 = vld [vmem:[%s3093_s25 + $0x78] sm:$0xff]  ;;  %v3156_v17 = vld [vmem:[%s598_s18] ss:$0 sm:$0xff] }
  0x40   : >> { %2479 = vmatprep.subr.bf16.mxu0 %v2478_v39  ;;  %v2498_v0 = vpack.c.bf16 %v427_v63, %v426_v62  ;;  %v752_v22 = vld [vmem:[%s3266_s30] sm:$0xff] }
  0x41   : >> { %2513 = vmatpush3.bf16.msra.mxu1 %v2510_v25  ;;  %v3170_v25 = vld [vmem:[%s428_s21] ss:$0 sm:$0xff]  ;;  %s1941_s21 = sshll.u32 %s2892_s28, 6  ;;  %s409_s28 = sadd.s32 1, %s2892_s28  }
  0x42   : >> { %2515 = vmatprep.subr.bf16.mxu1 %v2514_v36  ;;  %p406_p9 = scmp.ge.s32.totalorder %s409_s28, 2  }
  0x43   : >> { %2481 = vmatpush3.bf16.msra.mxu0 %v2478_v39  ;;  %s1965_s28 = sshll.u32 (%p406_p9), %s2975_s17, 11  ;;  %s1806_s12 = sshll.u32 (%p406_p9), %s3065_s27, 4  ;;  %s3519_s12 = int_to_ptr.vmem [resolvable:$true] %s1806_s12 }
  0x44   : >> { %2483 = vmatprep.subr.bf16.mxu0 %v2482_v45  ;;  %s3531_s25 = scalar_lea.sflag (%p406_p9), [#allocation4], %s364_s11  ;;  %s2818_s26 = scalar_lea.vmem (%p406_p9), %s3519_s12, 2048 }
  0x45   : >> { %2517 = vmatpush3.bf16.msra.mxu1 %v2514_v36  ;;  %p2819_p10 = scmp.ne.s32.totalorder (%p406_p9), %s3519_s12, %s2818_s26 }
  0x46   : >> { %2519 = vmatprep.subr.bf16.mxu1 %v2518_v42 }
  0x47   : >> { %2485 = vmatpush3.bf16.msra.mxu0 %v2482_v45  ;;  %p2820_p12 = pnand (%p406_p9), %p2819_p10, %p2992_p5 }
  0x48   : >> { %2487 = vmatprep.subr.bf16.mxu0 %v2486_v51 }
  0x49   : >> { %2521 = vmatpush3.bf16.msra.mxu1 %v2518_v42  ;;  %p2821_p13 = pneg (%p406_p9), %p2820_p12 }
  0x4a   : >> { %2523 = vmatprep.subr.bf16.mxu1 %v2522_v48 }
  0x4b   : >> { %2489 = vmatpush3.bf16.msra.mxu0 %v2486_v51 }
  0x4c   : >> { %2491 = vmatprep.subr.bf16.mxu0 %v2490_v57 }
  0x4d   : >> { %2525 = vmatpush3.bf16.msra.mxu1 %v2522_v48 }
  0x4e   : >> { %2527 = vmatprep.subr.bf16.mxu1 %v2526_v54 }
  0x4f   : >> { %2493 = vmatpush3.bf16.msra.mxu0 %v2490_v57 }
  0x50   : >> { %2495 = vmatprep.subr.bf16.mxu0 %v2494_v61 }
  0x51   : >> { %2529 = vmatpush3.bf16.msra.mxu1 %v2526_v54 }
  0x52   : >> { %2531 = vmatprep.subr.bf16.mxu1 %v2530_v60 }
  0x53   : >> { %2497 = vmatpush3.bf16.msra.mxu0 %v2494_v61 }
  0x54   : >> { %2499 = vmatprep.subr.bf16.mxu0 %v2498_v0 }
  0x55   : >> { %2533 = vmatpush3.bf16.msra.mxu1 %v2530_v60 }
  0x57   : >> { %2501 = vmatpush3.bf16.msra.mxu0 %v2498_v0 }
  0x58   : >> { %2239 = vmatmul.mubr.f32.vlgmr.msra.gmra.mrb[0].mxu1 %v3034_v2 }
  0x59   : >> { %2241 = vmatprep.mubr.f32.mxu1 %v3036_v3 }
  0x5a   : >> { %2183 = vmatmul.mubr.f32.vlgmr.msra.gmra.mrb[0].mxu0 %v3034_v2 }
  0x5b   : >> { %2185 = vmatprep.mubr.f32.mxu0 %v3036_v3 }
  0x5c   : >> { %2242 = vmatmul.mubr.f32.gmra.mrb[2].mxu1 %v3038_v4 }
  0x5d   : >> { %2244 = vmatprep.mubr.f32.mxu1 %v3040_v5 }
  0x5e   : >> { %2186 = vmatmul.mubr.f32.gmra.mrb[2].mxu0 %v3038_v4 }
  0x5f   : >> { %2188 = vmatprep.mubr.f32.mxu0 %v3040_v5 }
  0x60   : >> { %2245 = vmatmul.mubr.f32.gmra.mrb[4].mxu1 %v3042_v6 }
  0x61   : >> { %2247 = vmatprep.mubr.f32.mxu1 %v3044_v7 }
  0x62   : >> { %2189 = vmatmul.mubr.f32.gmra.mrb[4].mxu0 %v3042_v6 }
  0x63   : >> { %2191 = vmatprep.mubr.f32.mxu0 %v3044_v7 }
  0x64   : >> { %2248 = vmatmul.mubr.f32.gmra.mrb[6].mxu1 %v3046_v8 }
  0x65   : >> { %2250 = vmatprep.mubr.f32.mxu1 %v3048_v9 }
  0x66   : >> { %2192 = vmatmul.mubr.f32.gmra.mrb[6].mxu0 %v3046_v8 }
  0x67   : >> { %2194 = vmatprep.mubr.f32.mxu0 %v3048_v9 }
  0x68   : >> { %2251 = vmatmul.mubr.f32.gmra.mrb[8].mxu1 %v3050_v10 }
  0x69   : >> { %2253 = vmatprep.mubr.f32.mxu1 %v3052_v11 }
  0x6a   : >> { %2195 = vmatmul.mubr.f32.gmra.mrb[8].mxu0 %v3050_v10 }
  0x6b   : >> { %2197 = vmatprep.mubr.f32.mxu0 %v3052_v11 }
  0x6c   : >> { %2254 = vmatmul.mubr.f32.gmra.mrb[10].mxu1 %v3054_v12 }
  0x6d   : >> { %2256 = vmatprep.mubr.f32.mxu1 %v3056_v13 }
  0x6e   : >> { %2198 = vmatmul.mubr.f32.gmra.mrb[10].mxu0 %v3054_v12 }
  0x6f   : >> { %2200 = vmatprep.mubr.f32.mxu0 %v3056_v13 }
  0x70   : >> { %2257 = vmatmul.mubr.f32.gmra.mrb[12].mxu1 %v3058_v14 }
  0x71   : >> { %2259 = vmatprep.mubr.f32.mxu1 %v3060_v15 }
  0x72   : >> { %2201 = vmatmul.mubr.f32.gmra.mrb[12].mxu0 %v3058_v14 }
  0x73   : >> { %2203 = vmatprep.mubr.f32.mxu0 %v3060_v15 }
  0x74   : >> { %2260 = vmatmul.mubr.f32.gmra.mrb[14].mxu1 %v3062_v16 }
  0x76   : >> { %2204 = vmatmul.mubr.f32.gmra.mrb[14].mxu0 %v3062_v16 }
  0x77   : >> { %2294 = vmatprep.mubr.f32.mxu0 %v3032_v1 }
 0x12b   : >> { %v2240_v18 = vpop.f32.mrb[0].mxu1 }
 0x12c   : >> { %v678_v19 = vadd.f32 %v2240_v18, %v3156_v17  ;;  %v672_v20 = vpop.f32.mrb[1].mxu1 }
 0x12d   : >> { %v673_v21 = vadd.f32 %v3156_v17, %v672_v20  ;;  %v3173_v28 = vpop.f32.mrb[0].mxu0 }
 0x12e   : >> { %v502_v30 = vpop.f32.mrb[1].mxu0 }
 0x12f   : >> { %v2566_v23 = vpack.c.bf16 %v678_v19, %v673_v21  ;;  %v2243_v24 = vpop.f32.mrb[2].mxu1  ;;  %v503_v31 = vadd.f32 %v3170_v25, %v502_v30 }
 0x130   : >> { %v688_v26 = vadd.f32 %v2243_v24, %v3156_v17  ;;  %v682_v27 = vpop.f32.mrb[3].mxu1 }
 0x131   : >> { %2568 = vmatprep.subr.msk.bf16.mxu1 %vm3166_vm1, %v2566_v23  ;;  %v683_v29 = vadd.f32 %v3156_v17, %v682_v27  ;;  %v2187_v36 = vpop.f32.mrb[2].mxu0  ;;  %2350 = vmatprep.mubr.msk.f32.mxu1 %vm921_vm0, %v503_v31 }
 0x132   : >> { %2571 = vmatpush3.bf16.xpose.msk.msra.mxu1 %vm3166_vm1, %v2566_v23  ;;  %v3187_v38 = vadd.f32 %v2187_v36, %v3170_v25  ;;  %v3189_v39 = vpop.f32.mrb[3].mxu0 }
 0x133   : >> { %v2572_v32 = vpack.c.bf16 %v688_v26, %v683_v29  ;;  %v2246_v33 = vpop.f32.mrb[4].mxu1 }
 0x134   : >> { %v698_v34 = vadd.f32 %v2246_v33, %v3156_v17  ;;  %v692_v35 = vpop.f32.mrb[5].mxu1 }
 0x135   : >> { %2574 = vmatprep.subr.msk.bf16.mxu1 %vm3166_vm1, %v2572_v32  ;;  %v693_v37 = vadd.f32 %v3156_v17, %v692_v35  ;;  %v2190_v44 = vpop.f32.mrb[4].mxu0 }
 0x136   : >> { %v3194_v46 = vadd.f32 %v2190_v44, %v3170_v25  ;;  %v522_v47 = vpop.f32.mrb[5].mxu0 }
 0x137   : >> { %v2578_v40 = vpack.c.bf16 %v698_v34, %v693_v37  ;;  %v2249_v41 = vpop.f32.mrb[6].mxu1  ;;  %v523_v48 = vadd.f32 %v3170_v25, %v522_v47 }
 0x138   : >> { %v708_v42 = vadd.f32 %v2249_v41, %v3156_v17  ;;  %v702_v43 = vpop.f32.mrb[7].mxu1 }
 0x139   : >> { %v703_v45 = vadd.f32 %v3156_v17, %v702_v43  ;;  %v2193_v53 = vpop.f32.mrb[6].mxu0 }
 0x13a   : >> { %2577 = vmatpush3.bf16.xpose.msk.msra.mxu1 %vm3166_vm1, %v2572_v32  ;;  %v538_v55 = vadd.f32 %v2193_v53, %v3170_v25  ;;  %v532_v56 = vpop.f32.mrb[7].mxu0  ;;  %v758_v53 = vld [vmem:[%s3266_s30 + $0x30] sm:$0xff] }
 0x13b   : >> { %2580 = vmatprep.subr.msk.bf16.mxu1 %vm3166_vm1, %v2578_v40  ;;  %v2584_v49 = vpack.c.bf16 %v708_v42, %v703_v45  ;;  %v2252_v50 = vpop.f32.mrb[8].mxu1  ;;  %v533_v57 = vadd.f32 %v3170_v25, %v532_v56  ;;  %v760_v56 = vld [vmem:[%s3266_s30 + $0x40] sm:$0xff] }
 0x13c   : >> { %v718_v51 = vadd.f32 %v2252_v50, %v3156_v17  ;;  %v712_v52 = vpop.f32.mrb[9].mxu1 }
 0x13d   : >> { %v713_v54 = vadd.f32 %v3156_v17, %v712_v52  ;;  %v2196_v62 = vpop.f32.mrb[8].mxu0 }
 0x13e   : >> { %v548_v0 = vadd.f32 %v2196_v62, %v3170_v25  ;;  %v542_v18 = vpop.f32.mrb[9].mxu0  ;;  %v764_v62 = vld [vmem:[%s3266_s30 + $0x60] sm:$0xff] }
 0x13f   : >> { %v2590_v58 = vpack.c.bf16 %v718_v51, %v713_v54  ;;  %v2255_v59 = vpop.f32.mrb[10].mxu1  ;;  %v543_v19 = vadd.f32 %v3170_v25, %v542_v18  ;;  %v757_v51 = vld [vmem:[%s3266_s30 + $0x28] sm:$0xff]  ;;  %v759_v54 = vld [vmem:[%s3266_s30 + $0x38] sm:$0xff]  ;;  %v766_v18 = vld [vmem:[%s3266_s30 + $0x70] sm:$0xff] }
 0x140   : >> { %v728_v60 = vadd.f32 %v2255_v59, %v3156_v17  ;;  %v722_v61 = vpop.f32.mrb[11].mxu1  ;;  %v762_v59 = vld [vmem:[%s3266_s30 + $0x50] sm:$0xff] }
 0x141   : >> { %v723_v63 = vadd.f32 %v3156_v17, %v722_v61  ;;  %v2199_v26 = vpop.f32.mrb[10].mxu0 }
 0x142   : >> { %2583 = vmatpush3.bf16.xpose.msk.msra.mxu1 %vm3166_vm1, %v2578_v40  ;;  %v558_v29 = vadd.f32 %v2199_v26, %v3170_v25  ;;  %v552_v30 = vpop.f32.mrb[11].mxu0 }
 0x143   : >> { %2586 = vmatprep.subr.msk.bf16.mxu1 %vm3166_vm1, %v2584_v49  ;;  %v2596_v20 = vpack.c.bf16 %v728_v60, %v723_v63  ;;  %v2258_v21 = vpop.f32.mrb[12].mxu1  ;;  %v553_v31 = vadd.f32 %v3170_v25, %v552_v30  ;;  %v763_v60 = vld [vmem:[%s3266_s30 + $0x58] sm:$0xff]  ;;  %v765_v63 = vld [vmem:[%s3266_s30 + $0x68] sm:$0xff] }
 0x144   : >> { %v738_v23 = vadd.f32 %v2258_v21, %v3156_v17  ;;  %v732_v24 = vpop.f32.mrb[13].mxu1  ;;  %v2554_v61 = vpack.c.bf16 %v763_v60, %v762_v59  ;;  %v3300_v21 = vstv %s1163_s29 }
 0x145   : >> { %v733_v27 = vadd.f32 %v3156_v17, %v732_v24  ;;  %v2202_v36 = vpop.f32.mrb[12].mxu0 }
 0x146   : >> { %v568_v40 = vadd.f32 %v2202_v36, %v3170_v25  ;;  %v562_v41 = vpop.f32.mrb[13].mxu0 }
 0x147   : >> { %v2602_v32 = vpack.c.bf16 %v738_v23, %v733_v27  ;;  %v2261_v33 = vpop.f32.mrb[14].mxu1  ;;  %v563_v42 = vadd.f32 %v3170_v25, %v562_v41 }
 0x148   : >> { %v748_v34 = vadd.f32 %v2261_v33, %v3156_v17  ;;  %v742_v35 = vpop.f32.mrb[15].mxu1 }
 0x149   : >> { %v743_v37 = vadd.f32 %v3156_v17, %v742_v35  ;;  %v2205_v44 = vpop.f32.mrb[14].mxu0  ;;  %v513_v17 = vadd.f32 %v3170_v25, %v3189_v39  ;;  %v755_v39 = vld [vmem:[%s3266_s30 + $0x18] sm:$0xff] }
 0x14a   : >> { %2589 = vmatpush3.bf16.xpose.msk.msra.mxu1 %vm3166_vm1, %v2584_v49  ;;  %v578_v45 = vadd.f32 %v2205_v44, %v3170_v25  ;;  %v572_v47 = vpop.f32.mrb[15].mxu0  ;;  %v508_v49 = vadd.f32 %v3173_v28, %v3170_v25 }
 0x14b   : >> { %2592 = vmatprep.subr.msk.bf16.mxu1 %vm3166_vm1, %v2590_v58  ;;  %v2608_v43 = vpack.c.bf16 %v748_v34, %v743_v37  ;;  %v573_v50 = vadd.f32 %v3170_v25, %v572_v47  ;;  %v753_v25 = vld [vmem:[%s3266_s30 + $0x8] sm:$0xff] }
 0x14c   : >> { %v2534_v28 = vpack.c.bf16 %v753_v25, %v752_v22 }
 0x14e   : >> { %2535 = vmatprep.subr.bf16.mxu0 %v2534_v28 }
 0x14f   : >> { %2537 = vmatpush3.bf16.msra.mxu0 %v2534_v28 }
 0x152   : >> { %2595 = vmatpush3.bf16.xpose.msk.msra.mxu1 %vm3166_vm1, %v2590_v58 }
 0x153   : >> { %2598 = vmatprep.subr.msk.bf16.mxu1 %vm3166_vm1, %v2596_v20 }
 0x15a   : >> { %2601 = vmatpush3.bf16.xpose.msk.msra.mxu1 %vm3166_vm1, %v2596_v20 }
 0x15b   : >> { %2604 = vmatprep.subr.msk.bf16.mxu1 %vm3166_vm1, %v2602_v32 }
 0x162   : >> { %2607 = vmatpush3.bf16.xpose.msk.msra.mxu1 %vm3166_vm1, %v2602_v32 }
 0x163   : >> { %2610 = vmatprep.subr.msk.bf16.mxu1 %vm3166_vm1, %v2608_v43 }
 0x16a   : >> { %2613 = vmatpush3.bf16.xpose.msk.msra.mxu1 %vm3166_vm1, %v2608_v43 }
 0x171   : >> { %2351 = vmatmul.mubr.msk.f32.vlgmr.msra.gmra.mrb[16].mxu1 %vm921_vm0, %v508_v49 }
 0x172   : >> { %2353 = vmatprep.mubr.msk.f32.mxu1 %vm921_vm0, %v513_v17 }
 0x175   : >> { %2354 = vmatmul.mubr.msk.f32.gmra.mrb[18].mxu1 %vm921_vm0, %v3187_v38  ;;  %v754_v38 = vld [vmem:[%s3266_s30 + $0x10] sm:$0xff] }
 0x176   : >> { %2356 = vmatprep.mubr.msk.f32.mxu1 %vm921_vm0, %v523_v48  ;;  %v2538_v48 = vpack.c.bf16 %v755_v39, %v754_v38 }
 0x178   : >> { %2539 = vmatprep.subr.bf16.mxu0 %v2538_v48 }
 0x179   : >> { %2357 = vmatmul.mubr.msk.f32.gmra.mrb[20].mxu1 %vm921_vm0, %v3194_v46  ;;  %v756_v46 = vld [vmem:[%s3266_s30 + $0x20] sm:$0xff]  ;;  %2541 = vmatpush3.bf16.msra.mxu0 %v2538_v48 }
 0x17a   : >> { %2359 = vmatprep.mubr.msk.f32.mxu1 %vm921_vm0, %v533_v57  ;;  %v2542_v52 = vpack.c.bf16 %v757_v51, %v756_v46  ;;  %v761_v57 = vld [vmem:[%s3266_s30 + $0x48] sm:$0xff] }
 0x17b   : >> { %v2550_v58 = vpack.c.bf16 %v761_v57, %v760_v56 }
 0x17c   : >> { %2543 = vmatprep.subr.bf16.mxu0 %v2542_v52 }
 0x17d   : >> { %2360 = vmatmul.mubr.msk.f32.gmra.mrb[22].mxu1 %vm921_vm0, %v538_v55  ;;  %v2546_v55 = vpack.c.bf16 %v759_v54, %v758_v53  ;;  %2545 = vmatpush3.bf16.msra.mxu0 %v2542_v52 }
 0x17e   : >> { %2362 = vmatprep.mubr.msk.f32.mxu1 %vm921_vm0, %v543_v19  ;;  %v767_v19 = vld [vmem:[%s3266_s30 + $0x78] sm:$0xff]  ;;  %s3456_s30 = scalar_lea.vmem %s3580_s8, %s1941_s21  ;;  %s3517_s21 = scalar_lea.hbm (%p406_p9), %s3582_s10, %s1965_s28 }
 0x17f   : >> { %2547 = vmatprep.subr.bf16.mxu0 %v2546_v55  ;;  %v2562_v20 = vpack.c.bf16 %v767_v19, %v766_v18 }
 0x181   : >> { %2363 = vmatmul.mubr.msk.f32.gmra.mrb[24].mxu1 %vm921_vm0, %v548_v0  ;;  %2549 = vmatpush3.bf16.msra.mxu0 %v2546_v55  ;;  %v2558_v0 = vpack.c.bf16 %v765_v63, %v764_v62 }
 0x182   : >> { %2365 = vmatprep.mubr.msk.f32.mxu1 %vm921_vm0, %v553_v31  ;;  %2551 = vmatprep.subr.bf16.mxu0 %v2550_v58 }
 0x185   : >> { %2366 = vmatmul.mubr.msk.f32.gmra.mrb[26].mxu1 %vm921_vm0, %v558_v29  ;;  %2553 = vmatpush3.bf16.msra.mxu0 %v2550_v58  ;;  %v3371_v58 = vld [vmem:[%s768_s20] ss:$0 sm:$0xff] }
 0x186   : >> { %2368 = vmatprep.mubr.msk.f32.mxu1 %vm921_vm0, %v563_v42  ;;  %2555 = vmatprep.subr.bf16.mxu0 %v2554_v61 }
 0x189   : >> { %2369 = vmatmul.mubr.msk.f32.gmra.mrb[28].mxu1 %vm921_vm0, %v568_v40  ;;  %2557 = vmatpush3.bf16.msra.mxu0 %v2554_v61 }
 0x18a   : >> { %2371 = vmatprep.mubr.msk.f32.mxu1 %vm921_vm0, %v573_v50  ;;  %2559 = vmatprep.subr.bf16.mxu0 %v2558_v0 }
 0x18d   : >> { %2372 = vmatmul.mubr.msk.f32.gmra.mrb[30].mxu1 %vm921_vm0, %v578_v45  ;;  %2561 = vmatpush3.bf16.msra.mxu0 %v2558_v0 }
 0x18e   : >> { %2563 = vmatprep.subr.bf16.mxu0 %v2562_v20 }
 0x191   : >> { %2565 = vmatpush3.bf16.msra.mxu0 %v2562_v20 }
 0x194   : >> { %2295 = vmatmul.mubr.f32.vlgmr.msra.gmra.mrb[16].mxu0 %v3034_v2 }
 0x195   : >> { %2297 = vmatprep.mubr.f32.mxu0 %v3036_v3 }
 0x198   : >> { %2298 = vmatmul.mubr.f32.gmra.mrb[18].mxu0 %v3038_v4 }
 0x199   : >> { %2300 = vmatprep.mubr.f32.mxu0 %v3040_v5 }
 0x19c   : >> { %2301 = vmatmul.mubr.f32.gmra.mrb[20].mxu0 %v3042_v6 }
 0x19d   : >> { %2303 = vmatprep.mubr.f32.mxu0 %v3044_v7 }
 0x1a0   : >> { %2304 = vmatmul.mubr.f32.gmra.mrb[22].mxu0 %v3046_v8 }
 0x1a1   : >> { %2306 = vmatprep.mubr.f32.mxu0 %v3048_v9 }
 0x1a4   : >> { %2307 = vmatmul.mubr.f32.gmra.mrb[24].mxu0 %v3050_v10 }
 0x1a5   : >> { %2309 = vmatprep.mubr.f32.mxu0 %v3052_v11 }
 0x1a8   : >> { %2310 = vmatmul.mubr.f32.gmra.mrb[26].mxu0 %v3054_v12 }
 0x1a9   : >> { %2312 = vmatprep.mubr.f32.mxu0 %v3056_v13 }
 0x1ac   : >> { %2313 = vmatmul.mubr.f32.gmra.mrb[28].mxu0 %v3058_v14 }
 0x1ad   : >> { %2315 = vmatprep.mubr.f32.mxu0 %v3060_v15 }
 0x1b0   : >> { %2316 = vmatmul.mubr.f32.gmra.mrb[30].mxu0 %v3062_v16 }
 0x244   : >> { %v2352_v23 = vpop.f32.mrb[16].mxu1 }
 0x245   : >> { %v1084_v24 = vpop.f32.mrb[17].mxu1  ;;  %vm1166_vm3 = vcmp.lt.f32.partialorder %v2352_v23, %v3300_v21 }
 0x246   : >> { %vm1165_vm2 = vcmp.lt.f32.partialorder %v1084_v24, %v3300_v21  ;;  %v3308_v30 = vsel %vm1166_vm3, -10000.0, %v2352_v23 }
 0x247   : >> { %v3303_v26 = vsel %vm1165_vm2, -10000.0, %v1084_v24 }
 0x248   : >> { %1197 = vmax.xlane.f32.xlu0 %v3303_v26  ;;  %v2355_v27 = vpop.f32.mrb[18].mxu1 }
 0x249   : >> { %v1094_v29 = vpop.f32.mrb[19].mxu1  ;;  %vm1168_vm5 = vcmp.lt.f32.partialorder %v2355_v27, %v3300_v21 }
 0x24a   : >> { %vm1167_vm4 = vcmp.lt.f32.partialorder %v1094_v29, %v3300_v21  ;;  %v3316_v34 = vsel %vm1168_vm5, -10000.0, %v2355_v27 }
 0x24b   : >> { %v3310_v31 = vsel %vm1167_vm4, -10000.0, %v1094_v29 }
 0x24c   : >> { %1199 = vmax.xlane.f32.xlu0 %v3308_v30  ;;  %1201 = vmax.xlane.f32.xlu1 %v3310_v31  ;;  %v2358_v32 = vpop.f32.mrb[20].mxu1 }
 0x24d   : >> { %v1104_v33 = vpop.f32.mrb[21].mxu1  ;;  %vm1170_vm7 = vcmp.lt.f32.partialorder %v2358_v32, %v3300_v21 }
 0x24e   : >> { %vm1169_vm6 = vcmp.lt.f32.partialorder %v1104_v33, %v3300_v21  ;;  %v3324_v40 = vsel %vm1170_vm7, -10000.0, %v2358_v32 }
 0x24f   : >> { %v3318_v35 = vsel %vm1169_vm6, -10000.0, %v1104_v33 }
 0x250   : >> { %1203 = vmax.xlane.f32.xlu1 %v3316_v34  ;;  %1205 = vmax.xlane.f32.xlu0 %v3318_v35  ;;  %v2361_v36 = vpop.f32.mrb[22].mxu1 }
 0x251   : >> { %v1114_v37 = vpop.f32.mrb[23].mxu1  ;;  %vm1172_vm9 = vcmp.lt.f32.partialorder %v2361_v36, %v3300_v21 }
 0x252   : >> { %vm1171_vm8 = vcmp.lt.f32.partialorder %v1114_v37, %v3300_v21  ;;  %v3332_v44 = vsel %vm1172_vm9, -10000.0, %v2361_v36 }
 0x253   : >> { %v3326_v41 = vsel %vm1171_vm8, -10000.0, %v1114_v37 }
 0x254   : >> { %1207 = vmax.xlane.f32.xlu1 %v3324_v40  ;;  %1209 = vmax.xlane.f32.xlu0 %v3326_v41  ;;  %v2364_v42 = vpop.f32.mrb[24].mxu1 }
 0x255   : >> { %v1124_v43 = vpop.f32.mrb[25].mxu1  ;;  %vm1174_vm11 = vcmp.lt.f32.partialorder %v2364_v42, %v3300_v21 }
 0x256   : >> { %vm1173_vm10 = vcmp.lt.f32.partialorder %v1124_v43, %v3300_v21  ;;  %v3340_v17 = vsel %vm1174_vm11, -10000.0, %v2364_v42 }
 0x257   : >> { %v3334_v45 = vsel %vm1173_vm10, -10000.0, %v1124_v43 }
 0x258   : >> { %1211 = vmax.xlane.f32.xlu1 %v3332_v44  ;;  %1213 = vmax.xlane.f32.xlu0 %v3334_v45  ;;  %v2367_v47 = vpop.f32.mrb[26].mxu1 }
 0x259   : >> { %v1134_v50 = vpop.f32.mrb[27].mxu1  ;;  %vm1176_vm13 = vcmp.lt.f32.partialorder %v2367_v47, %v3300_v21 }
 0x25a   : >> { %vm1175_vm12 = vcmp.lt.f32.partialorder %v1134_v50, %v3300_v21  ;;  %v3348_v28 = vsel %vm1176_vm13, -10000.0, %v2367_v47 }
 0x25b   : >> { %v3342_v49 = vsel %vm1175_vm12, -10000.0, %v1134_v50 }
 0x25c   : >> { %1215 = vmax.xlane.f32.xlu1 %v3340_v17  ;;  %1217 = vmax.xlane.f32.xlu0 %v3342_v49  ;;  %v2370_v22 = vpop.f32.mrb[28].mxu1 }
 0x25d   : >> { %v1144_v25 = vpop.f32.mrb[29].mxu1  ;;  %vm1178_vm15 = vcmp.lt.f32.partialorder %v2370_v22, %v3300_v21 }
 0x25e   : >> { %vm1177_vm14 = vcmp.lt.f32.partialorder %v1144_v25, %v3300_v21  ;;  %v3356_v48 = vsel %vm1178_vm15, -10000.0, %v2370_v22 }
 0x25f   : >> { %v3350_v38 = vsel %vm1177_vm14, -10000.0, %v1144_v25 }
 0x260   : >> { %1219 = vmax.xlane.f32.xlu1 %v3348_v28  ;;  %1221 = vmax.xlane.f32.xlu0 %v3350_v38  ;;  %v2373_v39 = vpop.f32.mrb[30].mxu1 }
 0x261   : >> { %v1154_v46 = vpop.f32.mrb[31].mxu1  ;;  %vm1180_vm2 = vcmp.lt.f32.partialorder %v2373_v39, %v3300_v21 }
 0x262   : >> { %vm1179_vm1 = vcmp.lt.f32.partialorder %v1154_v46, %v3300_v21  ;;  %v3363_v52 = vsel %vm1180_vm2, -10000.0, %v2373_v39 }
 0x263   : >> { %v3358_v51 = vsel %vm1179_vm1, -10000.0, %v1154_v46 }
 0x264   : >> { %1223 = vmax.xlane.f32.xlu1 %v3356_v48  ;;  %1225 = vmax.xlane.f32.xlu0 %v3358_v51 }
 0x267   : >> { %v2296_v61 = vpop.f32.mrb[16].mxu0 }
 0x268   : >> { %1227 = vmax.xlane.f32.xlu1 %v3363_v52  ;;  %v848_v0 = vadd.f32 %v2296_v61, %v3371_v58  ;;  %v842_v18 = vpop.f32.mrb[17].mxu0 }
 0x269   : >> { %v843_v21 = vadd.f32 %v3371_v58, %v842_v18 }
 0x26b   : >> { %v2299_v27 = vpop.f32.mrb[18].mxu0 }
 0x26c   : >> { %v852_v32 = vpop.f32.mrb[19].mxu0 }
 0x26d   : >> { %v853_v37 = vadd.f32 %v3371_v58, %v852_v32 }
 0x26f   : >> { %v2302_v43 = vpop.f32.mrb[20].mxu0 }
 0x270   : >> { %v868_v25 = vadd.f32 %v2302_v43, %v3371_v58  ;;  %v862_v39 = vpop.f32.mrb[21].mxu0 }
 0x2d5   : >> { %v1198_v53 = vpop.xlane.xlu0 %1197 }
 0x2d6   : >> { %v1229_v54 = vsub.f32 %v3303_v26, %v1198_v53  ;;  %v2614_v26 = vpack.c.bf16 %v848_v0, %v843_v21 }
 0x2d8   : >> { %v1245_v55 = vmul.f32 1.442695, %v1229_v54  ;;  %2615 = vmatprep.subr.bf16.mxu0 %v2614_v26  ;;  %2662 = vmatprep.subr.bf16.mxu1 %v2614_v26 }
 0x2d9   : >> { %v1200_v56 = vpop.xlane.xlu0 %1199  ;;  %v1202_v57 = vpop.xlane.xlu1 %1201  ;;  %2617 = vmatpush3.bf16.msra.mxu0 %v2614_v26  ;;  %2670 = vmatpush3.bf16.msra.mxu1 %v2614_v26 }
 0x2da   : >> { %2739 = vpow2.f32 %v1245_v55  ;;  %v1230_v59 = vsub.f32 %v3308_v30, %v1200_v56  ;;  %v1231_v60 = vsub.f32 %v3310_v31, %v1202_v57  ;;  %v858_v31 = vadd.f32 %v2299_v27, %v3371_v58  ;;  %v2305_v56 = vpop.f32.mrb[22].mxu0 }
 0x2db   : >> { %v878_v61 = vadd.f32 %v2305_v56, %v3371_v58 }
 0x2dc   : >> { %v1247_v62 = vmul.f32 1.442695, %v1230_v59  ;;  %v1249_v63 = vmul.f32 1.442695, %v1231_v60 }
 0x2dd   : >> { %v1204_v19 = vpop.xlane.xlu1 %1203  ;;  %v1206_v20 = vpop.xlane.xlu0 %1205 }
 0x2de   : >> { %2741 = vpow2.f32 %v1247_v62  ;;  %v1232_v23 = vsub.f32 %v3316_v34, %v1204_v19  ;;  %v1233_v24 = vsub.f32 %v3318_v35, %v1206_v20  ;;  %v2618_v35 = vpack.c.bf16 %v858_v31, %v853_v37  ;;  %v872_v62 = vpop.f32.mrb[23].mxu0 }
 0x2df   : >> { %2743 = vpow2.f32 %v1249_v63  ;;  %v2308_v21 = vpop.f32.mrb[24].mxu0 }
 0x2e0   : >> { %v1251_v29 = vmul.f32 1.442695, %v1232_v23  ;;  %v1253_v30 = vmul.f32 1.442695, %v1233_v24  ;;  %2619 = vmatprep.subr.bf16.mxu0 %v2618_v35  ;;  %2663 = vmatprep.subr.bf16.mxu1 %v2618_v35  ;;  %v888_v27 = vadd.f32 %v2308_v21, %v3371_v58 }
 0x2e1   : >> { %v1208_v33 = vpop.xlane.xlu1 %1207  ;;  %v1210_v36 = vpop.xlane.xlu0 %1209  ;;  %2621 = vmatpush3.bf16.msra.mxu0 %v2618_v35  ;;  %2671 = vmatpush3.bf16.msra.mxu1 %v2618_v35 }
 0x2e2   : >> { %2745 = vpow2.f32 %v1251_v29  ;;  %v1234_v42 = vsub.f32 %v3324_v40, %v1208_v33  ;;  %v1235_v34 = vsub.f32 %v3326_v41, %v1210_v36  ;;  %v863_v40 = vadd.f32 %v3371_v58, %v862_v39  ;;  %v882_v29 = vpop.f32.mrb[25].mxu0 }
 0x2e3   : >> { %2747 = vpow2.f32 %v1253_v30  ;;  %v2311_v37 = vpop.f32.mrb[26].mxu0 }
 0x2e4   : >> { %v3383_v47 = vpop.eup %2739  ;;  %v1255_v50 = vmul.f32 1.442695, %v1234_v42  ;;  %v1257_v22 = vmul.f32 1.442695, %v1235_v34  ;;  %v2622_v55 = vpack.c.bf16 %v868_v25, %v863_v40  ;;  %v898_v43 = vadd.f32 %v2311_v37, %v3371_v58 }
 0x2e5   : >> { %v1212_v46 = vpop.xlane.xlu1 %1211  ;;  %v1214_v53 = vpop.xlane.xlu0 %1213  ;;  %1277 = vadd.xlane.f32.xlu0 %v3383_v47 }
 0x2e6   : >> { %2749 = vpow2.f32 %v1255_v50  ;;  %v1236_v41 = vsub.f32 %v3332_v44, %v1212_v46  ;;  %v1237_v54 = vsub.f32 %v3334_v45, %v1214_v53  ;;  %v873_v44 = vadd.f32 %v3371_v58, %v872_v62  ;;  %2623 = vmatprep.subr.bf16.mxu0 %v2622_v55  ;;  %2664 = vmatprep.subr.bf16.mxu1 %v2622_v55  ;;  %v892_v50 = vpop.f32.mrb[27].mxu0 }
 0x2e7   : >> { %2751 = vpow2.f32 %v1257_v22  ;;  %2625 = vmatpush3.bf16.msra.mxu0 %v2622_v55  ;;  %2672 = vmatpush3.bf16.msra.mxu1 %v2622_v55  ;;  %v893_v25 = vadd.f32 %v3371_v58, %v892_v50  ;;  %v2314_v40 = vpop.f32.mrb[28].mxu0 }
 0x2e8   : >> { %v3390_v57 = vpop.eup %2741  ;;  %v1259_v59 = vmul.f32 1.442695, %v1236_v41  ;;  %v1261_v60 = vmul.f32 1.442695, %v1237_v54  ;;  %v2626_v20 = vpack.c.bf16 %v878_v61, %v873_v44  ;;  %v908_v56 = vadd.f32 %v2314_v40, %v3371_v58 }
 0x2e9   : >> { %v3393_v63 = vpop.eup %2743  ;;  %v1216_v0 = vpop.xlane.xlu1 %1215  ;;  %1279 = vadd.xlane.f32.xlu1 %v3390_v57  ;;  %v2634_v53 = vpack.c.bf16 %v898_v43, %v893_v25  ;;  %v1507_v25 = vld [vmem:[%s3456_s30 + $0x18] sm:$0xff] }
 0x2ea   : >> { %v1218_v18 = vpop.xlane.xlu0 %1217  ;;  %2753 = vpow2.f32 %v1259_v59  ;;  %v1238_v45 = vsub.f32 %v3340_v17, %v1216_v0  ;;  %1281 = vadd.xlane.f32.xlu0 %v3393_v63  ;;  %2627 = vmatprep.subr.bf16.mxu0 %v2626_v20  ;;  %v902_v59 = vpop.f32.mrb[29].mxu0 }
 0x2eb   : >> { %v1239_v19 = vsub.f32 %v3342_v49, %v1218_v18  ;;  %2755 = vpow2.f32 %v1261_v60  ;;  %v883_v49 = vadd.f32 %v3371_v58, %v882_v29  ;;  %2665 = vmatprep.subr.bf16.mxu1 %v2626_v20  ;;  %2629 = vmatpush3.bf16.msra.mxu0 %v2626_v20 }
 0x2ec   : >> { %v3400_v23 = vpop.eup %2745  ;;  %v1263_v24 = vmul.f32 1.442695, %v1238_v45  ;;  %2673 = vmatpush3.bf16.msra.mxu1 %v2626_v20  ;;  %v2317_v45 = vpop.f32.mrb[30].mxu0 }
 0x2ed   : >> { %v1265_v26 = vmul.f32 1.442695, %v1239_v19  ;;  %v3403_v30 = vpop.eup %2747  ;;  %v1220_v17 = vpop.xlane.xlu1 %1219  ;;  %1283 = vadd.xlane.f32.xlu1 %v3400_v23  ;;  %v2630_v36 = vpack.c.bf16 %v888_v27, %v883_v49  ;;  %v918_v19 = vadd.f32 %v2317_v45, %v3371_v58 }
 0x2ee   : >> { %v1222_v31 = vpop.xlane.xlu0 %1221  ;;  %2757 = vpow2.f32 %v1263_v24  ;;  %v1240_v32 = vsub.f32 %v3348_v28, %v1220_v17  ;;  %1285 = vadd.xlane.f32.xlu0 %v3403_v30  ;;  %v1504_v17 = vld [vmem:[%s3456_s30] sm:$0xff] }
 0x2ef   : >> { %v1241_v33 = vsub.f32 %v3350_v38, %v1222_v31  ;;  %2759 = vpow2.f32 %v1265_v26  ;;  %2631 = vmatprep.subr.bf16.mxu0 %v2630_v36  ;;  %2666 = vmatprep.subr.bf16.mxu1 %v2630_v36  ;;  %v1505_v31 = vld [vmem:[%s3456_s30 + $0x8] sm:$0xff] }
 0x2f0   : >> { %v3410_v42 = vpop.eup %2749  ;;  %v1267_v34 = vmul.f32 1.442695, %v1240_v32  ;;  %2633 = vmatpush3.bf16.msra.mxu0 %v2630_v36  ;;  %2674 = vmatpush3.bf16.msra.mxu1 %v2630_v36  ;;  %v2646_v49 = vpack.c.bf16 %v1505_v31, %v1504_v17 }
 0x2f1   : >> { %v1269_v35 = vmul.f32 1.442695, %v1241_v33  ;;  %v3413_v22 = vpop.eup %2751  ;;  %v1224_v28 = vpop.xlane.xlu1 %1223  ;;  %1287 = vadd.xlane.f32.xlu1 %v3410_v42  ;;  %2635 = vmatprep.subr.bf16.mxu0 %v2634_v53 }
 0x2f2   : >> { %v1226_v38 = vpop.xlane.xlu0 %1225  ;;  %2761 = vpow2.f32 %v1267_v34  ;;  %v1242_v39 = vsub.f32 %v3356_v48, %v1224_v28  ;;  %1289 = vadd.xlane.f32.xlu0 %v3413_v22  ;;  %2667 = vmatprep.subr.bf16.mxu1 %v2634_v53 }
 0x2f3   : >> { %v1243_v46 = vsub.f32 %v3358_v51, %v1226_v38  ;;  %2763 = vpow2.f32 %v1269_v35  ;;  %v903_v51 = vadd.f32 %v3371_v58, %v902_v59  ;;  %v1506_v38 = vld [vmem:[%s3456_s30 + $0x10] sm:$0xff]  ;;  %v1508_v59 = vld [vmem:[%s3456_s30 + $0x20] sm:$0xff] }
 0x2f4   : >> { %v3420_v41 = vpop.eup %2753  ;;  %v1271_v54 = vmul.f32 1.442695, %v1242_v39  ;;  %2637 = vmatpush3.bf16.msra.mxu0 %v2634_v53  ;;  %2675 = vmatpush3.bf16.msra.mxu1 %v2634_v53 }
 0x2f5   : >> { %v1273_v55 = vmul.f32 1.442695, %v1243_v46  ;;  %v3423_v60 = vpop.eup %2755  ;;  %1291 = vadd.xlane.f32.xlu1 %v3420_v41  ;;  %v1228_v48 = vpop.xlane.xlu1 %1227  ;;  %v2638_v62 = vpack.c.bf16 %v908_v56, %v903_v51 }
 0x2f6   : >> { %2765 = vpow2.f32 %v1271_v54  ;;  %v1244_v61 = vsub.f32 %v3363_v52, %v1228_v48  ;;  %1293 = vadd.xlane.f32.xlu0 %v3423_v60  ;;  %v912_v52 = vpop.f32.mrb[31].mxu0  ;;  %v2650_v54 = vpack.c.bf16 %v1507_v25, %v1506_v38 }
 0x2f7   : >> { %2767 = vpow2.f32 %v1273_v55  ;;  %2639 = vmatprep.subr.bf16.mxu0 %v2638_v62  ;;  %2668 = vmatprep.subr.bf16.mxu1 %v2638_v62  ;;  %v913_v20 = vadd.f32 %v3371_v58, %v912_v52  ;;  %v1511_v52 = vld [vmem:[%s3456_s30 + $0x38] sm:$0xff] }
 0x2f8   : >> { %v3429_v0 = vpop.eup %2757  ;;  %v1275_v18 = vmul.f32 1.442695, %v1244_v61  ;;  %2641 = vmatpush3.bf16.msra.mxu0 %v2638_v62  ;;  %2676 = vmatpush3.bf16.msra.mxu1 %v2638_v62 }
 0x2f9   : >> { %v3431_v44 = vpop.eup %2759  ;;  %1295 = vadd.xlane.f32.xlu1 %v3429_v0  ;;  %v2642_v26 = vpack.c.bf16 %v918_v19, %v913_v20 }
 0x2fa   : >> { %2769 = vpow2.f32 %v1275_v18  ;;  %1297 = vadd.xlane.f32.xlu0 %v3431_v44 }
 0x2fb   : >> { %2643 = vmatprep.subr.bf16.mxu0 %v2642_v26  ;;  %2669 = vmatprep.subr.bf16.mxu1 %v2642_v26 }
 0x2fc   : >> { %v3437_v21 = vpop.eup %2761  ;;  %2645 = vmatpush3.bf16.msra.mxu0 %v2642_v26  ;;  %2677 = vmatpush3.bf16.msra.mxu1 %v2642_v26 }
 0x2fd   : >> { %v3439_v24 = vpop.eup %2763  ;;  %1299 = vadd.xlane.f32.xlu1 %v3437_v21  ;;  %2647 = vmatprep.subr.bf16.mxu0 %v2646_v49 }
 0x2fe   : >> { %1301 = vadd.xlane.f32.xlu0 %v3439_v24 }
 0x300   : >> { %v3443_v27 = vpop.eup %2765 }
 0x301   : >> { %v3445_v29 = vpop.eup %2767  ;;  %1303 = vadd.xlane.f32.xlu1 %v3443_v27 }
 0x302   : >> { %1305 = vadd.xlane.f32.xlu0 %v3445_v29 }
 0x304   : >> { %v3449_v58 = vpop.eup %2769 }
 0x305   : >> { %1307 = vadd.xlane.f32.xlu1 %v3449_v58 }
 0x372   : >> { %v1278_v32 = vpop.xlane.xlu0 %1277 }
 0x373   : >> { %2771 = vrcp.f32 %v1278_v32 }
 0x376   : >> { %v1280_v33 = vpop.xlane.xlu1 %1279 }
 0x377   : >> { %2773 = vrcp.f32 %v1280_v33  ;;  %v1282_v36 = vpop.xlane.xlu0 %1281 }
 0x378   : >> { %2775 = vrcp.f32 %v1282_v36 }
 0x37a   : >> { %v1284_v37 = vpop.xlane.xlu1 %1283 }
 0x37b   : >> { %2777 = vrcp.f32 %v1284_v37  ;;  %v1286_v34 = vpop.xlane.xlu0 %1285 }
 0x37c   : >> { %2779 = vrcp.f32 %v1286_v34 }
 0x37d   : >> { %v2772_v35 = vpop.eup %2771 }
 0x37e   : >> { %v1288_v43 = vpop.xlane.xlu1 %1287  ;;  %v1325_v50 = vmul.f32 %v2772_v35, %v3383_v47  ;;  %v1509_v47 = vld [vmem:[%s3456_s30 + $0x28] sm:$0xff] }
 0x37f   : >> { %2781 = vrcp.f32 %v1288_v43  ;;  %v1290_v28 = vpop.xlane.xlu0 %1289 }
 0x380   : >> { %2783 = vrcp.f32 %v1290_v28  ;;  %2406 = vmatprep.mubr.f32.mxu0 %v1325_v50 }
 0x381   : >> { %v2774_v39 = vpop.eup %2773 }
 0x382   : >> { %v2776_v46 = vpop.eup %2775  ;;  %v1326_v53 = vmul.f32 %v2774_v39, %v3390_v57  ;;  %v1292_v40 = vpop.xlane.xlu1 %1291  ;;  %v2654_v57 = vpack.c.bf16 %v1509_v47, %v1508_v59 }
 0x383   : >> { %2785 = vrcp.f32 %v1292_v40  ;;  %v1294_v55 = vpop.xlane.xlu0 %1293  ;;  %v1327_v56 = vmul.f32 %v2776_v46, %v3393_v63  ;;  %v1510_v63 = vld [vmem:[%s3456_s30 + $0x30] sm:$0xff]  ;;  %s2896_s30 = smov (%p406_p9), [#allocation6]  }
 0x384   : >> { %2787 = vrcp.f32 %v1294_v55  ;;  %2407 = vmatmul.mubr.f32.vlgmr.msra.gmra.mrb[32].mxu0 %v1326_v53  ;;  %v2658_v31 = vpack.c.bf16 %v1511_v52, %v1510_v63  ;;  %s2822_s29 = sshll.u32 (%p406_p9), %s2896_s30, 4  ;;  %s2823_s29 = int_to_ptr.vmem [resolvable:$false] %s2822_s29 }
 0x385   : >> { %v2778_v48 = vpop.eup %2777  ;;  %2409 = vmatprep.mubr.f32.mxu0 %v1327_v56  ;;  %2649 = vmatpush3.bf16.msra.mxu0 %v2646_v49  ;;  %s2824_s18 = scalar_lea.vmem (%p406_p9), %s2823_s29, 4096  ;;  %p2825_p0 = scmp.lt.s32.totalorder (%p406_p9), %s3519_s12, %s2823_s29 }
 0x386   : >> { %v2780_v51 = vpop.eup %2779  ;;  %v1296_v61 = vpop.xlane.xlu1 %1295  ;;  %v1328_v62 = vmul.f32 %v2778_v48, %v3400_v23  ;;  %2651 = vmatprep.subr.bf16.mxu0 %v2650_v54  ;;  %p2826_p1 = scmp.lt.s32.totalorder (%p406_p9), %s2824_s18, %s2818_s26 }
 0x387   : >> { %2789 = vrcp.f32 %v1296_v61  ;;  %v1298_v18 = vpop.xlane.xlu0 %1297  ;;  %v1329_v45 = vmul.f32 %v2780_v51, %v3403_v30 }
 0x388   : >> { %2791 = vrcp.f32 %v1298_v18  ;;  %2410 = vmatmul.mubr.f32.gmra.mrb[34].mxu0 %v1328_v62  ;;  %v1487_v18 = vld [vmem:[#allocation2 + $0x8] sm:$0xff]  ;;  %p2827_p2 = por (%p406_p9), %p2826_p1, %p2825_p0 }
 0x389   : >> { %v2782_v19 = vpop.eup %2781  ;;  %2412 = vmatprep.mubr.f32.mxu0 %v1329_v45  ;;  %2653 = vmatpush3.bf16.msra.mxu0 %v2650_v54  ;;  %v1486_v45 = vld [vmem:[#allocation2] sm:$0xff] }
 0x38a   : >> { %v2784_v20 = vpop.eup %2783  ;;  %v1300_v26 = vpop.xlane.xlu1 %1299  ;;  %v1330_v17 = vmul.f32 %v2782_v19, %v3410_v42  ;;  %2655 = vmatprep.subr.bf16.mxu0 %v2654_v57  ;;  %p2828_p3 = pnand (%p406_p9), %p2827_p2, %p2821_p13 }
 0x38b   : >> { %2793 = vrcp.f32 %v1300_v26  ;;  %v1302_v23 = vpop.xlane.xlu0 %1301  ;;  %v1331_v49 = vmul.f32 %v2784_v20, %v3413_v22  ;;  %v1489_v26 = vld [vmem:[#allocation2 + $0x18] sm:$0xff] }
 0x38c   : >> { %2795 = vrcp.f32 %v1302_v23  ;;  %2413 = vmatmul.mubr.f32.gmra.mrb[36].mxu0 %v1330_v17  ;;  %v1488_v17 = vld [vmem:[#allocation2 + $0x10] sm:$0xff] }
 0x38d   : >> { %v2786_v30 = vpop.eup %2785  ;;  %2415 = vmatprep.mubr.f32.mxu0 %v1331_v49  ;;  %2657 = vmatpush3.bf16.msra.mxu0 %v2654_v57 }
 0x38e   : >> { %v2788_v32 = vpop.eup %2787  ;;  %v1304_v33 = vpop.xlane.xlu1 %1303  ;;  %v1332_v36 = vmul.f32 %v2786_v30, %v3420_v41  ;;  %2659 = vmatprep.subr.bf16.mxu0 %v2658_v31 }
 0x38f   : >> { %2797 = vrcp.f32 %v1304_v33  ;;  %v1306_v37 = vpop.xlane.xlu0 %1305  ;;  %v1333_v42 = vmul.f32 %v2788_v32, %v3423_v60  ;;  %v1491_v32 = vld [vmem:[#allocation2 + $0x28] sm:$0xff]  ;;  %v1490_v33 = vld [vmem:[#allocation2 + $0x20] sm:$0xff] }
 0x390   : >> { %2799 = vrcp.f32 %v1306_v37  ;;  %2416 = vmatmul.mubr.f32.gmra.mrb[38].mxu0 %v1332_v36 }
 0x391   : >> { %v2790_v34 = vpop.eup %2789  ;;  %2418 = vmatprep.mubr.f32.mxu1 %v1333_v42  ;;  %2661 = vmatpush3.bf16.msra.mxu0 %v2658_v31 }
 0x392   : >> { %v2792_v22 = vpop.eup %2791  ;;  %v1334_v35 = vmul.f32 %v2790_v34, %v3429_v0  ;;  %v1308_v43 = vpop.xlane.xlu1 %1307 }
 0x393   : >> { %2801 = vrcp.f32 %v1308_v43  ;;  %v1335_v50 = vmul.f32 %v2792_v22, %v3431_v44  ;;  %v1493_v22 = vld [vmem:[#allocation2 + $0x38] sm:$0xff] }
 0x394   : >> { %2419 = vmatmul.mubr.f32.vlgmr.msra.gmra.mrb[32].mxu1 %v1334_v35  ;;  %v1492_v35 = vld [vmem:[#allocation2 + $0x30] sm:$0xff] }
 0x395   : >> { %v2794_v28 = vpop.eup %2793  ;;  %2421 = vmatprep.mubr.f32.mxu1 %v1335_v50 }
 0x396   : >> { %v2796_v41 = vpop.eup %2795  ;;  %v1336_v38 = vmul.f32 %v2794_v28, %v3437_v21 }
 0x397   : >> { %v1337_v60 = vmul.f32 %v2796_v41, %v3439_v24 }
 0x398   : >> { %2422 = vmatmul.mubr.f32.gmra.mrb[34].mxu1 %v1336_v38  ;;  %v1495_v38 = vld [vmem:[#allocation2 + $0x48] sm:$0xff] }
 0x399   : >> { %v2798_v25 = vpop.eup %2797  ;;  %2424 = vmatprep.mubr.f32.mxu1 %v1337_v60  ;;  %v1494_v60 = vld [vmem:[#allocation2 + $0x40] sm:$0xff] }
 0x39a   : >> { %v2800_v39 = vpop.eup %2799  ;;  %v1338_v46 = vmul.f32 %v2798_v25, %v3443_v27 }
 0x39b   : >> { %v1339_v0 = vmul.f32 %v2800_v39, %v3445_v29 }
 0x39c   : >> { %2425 = vmatmul.mubr.f32.gmra.mrb[36].mxu1 %v1338_v46 }
 0x39d   : >> { %v2802_v53 = vpop.eup %2801  ;;  %2427 = vmatprep.mubr.f32.mxu1 %v1339_v0 }
 0x39e   : >> { %v1340_v44 = vmul.f32 %v2802_v53, %v3449_v58  ;;  %v1497_v53 = vld [vmem:[#allocation2 + $0x58] sm:$0xff] }
 0x3a0   : >> { %2428 = vmatmul.mubr.f32.gmra.mrb[38].mxu1 %v1340_v44  ;;  %v1496_v44 = vld [vmem:[#allocation2 + $0x50] sm:$0xff] }
 0x457   : >> { %v2408_v40 = vpop.f32.mrb[32].mxu0 }
 0x458   : >> { %v1407_v54 = vpop.f32.mrb[33].mxu0 }
 0x459   : >> { %2446 = vmatprep.mubr.msk.f32.mxu0 %vm921_vm0, %v1407_v54 }
 0x45a   : >> { %2447 = vmatmul.mubr.msk.f32.vlgmr.msra.gmra.mrb[40].mxu0 %vm921_vm0, %v2408_v40 }
 0x45b   : >> { %v2411_v21 = vpop.f32.mrb[34].mxu0 }
 0x45c   : >> { %v1417_v24 = vpop.f32.mrb[35].mxu0 }
 0x45d   : >> { %2449 = vmatprep.mubr.msk.f32.mxu0 %vm921_vm0, %v1417_v24 }
 0x45e   : >> { %2450 = vmatmul.mubr.msk.f32.gmra.mrb[42].mxu0 %vm921_vm0, %v2411_v21 }
 0x45f   : >> { %v2414_v27 = vpop.f32.mrb[36].mxu0 }
 0x460   : >> { %v1427_v29 = vpop.f32.mrb[37].mxu0 }
 0x461   : >> { %2452 = vmatprep.mubr.msk.f32.mxu0 %vm921_vm0, %v1427_v29  ;;  %v1498_v29 = vld [vmem:[#allocation2 + $0x60] sm:$0xff] }
 0x462   : >> { %2453 = vmatmul.mubr.msk.f32.gmra.mrb[44].mxu0 %vm921_vm0, %v2414_v27  ;;  %v1499_v27 = vld [vmem:[#allocation2 + $0x68] sm:$0xff] }
 0x463   : >> { %v2417_v58 = vpop.f32.mrb[38].mxu0 }
 0x464   : >> { %v1437_v55 = vpop.f32.mrb[39].mxu0 }
 0x465   : >> { %2455 = vmatprep.mubr.msk.f32.mxu0 %vm921_vm0, %v1437_v55 }
 0x466   : >> { %2456 = vmatmul.mubr.msk.f32.gmra.mrb[46].mxu0 %vm921_vm0, %v2417_v58 }
 0x467   : >> { %v2420_v56 = vpop.f32.mrb[32].mxu1 }
 0x468   : >> { %v1447_v59 = vpop.f32.mrb[33].mxu1 }
 0x469   : >> { %2458 = vmatprep.mubr.msk.f32.mxu0 %vm921_vm0, %v1447_v59 }
 0x46a   : >> { %2459 = vmatmul.mubr.msk.f32.gmra.mrb[48].mxu0 %vm921_vm0, %v2420_v56 }
 0x46b   : >> { %v2423_v47 = vpop.f32.mrb[34].mxu1 }
 0x46c   : >> { %v1457_v48 = vpop.f32.mrb[35].mxu1 }
 0x46d   : >> { %2461 = vmatprep.mubr.msk.f32.mxu0 %vm921_vm0, %v1457_v48  ;;  %v1500_v48 = vld [vmem:[#allocation2 + $0x70] sm:$0xff] }
 0x46e   : >> { %2462 = vmatmul.mubr.msk.f32.gmra.mrb[50].mxu0 %vm921_vm0, %v2423_v47  ;;  %v1501_v47 = vld [vmem:[#allocation2 + $0x78] sm:$0xff] }
 0x46f   : >> { %v2426_v51 = vpop.f32.mrb[36].mxu1 }
 0x470   : >> { %v1467_v61 = vpop.f32.mrb[37].mxu1 }
 0x471   : >> { %2464 = vmatprep.mubr.msk.f32.mxu0 %vm921_vm0, %v1467_v61 }
 0x472   : >> { %2465 = vmatmul.mubr.msk.f32.gmra.mrb[52].mxu0 %vm921_vm0, %v2426_v51 }
 0x473   : >> { %v2429_v62 = vpop.f32.mrb[38].mxu1 }
 0x474   : >> { %v1477_v57 = vpop.f32.mrb[39].mxu1 }
 0x475   : >> { %2467 = vmatprep.mubr.msk.f32.mxu0 %vm921_vm0, %v1477_v57 }
 0x476   : >> { %2468 = vmatmul.mubr.msk.f32.gmra.mrb[54].mxu0 %vm921_vm0, %v2429_v62 }
 0x52d   : >> { %v2448_v63 = vpop.f32.mrb[40].mxu0 }
 0x52e   : >> { %v1706_v52 = vadd.f32 %v2448_v63, %v1487_v18  ;;  %v1626_v19 = vpop.f32.mrb[41].mxu0 }
 0x52f   : >> { %v1705_v20 = vadd.f32 %v1626_v19, %v1486_v45  ;;  %v1958_v45 = vld [vmem:[%s3581_s9] ss:$0 sm:$0xff] (%p406_p9) }
 0x530   : >> { %1722 = vst [vmem:[#allocation2 + $0x8] sm:$0xff] %v1706_v52 }
 0x531   : >> { %1721 = vst [vmem:[#allocation2] sm:$0xff] %v1705_v20  ;;  %v2451_v31 = vpop.f32.mrb[42].mxu0 }
 0x532   : >> { %v1708_v23 = vadd.f32 %v2451_v31, %v1489_v26  ;;  %v1636_v49 = vpop.f32.mrb[43].mxu0 }
 0x533   : >> { %v1707_v30 = vadd.f32 %v1636_v49, %v1488_v17 }
 0x534   : >> { %1724 = vst [vmem:[#allocation2 + $0x18] sm:$0xff] %v1708_v23 }
 0x535   : >> { %1723 = vst [vmem:[#allocation2 + $0x10] sm:$0xff] %v1707_v30  ;;  %v2454_v36 = vpop.f32.mrb[44].mxu0 }
 0x536   : >> { %v1710_v37 = vadd.f32 %v2454_v36, %v1491_v32  ;;  %v1646_v42 = vpop.f32.mrb[45].mxu0 }
 0x537   : >> { %v1709_v34 = vadd.f32 %v1646_v42, %v1490_v33  ;;  %v1738_v63 = vld [vmem:[#allocation2 + $0x8] sm:$0xff] (%p406_p9) }
 0x538   : >> { %1726 = vst [vmem:[#allocation2 + $0x28] sm:$0xff] %v1710_v37  ;;  %v1737_v18 = vld [vmem:[#allocation2] sm:$0xff] (%p406_p9)  ;;  %v1761_v19 = vadd.f32 (%p406_p9), %v1958_v45, %v1738_v63 }
 0x539   : >> { %1725 = vst [vmem:[#allocation2 + $0x20] sm:$0xff] %v1709_v34  ;;  %v2457_v43 = vpop.f32.mrb[46].mxu0  ;;  %v1760_v52 = vadd.f32 (%p406_p9), %v1958_v45, %v1737_v18 }
 0x53a   : >> { %v1712_v50 = vadd.f32 %v2457_v43, %v1493_v22  ;;  %v1656_v28 = vpop.f32.mrb[47].mxu0  ;;  %1777 = vst [vmem:[%s3065_s27 + $0x8] sm:$0xff] (%p406_p9), %v1761_v19 }
 0x53b   : >> { %v1711_v41 = vadd.f32 %v1656_v28, %v1492_v35  ;;  %v1740_v26 = vld [vmem:[#allocation2 + $0x18] sm:$0xff] (%p406_p9)  ;;  %1776 = vst [vmem:[%s3065_s27] sm:$0xff] (%p406_p9), %v1760_v52 }
 0x53c   : >> { %1728 = vst [vmem:[#allocation2 + $0x38] sm:$0xff] %v1712_v50  ;;  %v1739_v20 = vld [vmem:[#allocation2 + $0x10] sm:$0xff] (%p406_p9)  ;;  %v1763_v23 = vadd.f32 (%p406_p9), %v1958_v45, %v1740_v26 }
 0x53d   : >> { %1727 = vst [vmem:[#allocation2 + $0x30] sm:$0xff] %v1711_v41  ;;  %v2460_v25 = vpop.f32.mrb[48].mxu0  ;;  %v1762_v31 = vadd.f32 (%p406_p9), %v1958_v45, %v1739_v20 }
 0x53e   : >> { %v1714_v39 = vadd.f32 %v2460_v25, %v1495_v38  ;;  %v1666_v46 = vpop.f32.mrb[49].mxu0  ;;  %1779 = vst [vmem:[%s3065_s27 + $0x18] sm:$0xff] (%p406_p9), %v1763_v23 }
 0x53f   : >> { %v1713_v0 = vadd.f32 %v1666_v46, %v1494_v60  ;;  %v1742_v1 = vld [vmem:[#allocation2 + $0x28] sm:$0xff] (%p406_p9)  ;;  %1778 = vst [vmem:[%s3065_s27 + $0x10] sm:$0xff] (%p406_p9), %v1762_v31 }
 0x540   : >> { %1730 = vst [vmem:[#allocation2 + $0x48] sm:$0xff] %v1714_v39  ;;  %v1741_v17 = vld [vmem:[#allocation2 + $0x20] sm:$0xff] (%p406_p9)  ;;  %v1765_v4 = vadd.f32 (%p406_p9), %v1958_v45, %v1742_v1 }
 0x541   : >> { %1729 = vst [vmem:[#allocation2 + $0x40] sm:$0xff] %v1713_v0  ;;  %v2463_v40 = vpop.f32.mrb[50].mxu0  ;;  %v1764_v49 = vadd.f32 (%p406_p9), %v1958_v45, %v1741_v17 }
 0x542   : >> { %v1716_v54 = vadd.f32 %v2463_v40, %v1497_v53  ;;  %v1676_v21 = vpop.f32.mrb[51].mxu0  ;;  %1781 = vst [vmem:[%s3065_s27 + $0x28] sm:$0xff] (%p406_p9), %v1765_v4 }
 0x543   : >> { %v1715_v24 = vadd.f32 %v1676_v21, %v1496_v44  ;;  %v1744_v3 = vld [vmem:[#allocation2 + $0x38] sm:$0xff] (%p406_p9)  ;;  %1780 = vst [vmem:[%s3065_s27 + $0x20] sm:$0xff] (%p406_p9), %v1764_v49 }
 0x544   : >> { %1732 = vst [vmem:[#allocation2 + $0x58] sm:$0xff] %v1716_v54  ;;  %v1743_v2 = vld [vmem:[#allocation2 + $0x30] sm:$0xff] (%p406_p9)  ;;  %v1767_v6 = vadd.f32 (%p406_p9), %v1958_v45, %v1744_v3 }
 0x545   : >> { %1731 = vst [vmem:[#allocation2 + $0x50] sm:$0xff] %v1715_v24  ;;  %v2466_v58 = vpop.f32.mrb[52].mxu0  ;;  %v1766_v5 = vadd.f32 (%p406_p9), %v1958_v45, %v1743_v2 }
 0x546   : >> { %v1718_v55 = vadd.f32 %v2466_v58, %v1499_v27  ;;  %v1686_v56 = vpop.f32.mrb[53].mxu0  ;;  %1783 = vst [vmem:[%s3065_s27 + $0x38] sm:$0xff] (%p406_p9), %v1767_v6 }
 0x547   : >> { %v1717_v59 = vadd.f32 %v1686_v56, %v1498_v29  ;;  %408 = sbr.rel (!%p406_p9) target bundleno = 51 (0x33), region = 114  ;;  %v1746_v8 = vld [vmem:[#allocation2 + $0x48] sm:$0xff] (%p406_p9)  ;;  %1782 = vst [vmem:[%s3065_s27 + $0x30] sm:$0xff] (%p406_p9), %v1766_v5 }
 0x548   : >> { %1734 = vst [vmem:[#allocation2 + $0x68] sm:$0xff] %v1718_v55  ;;  %v1745_v7 = vld [vmem:[#allocation2 + $0x40] sm:$0xff] (%p406_p9)  ;;  %v1769_v11 = vadd.f32 (%p406_p9), %v1958_v45, %v1746_v8 }
 0x549   : >> { %1733 = vst [vmem:[#allocation2 + $0x60] sm:$0xff] %v1717_v59  ;;  %v2469_v51 = vpop.f32.mrb[54].mxu0  ;;  %v1768_v10 = vadd.f32 (%p406_p9), %v1958_v45, %v1745_v7 }
 0x54a   : >> { %v1720_v61 = vadd.f32 %v2469_v51, %v1501_v47  ;;  %v1696_v62 = vpop.f32.mrb[55].mxu0  ;;  %1785 = vst [vmem:[%s3065_s27 + $0x48] sm:$0xff] (%p406_p9), %v1769_v11 }
 0x54b   : >> { %v1719_v57 = vadd.f32 %v1696_v62, %v1500_v48  ;;  %v1748_v13 = vld [vmem:[#allocation2 + $0x58] sm:$0xff] (%p406_p9)  ;;  %1784 = vst [vmem:[%s3065_s27 + $0x40] sm:$0xff] (%p406_p9), %v1768_v10 }
 0x54c   : >> { %1736 = vst [vmem:[#allocation2 + $0x78] sm:$0xff] %v1720_v61  ;;  %v1747_v9 = vld [vmem:[#allocation2 + $0x50] sm:$0xff] (%p406_p9)  ;;  %v1771_v16 = vadd.f32 (%p406_p9), %v1958_v45, %v1748_v13 }
 0x54d   : >> { %1735 = vst [vmem:[#allocation2 + $0x70] sm:$0xff] %v1719_v57  ;;  %v1770_v12 = vadd.f32 (%p406_p9), %v1958_v45, %v1747_v9 }
 0x54e   : > { %1787 = vst [vmem:[%s3065_s27 + $0x58] sm:$0xff] %v1771_v16 }
 0x54f   : > { %v1750_v15 = vld [vmem:[#allocation2 + $0x68] sm:$0xff]  ;;  %1786 = vst [vmem:[%s3065_s27 + $0x50] sm:$0xff] %v1770_v12 }
 0x550   : > { %v1749_v14 = vld [vmem:[#allocation2 + $0x60] sm:$0xff]  ;;  %v1773_v32 = vadd.f32 %v1958_v45, %v1750_v15 }
 0x551   : > { %v1772_v30 = vadd.f32 %v1958_v45, %v1749_v14 }
 0x552   : > { %1789 = vst [vmem:[%s3065_s27 + $0x68] sm:$0xff] %v1773_v32 }
 0x553   : > { %v1752_v36 = vld [vmem:[#allocation2 + $0x78] sm:$0xff]  ;;  %1788 = vst [vmem:[%s3065_s27 + $0x60] sm:$0xff] %v1772_v30 }
 0x554   : > { %v1751_v33 = vld [vmem:[#allocation2 + $0x70] sm:$0xff]  ;;  %v1775_v42 = vadd.f32 %v1958_v45, %v1752_v36 }
 0x555   : > { %v1774_v37 = vadd.f32 %v1958_v45, %v1751_v33 }
 0x556   : > { %1791 = vst [vmem:[%s3065_s27 + $0x78] sm:$0xff] %v1775_v42 }
 0x557   : > { %1790 = vst [vmem:[%s3065_s27 + $0x70] sm:$0xff] %v1774_v37 }
 0x558   : > { %2831 = shalt.err (!%p2828_p3)
}
 0x559   : > { %s2832_s11 = scalar_lea.hbm %s3517_s21, 2048  ;;  %s2836_s17 = scalar_lea.hbm %s3582_s10, 4096 }
 0x55a   : > { %p2833_p4 = scmp.ne.s32.totalorder %s3517_s21, %s2832_s11  ;;  %p2837_p11 = scmp.lt.u32.totalorder %s3517_s21, %s3582_s10 }
 0x55b   : > { %p2838_p9 = scmp.lt.u32.totalorder %s2836_s17, %s2832_s11  ;;  %p2840_p12 = scmp.lt.u32.totalorder %s2832_s11, %s3517_s21 }
 0x55c   : > { %p2834_p7 = pnand %p2833_p4, %p2992_p5 }
 0x55d   : > { %p2839_p10 = por %p2838_p9, %p2837_p11 }
 0x55e   : > { %p2835_p8 = pneg %p2834_p7 }
 0x55f   : > { %p2841_p13 = por %p2840_p12, %p2839_p10 }
 0x561   : > { %p2842_p0 = pnand %p2841_p13, %p2835_p8 }
 0x563   : > { %2845 = shalt.err (!%p2842_p0)
}
 0x564   : > { %s2897_s26 = smov 128   ;;  %s2898_s29 = smov 8  }
 0x565   : > { %2682 = dma.vmem_to_hbm [thread:$0]  (%p2992_p5), %s3519_s12, 2048, %s3517_s21, %s3531_s25, %s2897_s26, %s2897_s26, %s2898_s29  }
 0x566 PF: > { %p2694_p1 = scmp.ge.s32.totalorder %s2888_s16, 2  ;;  %s1821_s18 = sand.u32 1, %s2876_s13  }
 0x567   : > { %s1822_s11 = scalar_lea.sflag [#allocation4], %s1821_s18 }
 0x568   : > { %p2689_p2 = pnand %p2694_p1, %p2996_p6 }
 0x56a   : > { %2871 = dma.done.wait (!%p2689_p2), %s1822_s11, 2048  }
 0x56b   : > { %2873 = vsyncadd (!%p2689_p2), %s1822_s11, 4294965248  ;;  %p21_p3 = scmp.ge.s32.totalorder %s2979_s19, 4   ;;  %s3588_s13 = smov %s2880_s14 }
 0x56c   : > { %s3589_s14 = smov %s2884_s15  ;;  %s3590_s15 = smov %s2990_s22 }
 0x56d   : > { %s3591_s16 = smov %s2979_s19  ;;  %23 = sbr.rel (!%p21_p3) target bundleno = 4 (0x4), region = 125 }
 0x574   :  { %1827 = vsyncpa [#allocation4], 1 }
 0x575   :  { %1829 = vsyncpa [#allocation4 + $0x1], 1 }
 0x576   :  { %1830 = vsyncpa [#allocation5], 1 }
 0x577   :  { %1832 = vsyncpa [#allocation5 + $0x1], 1 }

</bundles_post_ra>
